<compile_context>
chip_gen: v7x
topology: tpu7x:2x2x1
jax: 0.10.0
libtpu: 0.0.40
codegen_flags: <defaults>
</compile_context>

<pallas_src>
import jax
import jax.numpy as jnp
from jax.experimental import pallas as pl
from jax.experimental.pallas import tpu as pltpu


# which original 3x3 kernel rows/cols (ky / kx) collapse onto each 2x2 tap,
# per output sub-grid parity (a or b) and tap offset (dy or dx).
_SEL = {(0, 0): (0,), (0, 1): (1, 2), (1, 0): (0, 1), (1, 1): (2,)}


def _upsample_conv_kernel(x_ref, w_ref, b_ref, out_ref, pad_ref):
    """One batch element: nearest-2x upsample + 3x3 conv in sub-pixel form.

    x_ref   : (1, H, W, C)     bf16 NHWC input slice
    w_ref   : (4, 4*C, C)      bf16 packed sub-pixel weights, sub-grid g = 2a+b
    b_ref   : (1, 4*C)         f32 bias tiled over the 4 sub-grids
    out_ref : (1, H*Wp, 4*C)   f32 sub-grid-major output slab (junk at col >= W)
    pad_ref : ((H+4)*Wp, C)    bf16 row-flattened zero-padded input scratch
    """
    _, H, W, C = x_ref.shape
    Wp = pad_ref.shape[0] // (H + 4)   # padded row pitch (W + 1)
    M = H * Wp                         # flattened output rows (incl. junk col)

    # --- stage the input into the flattened zero-padded scratch -------------
    # Row block k (Wp rows of pad_ref) holds x row (k - 2); blocks 0, 1, H+2,
    # H+3 and column W of every block form the zero border.  Only the border
    # is zeroed (the interior is fully overwritten every step).
    pad_ref[pl.ds(0, 2 * Wp), :] = jnp.zeros((2 * Wp, C), pad_ref.dtype)
    pad_ref[pl.ds((H + 2) * Wp, 2 * Wp), :] = jnp.zeros((2 * Wp, C), pad_ref.dtype)
    zero_tail = jnp.zeros((Wp - W, C), pad_ref.dtype)
    for i in range(H):
        base = (i + 2) * Wp
        pad_ref[pl.ds(base, W), :] = x_ref[0, i, :, :].astype(pad_ref.dtype)
        pad_ref[pl.ds(base + W, Wp - W), :] = zero_tail

    # --- 9 shifted taps: tap (r, c)[i*Wp + j] == X_pad[i + r, j + c] ---------
    taps = {}
    for r in range(3):
        for c in range(3):
            taps[(r, c)] = pad_ref[pl.ds((r + 1) * Wp + (c - 1), M), :]

    # --- 4 sub-grid 2x2 convs, each folded into a single K = 4*C matmul -----
    sub = []
    for (a, b) in ((0, 0), (0, 1), (1, 0), (1, 1)):
        g = 2 * a + b
        t = jnp.concatenate(
            [taps[(a + dy, b + dx)] for dy in (0, 1) for dx in (0, 1)], axis=1)
        sub.append(jnp.dot(t, w_ref[g], preferred_element_type=jnp.float32))

    res = jnp.concatenate(sub, axis=1) + b_ref[...]          # (M, 4*C) f32
    out_ref[0] = res.astype(out_ref.dtype)


def _pack_subpixel_weights(w_oihw, bias):
    """Fold the nearest-2x upsample into the 3x3 conv weights.

    Returns
      wpack : (4, 4*Cin, Cout) bf16 — for sub-grid g = 2a+b the K dim is the
              (dy, dx)-row-major concat of the combined 2x2 kernels.
      bias4 : (1, 4*Cout) f32 — bias tiled over the 4 sub-grids.
    """
    Cout, Cin = w_oihw.shape[0], w_oihw.shape[1]
    w = jnp.transpose(w_oihw, (2, 3, 1, 0)).astype(jnp.float32)  # (3,3,Cin,Cout)
    gblocks = []
    for a in (0, 1):
        for b in (0, 1):
            kblocks = []
            for dy in (0, 1):
                for dx in (0, 1):
                    acc = jnp.zeros((Cin, Cout), jnp.float32)
                    for ky in _SEL[(a, dy)]:
                        for kx in _SEL[(b, dx)]:
                            acc = acc + w[ky, kx]
                    kblocks.append(acc)
            gblocks.append(jnp.concatenate(kblocks, axis=0))      # (4*Cin, Cout)
    wpack = jnp.stack(gblocks, axis=0).astype(jnp.bfloat16)       # (4,4*Cin,Cout)
    bias4 = jnp.tile(bias.astype(jnp.float32), (4,)).reshape(1, 4 * Cout)
    return wpack, bias4


def upsample_forward(x_nchw, w_oihw, bias):
    """Upsample.forward: nearest 2x + Conv2d(C, C, 3, padding=1). NCHW in/out."""
    N, C, H, W = x_nchw.shape
    assert w_oihw.shape == (C, C, 3, 3)
    Wp = W + 1                      # one junk column per row absorbs the W padding
    M = H * Wp

    # TODO(synk): a real model should keep activations NHWC end-to-end; these
    # boundary transposes exist only to match the PyTorch NCHW interface.
    x_nhwc = jnp.transpose(x_nchw, (0, 2, 3, 1)).astype(jnp.bfloat16)
    wpack, bias4 = _pack_subpixel_weights(w_oihw, bias)

    est = (2 * H * W * C * 2            # double-buffered input block (bf16)
           + 2 * wpack.size * 2         # double-buffered packed weights
           + 2 * bias4.size * 4
           + 2 * M * 4 * C * 4          # double-buffered output block (f32)
           + (H + 4) * Wp * C * 2       # pad scratch
           + 9 * M * C * 2              # tap values
           + 4 * M * 4 * C * 2          # K-folded operands
           + 5 * M * 4 * C * 4)         # matmul results + final slab (generous)
    vmem_limit = int(min(max(2 * est, 32 * 1024 * 1024), 100 * 1024 * 1024))

    grid_spec = pltpu.PrefetchScalarGridSpec(
        num_scalar_prefetch=0,
        grid=(N,),
        in_specs=[
            pl.BlockSpec((1, H, W, C), lambda n: (n, 0, 0, 0)),
            # grid-invariant operands (constant index maps)
            pl.BlockSpec((4, 4 * C, C), lambda n: (0, 0, 0)),
            pl.BlockSpec((1, 4 * C), lambda n: (0, 0)),
        ],
        out_specs=pl.BlockSpec((1, M, 4 * C), lambda n: (n, 0, 0)),
        scratch_shapes=[pltpu.VMEM(((H + 4) * Wp, C), jnp.bfloat16)],
    )

    raw = pl.pallas_call(
        _upsample_conv_kernel,
        out_shape=jax.ShapeDtypeStruct((N, M, 4 * C), jnp.float32),
        grid_spec=grid_spec,
        compiler_params=pltpu.CompilerParams(
            dimension_semantics=("parallel",),
            vmem_limit_bytes=vmem_limit),
    )(x_nhwc, wpack, bias4)

    # raw[n, i*Wp + j, (2a + b)*C + c]  ==  out[n, c, 2i + a, 2j + b]
    out = raw.reshape(N, H, Wp, 2, 2, C)[:, :, :W]        # drop junk column
    out = jnp.transpose(out, (0, 5, 1, 3, 2, 4))          # (N, C, H, 2, W, 2)
    return out.reshape(N, C, 2 * H, 2 * W)


def _reference(x, w, b):
    """Pure-JAX NCHW reference mirroring the PyTorch module exactly."""
    up = jnp.repeat(jnp.repeat(x, 2, axis=2), 2, axis=3)    # nearest, scale 2
    y = jax.lax.conv_general_dilated(
        up, w, window_strides=(1, 1), padding=((1, 1), (1, 1)),
        dimension_numbers=("NCHW", "OIHW", "NCHW"))
    return y + b.reshape(1, -1, 1, 1)


if __name__ == "__main__":
    N, C, H, W = 2, 64, 16, 16

    key = jax.random.PRNGKey(0)
    kx, kw, kb = jax.random.split(key, 3)
    x = jax.random.normal(kx, (N, C, H, W), jnp.float32)
    w = 0.05 * jax.random.normal(kw, (C, C, 3, 3), jnp.float32)   # OIHW
    b = 0.05 * jax.random.normal(kb, (C,), jnp.float32)

    out = upsample_forward(x, w, b)
    out = jax.block_until_ready(out)

    ref = _reference(x, w, b)
    assert out.shape == ref.shape == (N, C, 2 * H, 2 * W)
    # bf16 matmul operands with f32 accumulation vs a pure-f32 reference.
    if not jnp.allclose(out, ref, atol=5e-2, rtol=5e-2):
        raise AssertionError(
            f"kernel/reference mismatch, max abs err = {jnp.max(jnp.abs(out - ref))}")

    print("KERNEL_OK")
</pallas_src>

<mosaic_0001>
module attributes {stable_mosaic.version = 11 : i64} {
  func.func @_upsample_conv_kernel(%arg0: i32, %arg1: memref<1x16x16x64xbf16, #tpu.memory_space<vmem>>, %arg2: memref<4x256x64xbf16, #tpu.memory_space<vmem>>, %arg3: memref<1x256xf32, #tpu.memory_space<vmem>>, %arg4: memref<1x272x256xf32, #tpu.memory_space<vmem>>, %arg5: memref<340x64xbf16, #tpu.memory_space<vmem>>) attributes {dimension_semantics = [#tpu.dimension_semantics<parallel>], iteration_bounds = array<i64: 2>, scalar_prefetch = 0 : i64, scratch_operands = 1 : i64, tpu.core_type = #tpu.core_type<tc>, window_params = [{transform_indices = @transform_0, window_bounds = array<i64: 1, 16, 16, 64>}, {pipeline_mode = #tpu.pipeline_mode<synchronous>, transform_indices = @transform_1, window_bounds = array<i64: 4, 256, 64>}, {pipeline_mode = #tpu.pipeline_mode<synchronous>, transform_indices = @transform_2, window_bounds = array<i64: 1, 256>}, {transform_indices = @transform_3, window_bounds = array<i64: 1, 272, 256>}]} {
    %cst = arith.constant 0.000000e+00 : bf16
    %0 = vector.broadcast %cst : bf16 to vector<34x64xbf16>
    %c0 = arith.constant 0 : index
    %c0_0 = arith.constant 0 : index
    %1 = vector.load %arg5[%c0, %c0_0] : memref<340x64xbf16, #tpu.memory_space<vmem>>, vector<34x64xbf16>
    tpu.vector_store %arg5[%c0, %c0_0], %0 {strides = array<i32>} : memref<340x64xbf16, #tpu.memory_space<vmem>>, vector<34x64xbf16>,
    %cst_1 = arith.constant 0.000000e+00 : bf16
    %2 = vector.broadcast %cst_1 : bf16 to vector<34x64xbf16>
    %c306 = arith.constant 306 : index
    %c0_2 = arith.constant 0 : index
    %3 = vector.load %arg5[%c306, %c0_2] : memref<340x64xbf16, #tpu.memory_space<vmem>>, vector<34x64xbf16>
    tpu.vector_store %arg5[%c306, %c0_2], %2 {strides = array<i32>} : memref<340x64xbf16, #tpu.memory_space<vmem>>, vector<34x64xbf16>,
    %cst_3 = arith.constant 0.000000e+00 : bf16
    %4 = vector.broadcast %cst_3 : bf16 to vector<1x64xbf16>
    %c0_4 = arith.constant 0 : index
    %c0_5 = arith.constant 0 : index
    %c0_6 = arith.constant 0 : index
    %c0_7 = arith.constant 0 : index
    %5 = vector.load %arg1[%c0_4, %c0_5, %c0_6, %c0_7] : memref<1x16x16x64xbf16, #tpu.memory_space<vmem>>, vector<1x1x16x64xbf16>
    %6 = vector.shape_cast %5 : vector<1x1x16x64xbf16> to vector<16x64xbf16>
    %c34 = arith.constant 34 : index
    %c0_8 = arith.constant 0 : index
    %7 = vector.load %arg5[%c34, %c0_8] : memref<340x64xbf16, #tpu.memory_space<vmem>>, vector<16x64xbf16>
    tpu.vector_store %arg5[%c34, %c0_8], %6 {strides = array<i32>} : memref<340x64xbf16, #tpu.memory_space<vmem>>, vector<16x64xbf16>,
    %c50 = arith.constant 50 : index
    %c0_9 = arith.constant 0 : index
    %8 = vector.load %arg5[%c50, %c0_9] : memref<340x64xbf16, #tpu.memory_space<vmem>>, vector<1x64xbf16>
    tpu.vector_store %arg5[%c50, %c0_9], %4 {strides = array<i32>} : memref<340x64xbf16, #tpu.memory_space<vmem>>, vector<1x64xbf16>,
    %c0_10 = arith.constant 0 : index
    %c1 = arith.constant 1 : index
    %c0_11 = arith.constant 0 : index
    %c0_12 = arith.constant 0 : index
    %9 = vector.load %arg1[%c0_10, %c1, %c0_11, %c0_12] : memref<1x16x16x64xbf16, #tpu.memory_space<vmem>>, vector<1x1x16x64xbf16>
    %10 = vector.shape_cast %9 : vector<1x1x16x64xbf16> to vector<16x64xbf16>
    %c51 = arith.constant 51 : index
    %c0_13 = arith.constant 0 : index
    %11 = vector.load %arg5[%c51, %c0_13] : memref<340x64xbf16, #tpu.memory_space<vmem>>, vector<16x64xbf16>
    tpu.vector_store %arg5[%c51, %c0_13], %10 {strides = array<i32>} : memref<340x64xbf16, #tpu.memory_space<vmem>>, vector<16x64xbf16>,
    %c67 = arith.constant 67 : index
    %c0_14 = arith.constant 0 : index
    %12 = vector.load %arg5[%c67, %c0_14] : memref<340x64xbf16, #tpu.memory_space<vmem>>, vector<1x64xbf16>
    tpu.vector_store %arg5[%c67, %c0_14], %4 {strides = array<i32>} : memref<340x64xbf16, #tpu.memory_space<vmem>>, vector<1x64xbf16>,
    %c0_15 = arith.constant 0 : index
    %c2 = arith.constant 2 : index
    %c0_16 = arith.constant 0 : index
    %c0_17 = arith.constant 0 : index
    %13 = vector.load %arg1[%c0_15, %c2, %c0_16, %c0_17] : memref<1x16x16x64xbf16, #tpu.memory_space<vmem>>, vector<1x1x16x64xbf16>
    %14 = vector.shape_cast %13 : vector<1x1x16x64xbf16> to vector<16x64xbf16>
    %c68 = arith.constant 68 : index
    %c0_18 = arith.constant 0 : index
    %15 = vector.load %arg5[%c68, %c0_18] : memref<340x64xbf16, #tpu.memory_space<vmem>>, vector<16x64xbf16>
    tpu.vector_store %arg5[%c68, %c0_18], %14 {strides = array<i32>} : memref<340x64xbf16, #tpu.memory_space<vmem>>, vector<16x64xbf16>,
    %c84 = arith.constant 84 : index
    %c0_19 = arith.constant 0 : index
    %16 = vector.load %arg5[%c84, %c0_19] : memref<340x64xbf16, #tpu.memory_space<vmem>>, vector<1x64xbf16>
    tpu.vector_store %arg5[%c84, %c0_19], %4 {strides = array<i32>} : memref<340x64xbf16, #tpu.memory_space<vmem>>, vector<1x64xbf16>,
    %c0_20 = arith.constant 0 : index
    %c3 = arith.constant 3 : index
    %c0_21 = arith.constant 0 : index
    %c0_22 = arith.constant 0 : index
    %17 = vector.load %arg1[%c0_20, %c3, %c0_21, %c0_22] : memref<1x16x16x64xbf16, #tpu.memory_space<vmem>>, vector<1x1x16x64xbf16>
    %18 = vector.shape_cast %17 : vector<1x1x16x64xbf16> to vector<16x64xbf16>
    %c85 = arith.constant 85 : index
    %c0_23 = arith.constant 0 : index
    %19 = vector.load %arg5[%c85, %c0_23] : memref<340x64xbf16, #tpu.memory_space<vmem>>, vector<16x64xbf16>
    tpu.vector_store %arg5[%c85, %c0_23], %18 {strides = array<i32>} : memref<340x64xbf16, #tpu.memory_space<vmem>>, vector<16x64xbf16>,
    %c101 = arith.constant 101 : index
    %c0_24 = arith.constant 0 : index
    %20 = vector.load %arg5[%c101, %c0_24] : memref<340x64xbf16, #tpu.memory_space<vmem>>, vector<1x64xbf16>
    tpu.vector_store %arg5[%c101, %c0_24], %4 {strides = array<i32>} : memref<340x64xbf16, #tpu.memory_space<vmem>>, vector<1x64xbf16>,
    %c0_25 = arith.constant 0 : index
    %c4 = arith.constant 4 : index
    %c0_26 = arith.constant 0 : index
    %c0_27 = arith.constant 0 : index
    %21 = vector.load %arg1[%c0_25, %c4, %c0_26, %c0_27] : memref<1x16x16x64xbf16, #tpu.memory_space<vmem>>, vector<1x1x16x64xbf16>
    %22 = vector.shape_cast %21 : vector<1x1x16x64xbf16> to vector<16x64xbf16>
    %c102 = arith.constant 102 : index
    %c0_28 = arith.constant 0 : index
    %23 = vector.load %arg5[%c102, %c0_28] : memref<340x64xbf16, #tpu.memory_space<vmem>>, vector<16x64xbf16>
    tpu.vector_store %arg5[%c102, %c0_28], %22 {strides = array<i32>} : memref<340x64xbf16, #tpu.memory_space<vmem>>, vector<16x64xbf16>,
    %c118 = arith.constant 118 : index
    %c0_29 = arith.constant 0 : index
    %24 = vector.load %arg5[%c118, %c0_29] : memref<340x64xbf16, #tpu.memory_space<vmem>>, vector<1x64xbf16>
    tpu.vector_store %arg5[%c118, %c0_29], %4 {strides = array<i32>} : memref<340x64xbf16, #tpu.memory_space<vmem>>, vector<1x64xbf16>,
    %c0_30 = arith.constant 0 : index
    %c5 = arith.constant 5 : index
    %c0_31 = arith.constant 0 : index
    %c0_32 = arith.constant 0 : index
    %25 = vector.load %arg1[%c0_30, %c5, %c0_31, %c0_32] : memref<1x16x16x64xbf16, #tpu.memory_space<vmem>>, vector<1x1x16x64xbf16>
    %26 = vector.shape_cast %25 : vector<1x1x16x64xbf16> to vector<16x64xbf16>
    %c119 = arith.constant 119 : index
    %c0_33 = arith.constant 0 : index
    %27 = vector.load %arg5[%c119, %c0_33] : memref<340x64xbf16, #tpu.memory_space<vmem>>, vector<16x64xbf16>
    tpu.vector_store %arg5[%c119, %c0_33], %26 {strides = array<i32>} : memref<340x64xbf16, #tpu.memory_space<vmem>>, vector<16x64xbf16>,
    %c135 = arith.constant 135 : index
    %c0_34 = arith.constant 0 : index
    %28 = vector.load %arg5[%c135, %c0_34] : memref<340x64xbf16, #tpu.memory_space<vmem>>, vector<1x64xbf16>
    tpu.vector_store %arg5[%c135, %c0_34], %4 {strides = array<i32>} : memref<340x64xbf16, #tpu.memory_space<vmem>>, vector<1x64xbf16>,
    %c0_35 = arith.constant 0 : index
    %c6 = arith.constant 6 : index
    %c0_36 = arith.constant 0 : index
    %c0_37 = arith.constant 0 : index
    %29 = vector.load %arg1[%c0_35, %c6, %c0_36, %c0_37] : memref<1x16x16x64xbf16, #tpu.memory_space<vmem>>, vector<1x1x16x64xbf16>
    %30 = vector.shape_cast %29 : vector<1x1x16x64xbf16> to vector<16x64xbf16>
    %c136 = arith.constant 136 : index
    %c0_38 = arith.constant 0 : index
    %31 = vector.load %arg5[%c136, %c0_38] : memref<340x64xbf16, #tpu.memory_space<vmem>>, vector<16x64xbf16>
    tpu.vector_store %arg5[%c136, %c0_38], %30 {strides = array<i32>} : memref<340x64xbf16, #tpu.memory_space<vmem>>, vector<16x64xbf16>,
    %c152 = arith.constant 152 : index
    %c0_39 = arith.constant 0 : index
    %32 = vector.load %arg5[%c152, %c0_39] : memref<340x64xbf16, #tpu.memory_space<vmem>>, vector<1x64xbf16>
    tpu.vector_store %arg5[%c152, %c0_39], %4 {strides = array<i32>} : memref<340x64xbf16, #tpu.memory_space<vmem>>, vector<1x64xbf16>,
    %c0_40 = arith.constant 0 : index
    %c7 = arith.constant 7 : index
    %c0_41 = arith.constant 0 : index
    %c0_42 = arith.constant 0 : index
    %33 = vector.load %arg1[%c0_40, %c7, %c0_41, %c0_42] : memref<1x16x16x64xbf16, #tpu.memory_space<vmem>>, vector<1x1x16x64xbf16>
    %34 = vector.shape_cast %33 : vector<1x1x16x64xbf16> to vector<16x64xbf16>
    %c153 = arith.constant 153 : index
    %c0_43 = arith.constant 0 : index
    %35 = vector.load %arg5[%c153, %c0_43] : memref<340x64xbf16, #tpu.memory_space<vmem>>, vector<16x64xbf16>
    tpu.vector_store %arg5[%c153, %c0_43], %34 {strides = array<i32>} : memref<340x64xbf16, #tpu.memory_space<vmem>>, vector<16x64xbf16>,
    %c169 = arith.constant 169 : index
    %c0_44 = arith.constant 0 : index
    %36 = vector.load %arg5[%c169, %c0_44] : memref<340x64xbf16, #tpu.memory_space<vmem>>, vector<1x64xbf16>
    tpu.vector_store %arg5[%c169, %c0_44], %4 {strides = array<i32>} : memref<340x64xbf16, #tpu.memory_space<vmem>>, vector<1x64xbf16>,
    %c0_45 = arith.constant 0 : index
    %c8 = arith.constant 8 : index
    %c0_46 = arith.constant 0 : index
    %c0_47 = arith.constant 0 : index
    %37 = vector.load %arg1[%c0_45, %c8, %c0_46, %c0_47] : memref<1x16x16x64xbf16, #tpu.memory_space<vmem>>, vector<1x1x16x64xbf16>
    %38 = vector.shape_cast %37 : vector<1x1x16x64xbf16> to vector<16x64xbf16>
    %c170 = arith.constant 170 : index
    %c0_48 = arith.constant 0 : index
    %39 = vector.load %arg5[%c170, %c0_48] : memref<340x64xbf16, #tpu.memory_space<vmem>>, vector<16x64xbf16>
    tpu.vector_store %arg5[%c170, %c0_48], %38 {strides = array<i32>} : memref<340x64xbf16, #tpu.memory_space<vmem>>, vector<16x64xbf16>,
    %c186 = arith.constant 186 : index
    %c0_49 = arith.constant 0 : index
    %40 = vector.load %arg5[%c186, %c0_49] : memref<340x64xbf16, #tpu.memory_space<vmem>>, vector<1x64xbf16>
    tpu.vector_store %arg5[%c186, %c0_49], %4 {strides = array<i32>} : memref<340x64xbf16, #tpu.memory_space<vmem>>, vector<1x64xbf16>,
    %c0_50 = arith.constant 0 : index
    %c9 = arith.constant 9 : index
    %c0_51 = arith.constant 0 : index
    %c0_52 = arith.constant 0 : index
    %41 = vector.load %arg1[%c0_50, %c9, %c0_51, %c0_52] : memref<1x16x16x64xbf16, #tpu.memory_space<vmem>>, vector<1x1x16x64xbf16>
    %42 = vector.shape_cast %41 : vector<1x1x16x64xbf16> to vector<16x64xbf16>
    %c187 = arith.constant 187 : index
    %c0_53 = arith.constant 0 : index
    %43 = vector.load %arg5[%c187, %c0_53] : memref<340x64xbf16, #tpu.memory_space<vmem>>, vector<16x64xbf16>
    tpu.vector_store %arg5[%c187, %c0_53], %42 {strides = array<i32>} : memref<340x64xbf16, #tpu.memory_space<vmem>>, vector<16x64xbf16>,
    %c203 = arith.constant 203 : index
    %c0_54 = arith.constant 0 : index
    %44 = vector.load %arg5[%c203, %c0_54] : memref<340x64xbf16, #tpu.memory_space<vmem>>, vector<1x64xbf16>
    tpu.vector_store %arg5[%c203, %c0_54], %4 {strides = array<i32>} : memref<340x64xbf16, #tpu.memory_space<vmem>>, vector<1x64xbf16>,
    %c0_55 = arith.constant 0 : index
    %c10 = arith.constant 10 : index
    %c0_56 = arith.constant 0 : index
    %c0_57 = arith.constant 0 : index
    %45 = vector.load %arg1[%c0_55, %c10, %c0_56, %c0_57] : memref<1x16x16x64xbf16, #tpu.memory_space<vmem>>, vector<1x1x16x64xbf16>
    %46 = vector.shape_cast %45 : vector<1x1x16x64xbf16> to vector<16x64xbf16>
    %c204 = arith.constant 204 : index
    %c0_58 = arith.constant 0 : index
    %47 = vector.load %arg5[%c204, %c0_58] : memref<340x64xbf16, #tpu.memory_space<vmem>>, vector<16x64xbf16>
    tpu.vector_store %arg5[%c204, %c0_58], %46 {strides = array<i32>} : memref<340x64xbf16, #tpu.memory_space<vmem>>, vector<16x64xbf16>,
    %c220 = arith.constant 220 : index
    %c0_59 = arith.constant 0 : index
    %48 = vector.load %arg5[%c220, %c0_59] : memref<340x64xbf16, #tpu.memory_space<vmem>>, vector<1x64xbf16>
    tpu.vector_store %arg5[%c220, %c0_59], %4 {strides = array<i32>} : memref<340x64xbf16, #tpu.memory_space<vmem>>, vector<1x64xbf16>,
    %c0_60 = arith.constant 0 : index
    %c11 = arith.constant 11 : index
    %c0_61 = arith.constant 0 : index
    %c0_62 = arith.constant 0 : index
    %49 = vector.load %arg1[%c0_60, %c11, %c0_61, %c0_62] : memref<1x16x16x64xbf16, #tpu.memory_space<vmem>>, vector<1x1x16x64xbf16>
    %50 = vector.shape_cast %49 : vector<1x1x16x64xbf16> to vector<16x64xbf16>
    %c221 = arith.constant 221 : index
    %c0_63 = arith.constant 0 : index
    %51 = vector.load %arg5[%c221, %c0_63] : memref<340x64xbf16, #tpu.memory_space<vmem>>, vector<16x64xbf16>
    tpu.vector_store %arg5[%c221, %c0_63], %50 {strides = array<i32>} : memref<340x64xbf16, #tpu.memory_space<vmem>>, vector<16x64xbf16>,
    %c237 = arith.constant 237 : index
    %c0_64 = arith.constant 0 : index
    %52 = vector.load %arg5[%c237, %c0_64] : memref<340x64xbf16, #tpu.memory_space<vmem>>, vector<1x64xbf16>
    tpu.vector_store %arg5[%c237, %c0_64], %4 {strides = array<i32>} : memref<340x64xbf16, #tpu.memory_space<vmem>>, vector<1x64xbf16>,
    %c0_65 = arith.constant 0 : index
    %c12 = arith.constant 12 : index
    %c0_66 = arith.constant 0 : index
    %c0_67 = arith.constant 0 : index
    %53 = vector.load %arg1[%c0_65, %c12, %c0_66, %c0_67] : memref<1x16x16x64xbf16, #tpu.memory_space<vmem>>, vector<1x1x16x64xbf16>
    %54 = vector.shape_cast %53 : vector<1x1x16x64xbf16> to vector<16x64xbf16>
    %c238 = arith.constant 238 : index
    %c0_68 = arith.constant 0 : index
    %55 = vector.load %arg5[%c238, %c0_68] : memref<340x64xbf16, #tpu.memory_space<vmem>>, vector<16x64xbf16>
    tpu.vector_store %arg5[%c238, %c0_68], %54 {strides = array<i32>} : memref<340x64xbf16, #tpu.memory_space<vmem>>, vector<16x64xbf16>,
    %c254 = arith.constant 254 : index
    %c0_69 = arith.constant 0 : index
    %56 = vector.load %arg5[%c254, %c0_69] : memref<340x64xbf16, #tpu.memory_space<vmem>>, vector<1x64xbf16>
    tpu.vector_store %arg5[%c254, %c0_69], %4 {strides = array<i32>} : memref<340x64xbf16, #tpu.memory_space<vmem>>, vector<1x64xbf16>,
    %c0_70 = arith.constant 0 : index
    %c13 = arith.constant 13 : index
    %c0_71 = arith.constant 0 : index
    %c0_72 = arith.constant 0 : index
    %57 = vector.load %arg1[%c0_70, %c13, %c0_71, %c0_72] : memref<1x16x16x64xbf16, #tpu.memory_space<vmem>>, vector<1x1x16x64xbf16>
    %58 = vector.shape_cast %57 : vector<1x1x16x64xbf16> to vector<16x64xbf16>
    %c255 = arith.constant 255 : index
    %c0_73 = arith.constant 0 : index
    %59 = vector.load %arg5[%c255, %c0_73] : memref<340x64xbf16, #tpu.memory_space<vmem>>, vector<16x64xbf16>
    tpu.vector_store %arg5[%c255, %c0_73], %58 {strides = array<i32>} : memref<340x64xbf16, #tpu.memory_space<vmem>>, vector<16x64xbf16>,
    %c271 = arith.constant 271 : index
    %c0_74 = arith.constant 0 : index
    %60 = vector.load %arg5[%c271, %c0_74] : memref<340x64xbf16, #tpu.memory_space<vmem>>, vector<1x64xbf16>
    tpu.vector_store %arg5[%c271, %c0_74], %4 {strides = array<i32>} : memref<340x64xbf16, #tpu.memory_space<vmem>>, vector<1x64xbf16>,
    %c0_75 = arith.constant 0 : index
    %c14 = arith.constant 14 : index
    %c0_76 = arith.constant 0 : index
    %c0_77 = arith.constant 0 : index
    %61 = vector.load %arg1[%c0_75, %c14, %c0_76, %c0_77] : memref<1x16x16x64xbf16, #tpu.memory_space<vmem>>, vector<1x1x16x64xbf16>
    %62 = vector.shape_cast %61 : vector<1x1x16x64xbf16> to vector<16x64xbf16>
    %c272 = arith.constant 272 : index
    %c0_78 = arith.constant 0 : index
    %63 = vector.load %arg5[%c272, %c0_78] : memref<340x64xbf16, #tpu.memory_space<vmem>>, vector<16x64xbf16>
    tpu.vector_store %arg5[%c272, %c0_78], %62 {strides = array<i32>} : memref<340x64xbf16, #tpu.memory_space<vmem>>, vector<16x64xbf16>,
    %c288 = arith.constant 288 : index
    %c0_79 = arith.constant 0 : index
    %64 = vector.load %arg5[%c288, %c0_79] : memref<340x64xbf16, #tpu.memory_space<vmem>>, vector<1x64xbf16>
    tpu.vector_store %arg5[%c288, %c0_79], %4 {strides = array<i32>} : memref<340x64xbf16, #tpu.memory_space<vmem>>, vector<1x64xbf16>,
    %c0_80 = arith.constant 0 : index
    %c15 = arith.constant 15 : index
    %c0_81 = arith.constant 0 : index
    %c0_82 = arith.constant 0 : index
    %65 = vector.load %arg1[%c0_80, %c15, %c0_81, %c0_82] : memref<1x16x16x64xbf16, #tpu.memory_space<vmem>>, vector<1x1x16x64xbf16>
    %66 = vector.shape_cast %65 : vector<1x1x16x64xbf16> to vector<16x64xbf16>
    %c289 = arith.constant 289 : index
    %c0_83 = arith.constant 0 : index
    %67 = vector.load %arg5[%c289, %c0_83] : memref<340x64xbf16, #tpu.memory_space<vmem>>, vector<16x64xbf16>
    tpu.vector_store %arg5[%c289, %c0_83], %66 {strides = array<i32>} : memref<340x64xbf16, #tpu.memory_space<vmem>>, vector<16x64xbf16>,
    %c305 = arith.constant 305 : index
    %c0_84 = arith.constant 0 : index
    %68 = vector.load %arg5[%c305, %c0_84] : memref<340x64xbf16, #tpu.memory_space<vmem>>, vector<1x64xbf16>
    tpu.vector_store %arg5[%c305, %c0_84], %4 {strides = array<i32>} : memref<340x64xbf16, #tpu.memory_space<vmem>>, vector<1x64xbf16>,
    %c16 = arith.constant 16 : index
    %c0_85 = arith.constant 0 : index
    %69 = vector.load %arg5[%c16, %c0_85] : memref<340x64xbf16, #tpu.memory_space<vmem>>, vector<272x64xbf16>
    %c17 = arith.constant 17 : index
    %c0_86 = arith.constant 0 : index
    %70 = vector.load %arg5[%c17, %c0_86] : memref<340x64xbf16, #tpu.memory_space<vmem>>, vector<272x64xbf16>
    %c18 = arith.constant 18 : index
    %c0_87 = arith.constant 0 : index
    %71 = vector.load %arg5[%c18, %c0_87] : memref<340x64xbf16, #tpu.memory_space<vmem>>, vector<272x64xbf16>
    %c33 = arith.constant 33 : index
    %c0_88 = arith.constant 0 : index
    %72 = vector.load %arg5[%c33, %c0_88] : memref<340x64xbf16, #tpu.memory_space<vmem>>, vector<272x64xbf16>
    %c34_89 = arith.constant 34 : index
    %c0_90 = arith.constant 0 : index
    %73 = vector.load %arg5[%c34_89, %c0_90] : memref<340x64xbf16, #tpu.memory_space<vmem>>, vector<272x64xbf16>
    %c35 = arith.constant 35 : index
    %c0_91 = arith.constant 0 : index
    %74 = vector.load %arg5[%c35, %c0_91] : memref<340x64xbf16, #tpu.memory_space<vmem>>, vector<272x64xbf16>
    %c50_92 = arith.constant 50 : index
    %c0_93 = arith.constant 0 : index
    %75 = vector.load %arg5[%c50_92, %c0_93] : memref<340x64xbf16, #tpu.memory_space<vmem>>, vector<272x64xbf16>
    %c51_94 = arith.constant 51 : index
    %c0_95 = arith.constant 0 : index
    %76 = vector.load %arg5[%c51_94, %c0_95] : memref<340x64xbf16, #tpu.memory_space<vmem>>, vector<272x64xbf16>
    %c52 = arith.constant 52 : index
    %c0_96 = arith.constant 0 : index
    %77 = vector.load %arg5[%c52, %c0_96] : memref<340x64xbf16, #tpu.memory_space<vmem>>, vector<272x64xbf16>
    %78 = tpu.concatenate %69, %70, %72, %73 in 1 : vector<272x64xbf16>, vector<272x64xbf16>, vector<272x64xbf16>, vector<272x64xbf16> -> vector<272x256xbf16>
    %c0_97 = arith.constant 0 : index
    %c0_98 = arith.constant 0 : index
    %c0_99 = arith.constant 0 : index
    %79 = vector.load %arg2[%c0_97, %c0_98, %c0_99] : memref<4x256x64xbf16, #tpu.memory_space<vmem>>, vector<1x256x64xbf16>
    %80 = vector.shape_cast %79 : vector<1x256x64xbf16> to vector<256x64xbf16>
    %cst_100 = arith.constant dense<0.000000e+00> : vector<272x64xf32>
    %81 = tpu.matmul %78, %80, %cst_100 {dimension_numbers = #tpu.dot_dimension_numbers<[1], [0], [0], [1], [0, 0, 1, 1], [], []>} : vector<272x256xbf16>, vector<256x64xbf16>, vector<272x64xf32> -> vector<272x64xf32>
    %82 = tpu.concatenate %70, %71, %73, %74 in 1 : vector<272x64xbf16>, vector<272x64xbf16>, vector<272x64xbf16>, vector<272x64xbf16> -> vector<272x256xbf16>
    %c1_101 = arith.constant 1 : index
    %c0_102 = arith.constant 0 : index
    %c0_103 = arith.constant 0 : index
    %83 = vector.load %arg2[%c1_101, %c0_102, %c0_103] : memref<4x256x64xbf16, #tpu.memory_space<vmem>>, vector<1x256x64xbf16>
    %84 = vector.shape_cast %83 : vector<1x256x64xbf16> to vector<256x64xbf16>
    %cst_104 = arith.constant dense<0.000000e+00> : vector<272x64xf32>
    %85 = tpu.matmul %82, %84, %cst_104 {dimension_numbers = #tpu.dot_dimension_numbers<[1], [0], [0], [1], [0, 0, 1, 1], [], []>} : vector<272x256xbf16>, vector<256x64xbf16>, vector<272x64xf32> -> vector<272x64xf32>
    %86 = tpu.concatenate %72, %73, %75, %76 in 1 : vector<272x64xbf16>, vector<272x64xbf16>, vector<272x64xbf16>, vector<272x64xbf16> -> vector<272x256xbf16>
    %c2_105 = arith.constant 2 : index
    %c0_106 = arith.constant 0 : index
    %c0_107 = arith.constant 0 : index
    %87 = vector.load %arg2[%c2_105, %c0_106, %c0_107] : memref<4x256x64xbf16, #tpu.memory_space<vmem>>, vector<1x256x64xbf16>
    %88 = vector.shape_cast %87 : vector<1x256x64xbf16> to vector<256x64xbf16>
    %cst_108 = arith.constant dense<0.000000e+00> : vector<272x64xf32>
    %89 = tpu.matmul %86, %88, %cst_108 {dimension_numbers = #tpu.dot_dimension_numbers<[1], [0], [0], [1], [0, 0, 1, 1], [], []>} : vector<272x256xbf16>, vector<256x64xbf16>, vector<272x64xf32> -> vector<272x64xf32>
    %90 = tpu.concatenate %73, %74, %76, %77 in 1 : vector<272x64xbf16>, vector<272x64xbf16>, vector<272x64xbf16>, vector<272x64xbf16> -> vector<272x256xbf16>
    %c3_109 = arith.constant 3 : index
    %c0_110 = arith.constant 0 : index
    %c0_111 = arith.constant 0 : index
    %91 = vector.load %arg2[%c3_109, %c0_110, %c0_111] : memref<4x256x64xbf16, #tpu.memory_space<vmem>>, vector<1x256x64xbf16>
    %92 = vector.shape_cast %91 : vector<1x256x64xbf16> to vector<256x64xbf16>
    %cst_112 = arith.constant dense<0.000000e+00> : vector<272x64xf32>
    %93 = tpu.matmul %90, %92, %cst_112 {dimension_numbers = #tpu.dot_dimension_numbers<[1], [0], [0], [1], [0, 0, 1, 1], [], []>} : vector<272x256xbf16>, vector<256x64xbf16>, vector<272x64xf32> -> vector<272x64xf32>
    %94 = tpu.concatenate %81, %85, %89, %93 in 1 : vector<272x64xf32>, vector<272x64xf32>, vector<272x64xf32>, vector<272x64xf32> -> vector<272x256xf32>
    %c0_113 = arith.constant 0 : index
    %c0_114 = arith.constant 0 : index
    %95 = vector.load %arg3[%c0_113, %c0_114] : memref<1x256xf32, #tpu.memory_space<vmem>>, vector<1x256xf32>
    %96 = vector.broadcast %95 : vector<1x256xf32> to vector<272x256xf32>
    %97 = arith.addf %94, %96 : vector<272x256xf32>
    %c0_115 = arith.constant 0 : index
    %c0_116 = arith.constant 0 : index
    %c0_117 = arith.constant 0 : index
    %98 = vector.load %arg4[%c0_115, %c0_116, %c0_117] : memref<1x272x256xf32, #tpu.memory_space<vmem>>, vector<1x272x256xf32>
    %99 = vector.shape_cast %98 : vector<1x272x256xf32> to vector<272x256xf32>
    %100 = vector.shape_cast %97 : vector<272x256xf32> to vector<1x272x256xf32>
    tpu.vector_store %arg4[%c0_115, %c0_116, %c0_117], %100 {strides = array<i32>} : memref<1x272x256xf32, #tpu.memory_space<vmem>>, vector<1x272x256xf32>,
    return
  }
  func.func @transform_0(%arg0: i32) -> (i32, i32, i32, i32) {
    %c0_i32 = arith.constant 0 : i32
    %c0_i32_0 = arith.constant 0 : i32
    %c0_i32_1 = arith.constant 0 : i32
    %c0_i32_2 = arith.constant 0 : i32
    return %arg0, %c0_i32, %c0_i32_0, %c0_i32_1 : i32, i32, i32, i32
  }
  func.func @transform_1(%arg0: i32) -> (i32, i32, i32) {
    %c0_i32 = arith.constant 0 : i32
    %c0_i32_0 = arith.constant 0 : i32
    %c0_i32_1 = arith.constant 0 : i32
    %c0_i32_2 = arith.constant 0 : i32
    return %c0_i32, %c0_i32_0, %c0_i32_1 : i32, i32, i32
  }
  func.func @transform_2(%arg0: i32) -> (i32, i32) {
    %c0_i32 = arith.constant 0 : i32
    %c0_i32_0 = arith.constant 0 : i32
    %c0_i32_1 = arith.constant 0 : i32
    return %c0_i32, %c0_i32_0 : i32, i32
  }
  func.func @transform_3(%arg0: i32) -> (i32, i32, i32) {
    %c0_i32 = arith.constant 0 : i32
    %c0_i32_0 = arith.constant 0 : i32
    %c0_i32_1 = arith.constant 0 : i32
    return %arg0, %c0_i32, %c0_i32_0 : i32, i32, i32
  }
}

</mosaic_0001>

<bundles_post_ra>
// kernel: tpu_custom_call.1
= control target key start
LH: loop header
LB: loop body
LE: loop exit
PB: predicated region body
PF: predicated region fallthrough
CT: control target
= control target key end

     0   :  { %8 = vsyncpa [#allocation4], 0  ;;  %s6130_s0 = inlined_call_operand.vmem [shape: bf16[2,16,16,64], index: 0, kind: input, shape index: {}]   ;;  %s6131_s1 = inlined_call_operand.vmem [shape: bf16[4,256,64], index: 1, kind: input, shape index: {}]   ;;  %s6132_s2 = inlined_call_operand.vmem [shape: f32[1,256], index: 2, kind: input, shape index: {}]   ;;  %s6133_s3 = inlined_call_operand.hbm [shape: f32[2,272,256], index: 3, kind: output, shape index: {}]  }
   0x1   :  { %10 = vsyncpa [#allocation4 + $0x1], 0  ;;  %s4029_s12 = smov 0   ;;  %s4031_s13 = smov 0  }
   0x2   :  { %s4033_s14 = smov 0   ;;  %s4035_s15 = smov 0  }
   0x3 LB: > { %s4050_s16 = sadd.s32 4294967295, %s4002_s15   ;;  %s3559_s17 = sadd.s32 4294967294, %s4002_s15   ;;  %s4002_s15 = sphi %s4035_s15, %s6433_s15   ;;  %s3998_s14 = sphi %s4033_s14, %s6432_s14   ;;  %s3994_s13 = sphi %s4031_s13, %s6431_s13   ;;  %s3990_s12 = sphi %s4029_s12, %s6430_s12  }
   0x4   : > { %s4054_s18 = sadd.s32 1, %s4002_s15   ;;  %s91_s19 = sadd.s32 1, %s3998_s14 }
   0x5   : > { %s88_s20 = ssub.s32 %s4002_s15, %s4054_s18  ;;  %p101_p0 = scmp.ne.s32.totalorder %s3998_s14, %s3994_s13 }
   0x6   : > { %p89_p1 = scmp.eq.s32.totalorder %s88_s20, 0  ;;  %p102_p2 = scmp.eq.s32.totalorder %s4050_s16, 1 }
   0x7   : > { %p107_p3 = scmp.ne.s32.totalorder %s3994_s13, %s3990_s12  ;;  %p108_p4 = scmp.eq.s32.totalorder %s3559_s17, 1 }
   0x8   : > { %s4065_s21 = scalar_select %p89_p1, %s3998_s14, %s91_s19  }
   0x9   : > { %p4067_p5 = por %p102_p2, %p101_p0  ;;  %p4071_p6 = por %p108_p4, %p107_p3 }
   0xa   : > { %p3562_p7 = scmp.ge.s32.totalorder %s4002_s15, 1  ;;  %p140_p8 = scmp.lt.s32.totalorder %s4002_s15, 3 }
   0xc   : > { %p141_p9 = pnand %p3562_p7, %p140_p8 }
   0xe   : > { %144 = sbr.rel (%p141_p9) target bundleno = 813 (0x32d), region = 32 }
  0x15   : > { %p164_p10 = scmp.lt.s32.totalorder %s4050_s16, 1  ;;  %vm6140_vm0 = vcmask 519168   ;;  %vm6136_vm1 = vcmask 516096   ;;  %vm6135_vm2 = vcmask 519169   ;;  %vm6134_vm3 = vcmask 517121   ;;  %v3852_v1 = vld [vmem:[%s6131_s1 + $0x80] sm:$0xff]  }
  0x16   : > { %vm203_vm4 = vsmask.f32 1280  ;;  %v6164_v0 = vmov 0   ;;  %v205_v2 = vld [vmem:[#allocation2 + $0x18] sm:$0x2]  ;;  %vm188_vm5 = vcmask 1040384  }
  0x17   : > { %173 = vst.msk [vmem:[#allocation2 + $0x8] sm:$0xf] %vm6140_vm0, %v6164_v0  ;;  %174 = vst.msk [vmem:[#allocation2 + $0xc] sm:$0xf] %vm6140_vm0, %v6164_v0  ;;  %1915 = vmatprep.subr.bf16.mxu1 %v6164_v0  ;;  %1292 = vmatprep.subr.bf16.mxu0 %v6164_v0  ;;  %s165_s26 = scalar_select %p164_p10, %s4050_s16, 1  ;;  %vm6138_vm8 = vcmask 517120  }
  0x18   : > { %176 = vst.msk [vmem:[#allocation2 + $0x10] sm:$0x1] %vm6136_vm1, %v6164_v0  ;;  %vm4100_vm6 = vmand %vm6134_vm3, %vm203_vm4  ;;  %vm211_vm7 = vsmask.f32 5392  ;;  %1916 = vmatpush1.bf16.msra.mxu1 %v3852_v1  ;;  %vm189_vm9 = vcmask 1044484   ;;  %vm256_vm11 = vcmask 1041408  }
  0x19   : > { %178 = vst.msk [vmem:[#allocation2 + $0x98] sm:$0xe] %vm6135_vm2, %v6164_v0  ;;  %s3786_s27 = sshll.u32 %s165_s26, 7  ;;  %v206_v4 = vsel %vm4100_vm6, 0, %v205_v2  ;;  %vm236_vm10 = vsmask.f32 7942  ;;  %1917 = vmatprep.subr.bf16.mxu1 %v6164_v0  ;;  %vm4118_vm3 = vmor %vm188_vm5, %vm189_vm9 }
  0x1a   : > { %179 = vst.msk [vmem:[#allocation2 + $0x9c] sm:$0xf] %vm6140_vm0, %v6164_v0  ;;  %180 = vst.msk [vmem:[#allocation2 + $0xa0] sm:$0xf] %vm6140_vm0, %v6164_v0  ;;  %s4110_s30 = scalar_lea.vmem %s6130_s0, %s3786_s27  ;;  %vm257_vm12 = vcmask 1045508   ;;  %vm6142_vm13 = vcmask 519170  }
  0x1b   : > { %207 = vst [vmem:[#allocation2 + $0x18] sm:$0x2] %v206_v4  ;;  %vm6137_vm14 = vcmask 518146   ;;  %vm272_vm15 = vsmask.f32 2304  ;;  %vm4127_vm5 = vmand %vm6135_vm2, %vm236_vm10  ;;  %v3854_v42 = vld [vmem:[%s6131_s1 + $0x88] sm:$0xff]  }
  0x1c   : > { %v184_v5 = vld [vmem:[%s4110_s30] sm:$0xf]  ;;  %v185_v6 = vld [vmem:[%s4110_s30 + $0x4] sm:$0xf]  ;;  %v3565_v7 = vld [vmem:[%s4110_s30 + $0x8] sm:$0xf]  ;;  %1918 = vmatpush1.bf16.msra.mxu1 %v3854_v42 }
  0x1d   : > { %v191_v8 = vrot.slane %v184_v5, 7  ;;  %v193_v9 = vrot.slane %v185_v6, 7  ;;  %v3566_v10 = vld [vmem:[%s4110_s30 + $0xc] sm:$0xf]  ;;  %v214_v11 = vshrl.u32 %v3565_v7, 16  ;;  %v217_v12 = vshll.u32 %v3565_v7, 16  ;;  %vm4138_vm9 = vmand %vm6137_vm14, %vm272_vm15  ;;  %1919 = vmatprep.subr.bf16.mxu1 %v6164_v0 }
  0x1e   : > { %v223_v14 = vshrl.u32 %v3566_v10, 16  ;;  %v226_v15 = vshll.u32 %v3566_v10, 16  ;;  %v4122_v16 = vld [vmem:[#allocation2 + $0xc] sm:$0xf]  ;;  %v274_v17 = vld [vmem:[#allocation2 + $0x28] sm:$0x4]  ;;  %vm4170_vm14 = vmand %vm6138_vm8, %vm203_vm4 }
  0x1f   : > { %v192_v18 = vrot.slane %v191_v8, 4  ;;  %v195_v19 = vrot.slane %v193_v9, 4  ;;  %199 = vst.msk [vmem:[#allocation2 + $0x10] sm:$0xe] %vm6135_vm2, %v191_v8  ;;  %v216_v20 = vrot.slane %v214_v11, 6  ;;  %v219_v21 = vrot.slane %v217_v12, 7  ;;  %vm4147_vm2 = vmor %vm203_vm4, %vm211_vm7 }
  0x20   : > { %v675_v23 = vld [vmem:[#allocation2 + $0x8] sm:$0xe]  ;;  %v225_v24 = vrot.slane %v223_v14, 6  ;;  %v228_v25 = vrot.slane %v226_v15, 7  ;;  %v3567_v27 = vld [vmem:[%s4110_s30 + $0x10] sm:$0xf] }
  0x21   : > { %v4132_v26 = vcombine.low %v675_v23, %v4122_v16  ;;  %v3568_v28 = vld [vmem:[%s4110_s30 + $0x14] sm:$0xf]  ;;  %v194_v30 = vsel %vm4118_vm3, %v192_v18, %v193_v9  ;;  %201 = vst.msk [vmem:[#allocation2 + $0x18] sm:$0x1] %vm6136_vm1, %v195_v19  ;;  %v220_v32 = vor.u32 %v219_v21, %v216_v20  ;;  %v259_v33 = vrot.slane %v3567_v27, 6  ;;  %vm4157_vm1 = vmor %vm256_vm11, %vm257_vm12  ;;  %v3856_v10 = vld [vmem:[%s6131_s1 + $0x98] sm:$0xff]  }
  0x22   : > { %v261_v34 = vrot.slane %v3568_v28, 6  ;;  %v3569_v35 = vld [vmem:[%s4110_s30 + $0x18] sm:$0xf]  ;;  %v3570_v36 = vld [vmem:[%s4110_s30 + $0x1c] sm:$0xf]  ;;  %v229_v37 = vor.u32 %v228_v25, %v225_v24  ;;  %v275_v41 = vsel %vm4138_vm9, 0, %v274_v17 }
  0x23   : > { %200 = vst.msk [vmem:[#allocation2 + $0x14] sm:$0xf] %vm6140_vm0, %v194_v30  ;;  %v238_v38 = vld [vmem:[#allocation2 + $0x18] sm:$0xe]  ;;  %v1465_v39 = vshrl.u32 %v4132_v26, 16  ;;  %vm6141_vm7 = vcmask 518144  }
  0x24   : > { %v221_v43 = vrot.slane %v220_v32, 4  ;;  %v239_v44 = vsel %vm4127_vm5, %v220_v32, %v238_v38  ;;  %v6191_v45 = vmov 0  ;;  %v244_v46 = vld [vmem:[#allocation2 + $0x20] sm:$0x3]  ;;  %v260_v47 = vrot.slane %v259_v33, 4  ;;  %v3855_v52 = vld [vmem:[%s6131_s1 + $0x90] sm:$0xff]  }
  0x25   : > { %v6192_v45 = vsel %vm4170_vm14, 4294967295, %v6191_v45  ;;  %268 = vst.msk [vmem:[#allocation2 + $0x20] sm:$0xc] %vm6142_vm13, %v259_v33  ;;  %v263_v48 = vrot.slane %v261_v34, 4  ;;  %276 = vst [vmem:[#allocation2 + $0x28] sm:$0x4] %v275_v41  ;;  %1920 = vmatpush1.bf16.msra.mxu1 %v3855_v52 }
  0x26   : > { %v231_v49 = vrot.slane %v229_v37, 4  ;;  %240 = vst [vmem:[#allocation2 + $0x18] sm:$0xe] %v239_v44  ;;  %v1467_v50 = vshll.u32 %v4132_v26, 16  ;;  %v283_v51 = vshrl.u32 %v3569_v35, 16  ;;  %v230_v53 = vsel %vm4147_vm2, %v221_v43, %v229_v37  ;;  %1921 = vmatprep.subr.bf16.mxu1 %v6164_v0  ;;  %v3857_v41 = vld [vmem:[%s6131_s1 + $0xa0] sm:$0xff]  }
  0x27   : > { %v262_v54 = vsel %vm4157_vm1, %v260_v47, %v261_v34  ;;  %270 = vst.msk [vmem:[#allocation2 + $0x28] sm:$0x3] %vm6138_vm8, %v263_v48  ;;  %v286_v55 = vshll.u32 %v3569_v35, 16  ;;  %v292_v56 = vshrl.u32 %v3570_v36, 16  ;;  %v3571_v57 = vld [vmem:[%s4110_s30 + $0x20] sm:$0xf] }
  0x28   : > { %v3572_v58 = vld [vmem:[%s4110_s30 + $0x24] sm:$0xf]  ;;  %241 = vst.msk [vmem:[#allocation2 + $0x1c] sm:$0xf] %vm6140_vm0, %v230_v53  ;;  %vm6193_vm4 = vcmask 517121   ;;  %v6194_v59 = vmov 0  ;;  %v245_v62 = vsel %vm4170_vm14, %v231_v49, %v244_v46 }
  0x29   : > { %vm4190_vm12 = vmand %vm6193_vm4, %vm236_vm10  ;;  %v679_v60 = vld [vmem:[#allocation2 + $0x10] sm:$0xe]  ;;  %269 = vst.msk [vmem:[#allocation2 + $0x24] sm:$0xf] %vm6140_vm0, %v262_v54  ;;  %v285_v63 = vrot.slane %v283_v51, 5  ;;  %v295_v1 = vshll.u32 %v3570_v36, 16  ;;  %1922 = vmatpush1.bf16.msra.mxu1 %v3856_v10 }
  0x2a   : > { %v6195_v59 = vsel %vm4190_vm12, 4294967295, %v6194_v59  ;;  %v642_v61 = vld [vmem:[#allocation2 + $0x10] sm:$0xf]  ;;  %246 = vst [vmem:[#allocation2 + $0x20] sm:$0x3] %v245_v62  ;;  %v288_v2 = vrot.slane %v286_v55, 6  ;;  %vm4199_vm10 = vmand %vm6141_vm7, %vm272_vm15  ;;  %1923 = vmatprep.subr.bf16.mxu1 %v6164_v0 }
  0x2b   : > { %v294_v4 = vrot.slane %v292_v56, 5  ;;  %vm6143_vm11 = vsmask.f32 7946  ;;  %v6196_v5 = vmov 0  ;;  %v297_v6 = vrot.slane %v295_v1, 6  ;;  %v3858_v42 = vld [vmem:[%s6131_s1] sm:$0xff]  }
  0x2c   : > { %v6197_v5 = vsel %vm4199_vm10, 4294967295, %v6196_v5  ;;  %vm4205_vm14 = vmand %vm6142_vm13, %vm6143_vm11  ;;  %v6198_v7 = vmov 0  ;;  %vm326_vm0 = vcmask 1046532   ;;  %v328_v8 = vrot.slane %v3571_v57, 5  ;;  %v643_v11 = vld [vmem:[#allocation2 + $0x14] sm:$0xf]  ;;  %1293 = vmatpush1.bf16.msra.mxu0 %v3858_v42 }
  0x2d   : > { %v6199_v7 = vsel %vm4205_vm14, 4294967295, %v6198_v7  ;;  %v330_v9 = vrot.slane %v3572_v58, 5  ;;  %v1469_v12 = vrot.slane %v1467_v50, 1  ;;  %vm6200_vm7 = vsmask.f32 6416  ;;  %1294 = vmatprep.subr.bf16.mxu0 %v6164_v0  ;;  %1924 = vmatpush1.bf16.msra.mxu1 %v3857_v41  ;;  %v3859_v1 = vld [vmem:[%s6131_s1 + $0xa8] sm:$0xff]  }
  0x2e   : > { %vm4214_vm4 = vmor %vm272_vm15, %vm6200_vm7  ;;  %v6201_v14 = vmov 0  ;;  %v289_v15 = vor.u32 %v288_v2, %v285_v63  ;;  %v313_v17 = vld [vmem:[#allocation2 + $0x30] sm:$0x7]  ;;  %vm6144_vm13 = vcmask 519171   ;;  %vm6145_vm11 = vsmask.f32 3328  ;;  %1925 = vmatprep.subr.bf16.mxu1 %v6164_v0 }
  0x2f   : > { %v6202_v14 = vsel %vm4214_vm4, 4294967295, %v6201_v14  ;;  %v4219_v18 = vcombine.low %v679_v60, %v643_v11  ;;  %v4221_v19 = vcombine.low %v642_v61, %v643_v11  ;;  %v298_v20 = vor.u32 %v297_v6, %v294_v4  ;;  %v307_v21 = vld [vmem:[#allocation2 + $0x28] sm:$0xc]  ;;  %337 = vst.msk [vmem:[#allocation2 + $0x30] sm:$0x8] %vm6144_vm13, %v328_v8  ;;  %vm4234_vm7 = vmand %vm6144_vm13, %vm6145_vm11  ;;  %s4005_s25 = smov 64  }
  0x30   : > { %vm6203_vm8 = vcmask 1042432   ;;  %v6204_v23 = vmov 0  ;;  %v329_v24 = vrot.slane %v328_v8, 4  ;;  %v344_v25 = vld [vmem:[#allocation2 + $0x38] sm:$0x8]  ;;  %v290_v28 = vrot.slane %v289_v15, 4 }
  0x31   : > { %vm4225_vm15 = vmor %vm6203_vm8, %vm326_vm0  ;;  %v644_v27 = vld [vmem:[#allocation2 + $0x18] sm:$0xf]  ;;  %v308_v30 = vsel %vm4205_vm14, %v289_v15, %v307_v21  ;;  %v332_v32 = vrot.slane %v330_v9, 4  ;;  %v6206_v33 = vmov 0  ;;  %v3573_v34 = vld [vmem:[%s4110_s30 + $0x28] sm:$0xf]  ;;  %v1470_v61 = vor.u32 %v1469_v12, %v1465_v39  ;;  %1926 = vmatpush1.bf16.msra.mxu1 %v3859_v1 }
  0x32   : > { %v6205_v23 = vsel %vm4225_vm15, 4294967295, %v6204_v23  ;;  %v6207_v33 = vsel %vm4234_vm7, 4294967295, %v6206_v33  ;;  %v784_v35 = vshll.u32 %v4221_v19, 16  ;;  %309 = vst [vmem:[#allocation2 + $0x28] sm:$0xc] %v308_v30  ;;  %v300_v36 = vrot.slane %v298_v20, 4  ;;  %1927 = vmatprep.subr.bf16.mxu1 %v6164_v0 }
  0x33   : > { %v331_v37 = vsel %vm4225_vm15, %v329_v24, %v330_v9  ;;  %v3574_v38 = vld [vmem:[%s4110_s30 + $0x2c] sm:$0xf]  ;;  %v4249_v43 = vld [vmem:[#allocation2 + $0x1c] sm:$0xf]  ;;  %v975_v44 = vrot.slane %v4219_v18, 1  ;;  %v299_v46 = vsel %vm4214_vm4, %v290_v28, %v298_v20  ;;  %vm6208_vm0 = vcmask 519168  }
  0x34   : > { %338 = vst.msk [vmem:[#allocation2 + $0x34] sm:$0xf] %vm6208_vm0, %v331_v37  ;;  %vm6209_vm8 = vcmask 518144   ;;  %v345_v47 = vsel %vm4234_vm7, 0, %v344_v25  ;;  %v4260_v48 = vcombine.low %v644_v27, %v4249_v43  ;;  %v248_v49 = vld [vmem:[#allocation2 + $0x20] sm:$0x2]  ;;  %vm6210_vm13 = vmmov %vm6208_vm0  ;;  %v314_v50 = vsel %vm4199_vm10, %v300_v36, %v313_v17 }
  0x35   : > { %340 = vst.msk [vmem:[#allocation2 + $0x38] sm:$0x7] %vm6209_vm8, %v332_v32  ;;  %v788_v51 = vshrl.u32 %v4221_v19, 16  ;;  %346 = vst [vmem:[#allocation2 + $0x38] sm:$0x8] %v345_v47  ;;  %v249_v52 = vsel %vm4190_vm12, 0, %v248_v49 }
  0x36   : > { %310 = vst.msk [vmem:[#allocation2 + $0x2c] sm:$0xf] %vm6210_vm13, %v299_v46  ;;  %315 = vst [vmem:[#allocation2 + $0x30] sm:$0x7] %v314_v50  ;;  %v353_v53 = vshll.u32 %v3573_v34, 16  ;;  %v356_v54 = vshrl.u32 %v3573_v34, 16 }
  0x37   : > { %v362_v55 = vshll.u32 %v3574_v38, 16  ;;  %v3575_v56 = vld [vmem:[%s4110_s30 + $0x30] sm:$0xf]  ;;  %v976_v57 = vrot.slane %v4260_v48, 1  ;;  %v640_v58 = vld [vmem:[#allocation2 + $0x8] sm:$0xf]  ;;  %vm6211_vm13 = vmmov %vm6208_vm0 }
  0x38   : > { %v4271_v60 = vrot.slane %v784_v35, 1  ;;  %250 = vst [vmem:[#allocation2 + $0x20] sm:$0x2] %v249_v52  ;;  %v792_v62 = vshll.u32 %v4260_v48, 16  ;;  %391 = vst.msk [vmem:[#allocation2 + $0x44] sm:$0xf] %vm6211_vm13, %v3575_v56  ;;  %v4320_v35 = vcombine.low %v640_v58, %v4122_v16 }
  0x39   : > { %v3576_v63 = vld [vmem:[%s4110_s30 + $0x34] sm:$0xf]  ;;  %vm6212_vm8 = vsmask.f32 7946  ;;  %vm6213_vm11 = vcmask 518146   ;;  %v6214_v2 = vmov 0  ;;  %vm6216_vm12 = vmmov %vm6211_vm13 }
  0x3a   : > { %vm4283_vm0 = vmand %vm6213_vm11, %vm6212_vm8  ;;  %v355_v4 = vrot.slane %v353_v53, 5  ;;  %v358_v26 = vrot.slane %v356_v54, 4  ;;  %v364_v39 = vrot.slane %v362_v55, 5  ;;  %v366_v6 = vshrl.u32 %v3574_v38, 16  ;;  %392 = vst.msk [vmem:[#allocation2 + $0x48] sm:$0xf] %vm6216_vm12, %v3576_v63 }
  0x3b   : > { %v6215_v2 = vsel %vm4283_vm0, 4294967295, %v6214_v2  ;;  %v396_v8 = vld [vmem:[#allocation2 + $0x4c] sm:$0x1]  ;;  %v3577_v9 = vld [vmem:[%s4110_s30 + $0x38] sm:$0xf]  ;;  %vm6217_vm13 = vcmask 1046528   ;;  %v790_v58 = vor.u32 %v788_v51, %v4271_v60 }
  0x3c   : > { %v977_v10 = vsel %vm6217_vm13, %v975_v44, %v976_v57  ;;  %v4293_v11 = vrot.slane %v792_v62, 1  ;;  %vm6218_vm11 = vsmask.f32 7440  ;;  %vm6219_vm8 = vsmask.f32 3328  ;;  %v3860_v34 = vld [vmem:[%s6131_s1 + $0x8] sm:$0xff]  }
  0x3d   : > { %vm4297_vm10 = vmor %vm6219_vm8, %vm6218_vm11  ;;  %vm374_vm4 = vsmask.f32 7950  ;;  %v796_v15 = vshrl.u32 %v4260_v48, 16  ;;  %v604_v17 = vld [vmem:[#allocation2 + $0x90] sm:$0x1]  ;;  %1010 = vrot.lane.b32.xlu0 %v977_v10, %s4005_s25  ;;  %v359_v20 = vor.u32 %v358_v26, %v355_v4  ;;  %vm6222_vm12 = vcmask 519171   ;;  %1295 = vmatpush1.bf16.msra.mxu0 %v3860_v34 }
  0x3e   : > { %vm4304_vm14 = vmand %vm6222_vm12, %vm374_vm4  ;;  %v368_v24 = vrot.slane %v366_v6, 4  ;;  %vm6152_vm13 = vsmask.f32 256  ;;  %v405_v25 = vshrl.u32 %v3577_v9, 16  ;;  %vm6225_vm11 = vsmask.f32 7424  ;;  %1296 = vmatprep.subr.bf16.mxu0 %v6164_v0 }
  0x3f   : > { %v1471_v27 = vsel %vm6225_vm11, %v1470_v61, %v4271_v60  ;;  %v382_v28 = vld [vmem:[#allocation2 + $0x40] sm:$0xf]  ;;  %vm6226_vm8 = vcmask 516096   ;;  %v408_v32 = vshll.u32 %v3577_v9, 16  ;;  %vm6153_vm7 = vsmask.f32 7938 }
  0x40   : > { %vm4312_vm15 = vmand %vm6226_vm8, %vm6152_vm13  ;;  %v4322_v36 = vld [vmem:[#allocation2 + $0x28] sm:$0xff]   ;;  %v360_v37 = vrot.slane %v359_v20, 4  ;;  %v376_v38 = vld [vmem:[#allocation2 + $0x38] sm:$0x8]  ;;  %v369_v41 = vor.u32 %v368_v24, %v364_v39  ;;  %vm6229_vm4 = vsmask.f32 3328  ;;  %v798_v61 = vor.u32 %v796_v15, %v4293_v11 }
  0x41   : > { %v317_v42 = vld [vmem:[#allocation2 + $0x30] sm:$0x4]  ;;  %v377_v44 = vsel %vm4304_vm14, %v355_v4, %v376_v38  ;;  %vm6230_vm12 = vcmask 519168   ;;  %v397_v16 = vsel %vm4312_vm15, 0, %v396_v8  ;;  %v4335_v47 = vrot.slane %v405_v25, 7  ;;  %1474 = vrot.lane.b32.xlu0 %v1471_v27, %s4005_s25  ;;  %v3836_v52 = vld [vmem:[#allocation2 + $0x20] sm:$0xff]  }
  0x42   : > { %vm4329_vm11 = vmand %vm6230_vm12, %vm6229_vm4  ;;  %v605_v49 = vsel %vm4312_vm15, 0, %v604_v17  ;;  %v3861_v50 = vld [vmem:[%s6131_s1 + $0xb0] sm:$0xff]   ;;  %v980_v53 = vrot.slane %v4322_v36, 1  ;;  %v318_v54 = vsel %vm4283_vm0, 0, %v317_v42  ;;  %v365_v55 = vsel %vm4297_vm10, %v360_v37, %v364_v39  ;;  %378 = vst [vmem:[#allocation2 + $0x38] sm:$0x8] %v377_v44 }
  0x43   : > { %v370_v56 = vrot.slane %v369_v41, 4  ;;  %398 = vst [vmem:[#allocation2 + $0x4c] sm:$0x1] %v397_v16  ;;  %606 = vst [vmem:[#allocation2 + $0x90] sm:$0x1] %v605_v49  ;;  %v808_v62 = vshll.u32 %v4322_v36, 16  ;;  %v410_v63 = vor.u32 %v408_v32, %v4335_v47  ;;  %1928 = vmatpush1.bf16.msra.mxu1 %v3861_v50 }
  0x44   : > { %319 = vst [vmem:[#allocation2 + $0x30] sm:$0x4] %v318_v54  ;;  %vm6233_vm8 = vmmov %vm6230_vm12  ;;  %v3593_v1 = vld [vmem:[%s4110_s30 + $0x78] sm:$0xf]  ;;  %v4357_v4 = vrot.slane %v3836_v52, 1  ;;  %v800_v26 = vshll.u32 %v3836_v52, 16  ;;  %1929 = vmatprep.subr.bf16.mxu1 %v6164_v0 }
  0x45   : > { %379 = vst.msk [vmem:[#allocation2 + $0x3c] sm:$0xf] %vm6233_vm8, %v365_v55  ;;  %v383_v39 = vsel %vm4329_vm11, %v370_v56, %v382_v28  ;;  %v804_v6 = vshrl.u32 %v3836_v52, 16  ;;  %v3862_v51 = vld [vmem:[%s6131_s1 + $0x10] sm:$0xff]   ;;  %v810_v8 = vrot.slane %v808_v62, 1  ;;  %v611_v9 = vshrl.u32 %v3593_v1, 16 }
  0x46   : > { %384 = vst [vmem:[#allocation2 + $0x40] sm:$0xf] %v383_v39  ;;  %v614_v10 = vshll.u32 %v3593_v1, 16  ;;  %v812_v15 = vshrl.u32 %v4322_v36, 16  ;;  %v3578_v17 = vld [vmem:[%s4110_s30 + $0x3c] sm:$0xf]  ;;  %1297 = vmatpush1.bf16.msra.mxu0 %v3862_v51 }
  0x47   : > { %vm6234_vm4 = vcmask 1046528   ;;  %v4375_v25 = vrot.slane %v800_v26, 1  ;;  %vm402_vm8 = vsmask.f32 4368  ;;  %v3863_v27 = vld [vmem:[%s6131_s1 + $0xb8] sm:$0xff]   ;;  %vm6237_vm13 = vcmask 519168   ;;  %1298 = vmatprep.subr.bf16.mxu0 %v6164_v0 }
  0x48   : > { %v979_v20 = vsel %vm6234_vm4, %v976_v57, %v4357_v4  ;;  %vm6235_vm12 = vmmov %vm6234_vm4  ;;  %vm6236_vm4 = vsmask.f32 7424  ;;  %v4392_v32 = vrot.slane %v611_v9, 7  ;;  %v411_v34 = vrot.slane %v4335_v47, 4  ;;  %v3579_v38 = vld [vmem:[%s4110_s30 + $0x40] sm:$0xf]  ;;  %1930 = vmatpush1.bf16.msra.mxu1 %v3863_v27 }
  0x49   : > { %v981_v24 = vsel %vm6235_vm12, %v4357_v4, %v980_v53  ;;  %1012 = vrot.lane.b32.xlu1 %v979_v20, %s4005_s25  ;;  %v4384_v57 = vsel %vm6236_vm4, %v790_v58, %v4293_v11  ;;  %vm4388_vm12 = vmand %vm6237_vm13, %vm6153_vm7  ;;  %v413_v37 = vshrl.u32 %v3578_v17, 16  ;;  %v3864_v41 = vld [vmem:[%s6131_s1 + $0x18] sm:$0xff]   ;;  %v806_v42 = vor.u32 %v804_v6, %v4375_v25  ;;  %v430_v55 = vld [vmem:[#allocation2 + $0x54] sm:$0x1]  ;;  %1931 = vmatprep.subr.bf16.mxu1 %v6164_v0  ;;  %s161_s17 = sand.u32 1, %s3994_s13   ;;  %s4006_s6 = smov [#allocation3]  }
  0x4a   : > { %1014 = vrot.lane.b32.xlu0 %v981_v24, %s4005_s25  ;;  %v416_v44 = vshll.u32 %v3578_v17, 16  ;;  %v442_v16 = vrot.slane %v3579_v38, 7  ;;  %v3594_v49 = vld [vmem:[%s4110_s30 + $0x7c] sm:$0xf]  ;;  %v779_v50 = vshll.u32 %v4320_v35, 16  ;;  %v616_v54 = vor.u32 %v614_v10, %v4392_v32  ;;  %vm6240_vm13 = vmmov %vm6236_vm4  ;;  %1299 = vmatpush1.bf16.msra.mxu0 %v3864_v41  ;;  %v3865_v28 = vld [vmem:[%s6131_s1 + $0xc0] sm:$0xff]  }
  0x4b   : > { %v426_v52 = vld [vmem:[#allocation2 + $0x4c] sm:$0xf]  ;;  %v630_v47 = vld [vmem:[#allocation2 + $0x90] sm:$0xf]  ;;  %v4407_v58 = vsel %vm6240_vm13, %v798_v61, %v4375_v25  ;;  %v4411_v1 = vor.u32 %v812_v15, %v810_v8  ;;  %v415_v26 = vrot.slane %v413_v37, 7  ;;  %vm6241_vm4 = vcmask 519169   ;;  %vm6242_vm7 = vmmov %vm6240_vm13  ;;  %1300 = vmatprep.subr.bf16.mxu0 %v6164_v0 }
  0x4c   : > { %v3838_v56 = vld [vmem:[#allocation2 + $0x30] sm:$0xff]   ;;  %v427_v62 = vsel %vm4388_vm12, %v410_v63, %v426_v52  ;;  %450 = vst.msk [vmem:[#allocation2 + $0x54] sm:$0xe] %vm6241_vm4, %v442_v16  ;;  %v4416_v39 = vld [vmem:[#allocation2 + $0x38] sm:$0xff]   ;;  %v4419_v6 = vsel %vm6242_vm7, %v806_v42, %v810_v8  ;;  %v631_v61 = vsel %vm4388_vm12, %v616_v54, %v630_v47  ;;  %vm6243_vm13 = vsmask.f32 256  ;;  %1932 = vmatpush1.bf16.msra.mxu1 %v3865_v28 }
  0x4d   : > { %918 = vrot.lane.b32.xlu1 %v4384_v57, %s4005_s25  ;;  %428 = vst [vmem:[#allocation2 + $0x4c] sm:$0xf] %v427_v62  ;;  %vm4425_vm0 = vmor %vm6243_vm13, %vm402_vm8  ;;  %v617_v51 = vrot.slane %v4392_v32, 4  ;;  %v619_v9 = vshrl.u32 %v3594_v49, 16  ;;  %v3580_v10 = vld [vmem:[%s4110_s30 + $0x44] sm:$0xf]  ;;  %v418_v24 = vor.u32 %v416_v44, %v415_v26  ;;  %1933 = vmatprep.subr.bf16.mxu1 %v6164_v0 }
  0x4e   : > { %v453_v15 = vld [vmem:[#allocation2 + $0x5c] sm:$0x2]  ;;  %v982_v8 = vrot.slane %v3838_v56, 1  ;;  %v385_v17 = vld [vmem:[#allocation2 + $0x40] sm:$0x8]  ;;  %v816_v20 = vshll.u32 %v3838_v56, 16 }
  0x4f   : > { %632 = vst [vmem:[#allocation2 + $0x90] sm:$0xf] %v631_v61  ;;  %v420_v27 = vrot.slane %v415_v26, 4  ;;  %v984_v37 = vrot.slane %v4416_v39, 1  ;;  %v386_v32 = vsel %vm4304_vm14, 0, %v385_v17  ;;  %v4438_v38 = vrot.slane %v619_v9, 7 }
  0x50   : > { %v622_v41 = vshll.u32 %v3594_v49, 16  ;;  %v3581_v42 = vld [vmem:[%s4110_s30 + $0x48] sm:$0xf]  ;;  %vm6246_vm7 = vcmask 1046528   ;;  %387 = vst [vmem:[#allocation2 + $0x40] sm:$0x8] %v386_v32  ;;  %v419_v44 = vsel %vm4425_vm0, %v411_v34, %v418_v24 }
  0x51   : > { %v983_v52 = vsel %vm6246_vm7, %v980_v53, %v982_v8  ;;  %v431_v54 = vsel %vm4312_vm15, %v420_v27, %v430_v55  ;;  %v443_v47 = vrot.slane %v442_v16, 4  ;;  %v3866_v62 = vld [vmem:[%s6131_s1 + $0x20] sm:$0xff]   ;;  %920 = vrot.lane.b32.xlu1 %v4407_v58, %s4005_s25  ;;  %v818_v36 = vrot.slane %v816_v20, 1  ;;  %vm6248_vm12 = vmmov %vm6246_vm7  ;;  %v3582_v9 = vld [vmem:[%s4110_s30 + $0x4c] sm:$0xf]  ;;  %s3787_s24 = smul.u32 544, %s161_s17 }
  0x52   : > { %1016 = vrot.lane.b32.xlu0 %v983_v52, %s4005_s25  ;;  %vm6247_vm8 = vcmask 519168   ;;  %432 = vst [vmem:[#allocation2 + $0x54] sm:$0x1] %v431_v54  ;;  %v624_v53 = vor.u32 %v622_v41, %v4438_v38  ;;  %v820_v34 = vshrl.u32 %v3838_v56, 16  ;;  %v824_v49 = vshll.u32 %v4416_v39, 16  ;;  %1301 = vmatpush1.bf16.msra.mxu0 %v3866_v62  ;;  %v3867_v17 = vld [vmem:[%s6131_s1 + $0xc8] sm:$0xff]  }
  0x53   : > { %429 = vst.msk [vmem:[#allocation2 + $0x50] sm:$0xf] %vm6247_vm8, %v419_v44  ;;  %v985_v16 = vsel %vm6248_vm12, %v982_v8, %v984_v37  ;;  %v444_v55 = vrot.slane %v3580_v10, 7  ;;  %v454_v26 = vsel %vm4100_vm6, 0, %v453_v15  ;;  %v460_v61 = vshrl.u32 %v3581_v42, 16  ;;  %1302 = vmatprep.subr.bf16.mxu0 %v6164_v0  ;;  %vm6249_vm6 = vmmov %vm6247_vm8  ;;  %1934 = vmatpush1.bf16.msra.mxu1 %v3867_v17  ;;  %v3868_v13 = vld [vmem:[%s6131_s1 + $0x28] sm:$0xff]  }
  0x54   : > { %v625_v56 = vsel %vm4425_vm0, %v617_v51, %v624_v53  ;;  %v822_v20 = vor.u32 %v820_v34, %v818_v36  ;;  %v826_v24 = vrot.slane %v824_v49, 1  ;;  %455 = vst [vmem:[#allocation2 + $0x5c] sm:$0x2] %v454_v26  ;;  %v463_v10 = vshll.u32 %v3581_v42, 16  ;;  %v4470_v3 = vld [vmem:[#allocation2 + $0x48] sm:$0xff]   ;;  %vm6250_vm0 = vmmov %vm6249_vm6  ;;  %1935 = vmatprep.subr.bf16.mxu1 %v6164_v0  ;;  %v3872_v31 = vld [vmem:[%s6131_s1 + $0x38] sm:$0xff]  }
  0x55   : > { %633 = vst.msk [vmem:[#allocation2 + $0x94] sm:$0xf] %vm6249_vm6, %v625_v56  ;;  %v445_v15 = vsel %vm4118_vm3, %v443_v47, %v444_v55  ;;  %v446_v8 = vrot.slane %v444_v55, 4  ;;  %v462_v27 = vrot.slane %v460_v61, 6  ;;  %v828_v28 = vshrl.u32 %v4416_v39, 16  ;;  %922 = vrot.lane.b32.xlu1 %v4419_v6, %s4005_s25  ;;  %s5679_s26 = scalar_lea.vmem [#allocation3], %s3787_s24 }
  0x56   : > { %1018 = vrot.lane.b32.xlu0 %v985_v16, %s4005_s25  ;;  %451 = vst.msk [vmem:[#allocation2 + $0x58] sm:$0xf] %vm6250_vm0, %v445_v15  ;;  %v465_v63 = vrot.slane %v463_v10, 7  ;;  %v469_v51 = vshrl.u32 %v3582_v9, 16  ;;  %v3583_v32 = vld [vmem:[%s4110_s30 + $0x50] sm:$0xf]  ;;  %1303 = vmatpush1.bf16.msra.mxu0 %v3868_v13 }
  0x57   : > { %vm6251_vm3 = vsmask.f32 7424  ;;  %vm6252_vm4 = vsmask.f32 7938  ;;  %vm6253_vm13 = vcmask 516096   ;;  %v840_v52 = vshll.u32 %v4470_v3, 16  ;;  %1304 = vmatprep.subr.bf16.mxu0 %v6164_v0 }
  0x58   : > { %v4486_v41 = vsel %vm6251_vm3, %v4411_v1, %v818_v36  ;;  %vm4490_vm7 = vmand %vm6253_vm13, %vm6252_vm4  ;;  %v777_v44 = vshrl.u32 %v4320_v35, 16  ;;  %v4499_v54 = vrot.slane %v779_v50, 1  ;;  %v3869_v1 = vld [vmem:[%s6131_s1 + $0xd0] sm:$0xff]   ;;  %v3840_v47 = vld [vmem:[#allocation2 + $0x40] sm:$0xff]   ;;  %v988_v62 = vrot.slane %v4470_v3, 1  ;;  %s3497_s27 = sshll.u32 %s5679_s26, 4  ;;  %s6084_s27 = int_to_ptr.vmem [resolvable:$true] %s3497_s27 }
  0x59   : > { %vm6256_vm8 = vmmov %vm6253_vm13  ;;  %v466_v36 = vor.u32 %v465_v63, %v462_v27  ;;  %v472_v53 = vshll.u32 %v3582_v9, 16  ;;  %v3584_v34 = vld [vmem:[%s4110_s30 + $0x54] sm:$0xf]  ;;  %v507_v49 = vld [vmem:[#allocation2 + $0x6c] sm:$0x4]  ;;  %v830_v26 = vor.u32 %v828_v28, %v826_v24  ;;  %v471_v61 = vrot.slane %v469_v51, 6  ;;  %1936 = vmatpush1.bf16.msra.mxu1 %v3869_v1  ;;  %924 = vrot.lane.b32.xlu1 %v4486_v41, %s4005_s25 }
  0x5a   : > { %452 = vst.msk [vmem:[#allocation2 + $0x5c] sm:$0x1] %vm6256_vm8, %v446_v8  ;;  %v3870_v50 = vld [vmem:[%s6131_s1 + $0x30] sm:$0xff]   ;;  %vm6257_vm12 = vmmov %vm6251_vm3  ;;  %v496_v17 = vrot.slane %v3583_v32, 6  ;;  %v986_v9 = vrot.slane %v3840_v47, 1  ;;  %v832_v10 = vshll.u32 %v3840_v47, 16  ;;  %1937 = vmatprep.subr.bf16.mxu1 %v6164_v0 }
  0x5b   : > { %v434_v16 = vld [vmem:[#allocation2 + $0x54] sm:$0x1]  ;;  %v4511_v55 = vsel %vm6257_vm12, %v822_v20, %v826_v24  ;;  %v836_v15 = vshrl.u32 %v3840_v47, 16  ;;  %v3585_v8 = vld [vmem:[%s4110_s30 + $0x58] sm:$0xf]  ;;  %v4520_v24 = vrot.slane %v840_v52, 1  ;;  %1305 = vmatpush1.bf16.msra.mxu0 %v3870_v50 }
  0x5c   : > { %v435_v56 = vsel %vm4490_vm7, 0, %v434_v16  ;;  %v481_v20 = vld [vmem:[#allocation2 + $0x5c] sm:$0xe]  ;;  %v844_v27 = vshrl.u32 %v4470_v3, 16  ;;  %v467_v28 = vrot.slane %v466_v36, 4  ;;  %v474_v63 = vrot.slane %v472_v53, 7  ;;  %1306 = vmatprep.subr.bf16.mxu0 %v6164_v0 }
  0x5d   : > { %436 = vst [vmem:[#allocation2 + $0x54] sm:$0x1] %v435_v56  ;;  %vm6258_vm6 = vcmask 519170   ;;  %v3586_v51 = vld [vmem:[%s4110_s30 + $0x5c] sm:$0xf]  ;;  %vm6259_vm0 = vcmask 1046528   ;;  %v482_v1 = vsel %vm4127_vm5, %v466_v36, %v481_v20  ;;  %926 = vrot.lane.b32.xlu1 %v4511_v55, %s4005_s25  ;;  %vm6261_vm5 = vmmov %vm6257_vm12 }
  0x5e   : > { %504 = vst.msk [vmem:[#allocation2 + $0x64] sm:$0xc] %vm6258_vm6, %v496_v17  ;;  %v987_v32 = vsel %vm6259_vm0, %v984_v37, %v986_v9  ;;  %vm6260_vm3 = vmmov %vm6259_vm0  ;;  %v834_v52 = vrot.slane %v832_v10, 1  ;;  %v485_v47 = vld [vmem:[#allocation2 + $0x64] sm:$0x3]  ;;  %v475_v39 = vor.u32 %v474_v63, %v471_v61  ;;  %v497_v37 = vrot.slane %v496_v17, 4 }
  0x5f   : > { %v989_v13 = vsel %vm6260_vm3, %v986_v9, %v988_v62  ;;  %v3587_v16 = vld [vmem:[%s4110_s30 + $0x60] sm:$0xf]  ;;  %v4535_v56 = vld [vmem:[%s4110_s30 + $0x64] sm:$0xf]  ;;  %1020 = vrot.lane.b32.xlu0 %v987_v32, %s4005_s25  ;;  %483 = vst [vmem:[#allocation2 + $0x5c] sm:$0xe] %v482_v1  ;;  %vm6268_vm12 = vmmov %vm6261_vm5  ;;  %vm6269_vm6 = vnez %v6207_v33  ;;  %1307 = vmatpush1.bf16.msra.mxu0 %v3872_v31  ;;  %v846_v33 = vor.u32 %v844_v27, %v4520_v24 }
  0x60   : > { %v498_v53 = vrot.slane %v3584_v34, 6  ;;  %v508_v9 = vsel %vm4138_vm9, 0, %v507_v49  ;;  %v561_v22 = vld [vmem:[#allocation2 + $0x7c] sm:$0x8]  ;;  %v4547_v50 = vsel %vm6261_vm5, %v830_v26, %v834_v52  ;;  %v838_v61 = vor.u32 %v836_v15, %v834_v52  ;;  %v4550_v29 = vld [vmem:[%s4110_s30 + $0x68] sm:$0xf]  ;;  %1308 = vmatprep.subr.bf16.mxu0 %v6164_v0 }
  0x61   : > { %v3871_v36 = vld [vmem:[%s6131_s1 + $0xd8] sm:$0xff]   ;;  %509 = vst [vmem:[#allocation2 + $0x6c] sm:$0x4] %v508_v9  ;;  %v514_v34 = vshrl.u32 %v3585_v8, 16  ;;  %v517_v17 = vshll.u32 %v3585_v8, 16  ;;  %v476_v10 = vsel %vm4147_vm2, %v467_v28, %v475_v39  ;;  %v477_v20 = vrot.slane %v475_v39, 4  ;;  %928 = vrot.lane.b32.xlu1 %v4547_v50, %s4005_s25 }
  0x62   : > { %v3591_v49 = vld [vmem:[%s4110_s30 + $0x70] sm:$0xf]  ;;  %v499_v63 = vsel %vm4157_vm1, %v497_v37, %v498_v53  ;;  %v500_v32 = vrot.slane %v498_v53, 4  ;;  %v3592_v1 = vld [vmem:[%s4110_s30 + $0x74] sm:$0xf]  ;;  %vm6262_vm9 = vcmask 519168   ;;  %1938 = vmatpush1.bf16.msra.mxu1 %v3871_v36  ;;  %vm6266_vm1 = vnez %v6192_v45 }
  0x63   : > { %602 = vst.msk [vmem:[#allocation2 + $0x88] sm:$0xf] %vm6262_vm9, %v3591_v49  ;;  %vm6263_vm4 = vmmov %vm6262_vm9  ;;  %v516_v26 = vrot.slane %v514_v34, 5  ;;  %v519_v15 = vrot.slane %v517_v17, 6  ;;  %v523_v8 = vshrl.u32 %v3586_v51, 16  ;;  %1939 = vmatprep.subr.bf16.mxu1 %v6164_v0  ;;  %1022 = vrot.lane.b32.xlu0 %v989_v13, %s4005_s25  ;;  %v486_v40 = vsel %vm6266_vm1, %v477_v20, %v485_v47  ;;  %v3873_v37 = vld [vmem:[%s6131_s1 + $0xe0] sm:$0xff]  }
  0x64   : > { %484 = vst.msk [vmem:[#allocation2 + $0x60] sm:$0xf] %vm6263_vm4, %v476_v10  ;;  %vm6264_vm13 = vmmov %vm6263_vm4  ;;  %vm6267_vm2 = vcmask 517120   ;;  %v526_v28 = vshll.u32 %v3586_v51, 16  ;;  %v550_v52 = vrot.slane %v3587_v16, 5  ;;  %v552_v39 = vrot.slane %v4535_v56, 5 }
  0x65   : > { %505 = vst.msk [vmem:[#allocation2 + $0x68] sm:$0xf] %vm6264_vm13, %v499_v63  ;;  %vm6265_vm8 = vmmov %vm6263_vm4  ;;  %v4574_v53 = vld [vmem:[#allocation2 + $0x50] sm:$0xff]   ;;  %v4580_v13 = vsel %vm6268_vm12, %v838_v61, %v4520_v24  ;;  %v520_v45 = vor.u32 %v519_v15, %v516_v26  ;;  %v525_v47 = vrot.slane %v523_v8, 5  ;;  %v562_v51 = vsel %vm6269_vm6, 0, %v561_v22  ;;  %s3940_s5 = scalar_lea.vmem %s6084_s27, 8704 }
  0x66   : > { %603 = vst.msk [vmem:[#allocation2 + $0x8c] sm:$0xf] %vm6265_vm8, %v3592_v1  ;;  %487 = vst [vmem:[#allocation2 + $0x64] sm:$0x3] %v486_v40  ;;  %v528_v16 = vrot.slane %v526_v28, 6  ;;  %v551_v56 = vrot.slane %v550_v52, 4  ;;  %1940 = vmatpush1.bf16.msra.mxu1 %v3873_v37  ;;  %vm6271_vm3 = vnez %v6205_v23  ;;  %930 = vrot.lane.b32.xlu1 %v4580_v13, %s4005_s25  ;;  %v782_v26 = vor.u32 %v4499_v54, %v777_v44  ;;  %p3941_p11 = scmp.ne.s32.totalorder %s6084_s27, %s3940_s5 }
  0x67   : > { %506 = vst.msk [vmem:[#allocation2 + $0x6c] sm:$0x3] %vm6267_vm2, %v500_v32  ;;  %vm6270_vm0 = vcmask 519171   ;;  %v554_v9 = vrot.slane %v552_v39, 4  ;;  %563 = vst [vmem:[#allocation2 + $0x7c] sm:$0x8] %v562_v51  ;;  %1941 = vmatprep.subr.bf16.mxu1 %v6164_v0  ;;  %vm6274_vm13 = vnez %v6199_v7  ;;  %vm6275_vm8 = vnez %v6202_v14 }
  0x68   : > { %558 = vst.msk [vmem:[#allocation2 + $0x74] sm:$0x8] %vm6270_vm0, %v550_v52  ;;  %v568_v36 = vshll.u32 %v4550_v29, 16  ;;  %v990_v61 = vrot.slane %v4574_v53, 1  ;;  %v4588_v34 = vld [vmem:[#allocation2 + $0x58] sm:$0xff]   ;;  %v848_v22 = vshll.u32 %v4574_v53, 16  ;;  %v529_v63 = vor.u32 %v528_v16, %v525_v47  ;;  %vm6277_vm2 = vmmov %vm6268_vm12  ;;  %p3942_p12 = pnand %p3941_p11, %p4067_p5 }
  0x69   : > { %v539_v17 = vld [vmem:[#allocation2 + $0x74] sm:$0x7]  ;;  %v3590_v49 = vld [vmem:[%s4110_s30 + $0x6c] sm:$0xf]  ;;  %v521_v20 = vrot.slane %v520_v45, 4  ;;  %v553_v32 = vsel %vm6271_vm3, %v551_v56, %v552_v39  ;;  %vm6272_vm5 = vcmask 518144   ;;  %vm6278_vm12 = vmmov %vm6263_vm4  ;;  %vm6279_vm6 = vnez %v6197_v5 }
  0x6a   : > { %v535_v10 = vld [vmem:[#allocation2 + $0x6c] sm:$0xc]  ;;  %560 = vst.msk [vmem:[#allocation2 + $0x7c] sm:$0x7] %vm6272_vm5, %v554_v9  ;;  %v571_v1 = vshrl.u32 %v4550_v29, 16  ;;  %vm6273_vm9 = vcmask 1046528   ;;  %vm6280_vm0 = vnez %v6195_v59  ;;  %vm6281_vm3 = vmmov %vm6277_vm2  ;;  %p3943_p13 = pneg %p3942_p12 }
  0x6b   : > { %v991_v24 = vsel %vm6273_vm9, %v988_v62, %v990_v61  ;;  %v992_v27 = vrot.slane %v4588_v34, 1  ;;  %v850_v15 = vrot.slane %v848_v22, 1  ;;  %559 = vst.msk [vmem:[#allocation2 + $0x78] sm:$0xf] %vm6263_vm4, %v553_v32  ;;  %v3875_v23 = vld [vmem:[%s6131_s1 + $0x40] sm:$0xff]   ;;  %v536_v3 = vsel %vm6274_vm13, %v520_v45, %v535_v10  ;;  %vm6276_vm1 = vmmov %vm6273_vm9  ;;  %v3876_v37 = vld [vmem:[%s6131_s1 + $0xe8] sm:$0xff]  }
  0x6c   : > { %1024 = vrot.lane.b32.xlu0 %v991_v24, %s4005_s25  ;;  %v530_v62 = vsel %vm6275_vm8, %v521_v20, %v529_v63  ;;  %v531_v29 = vrot.slane %v529_v63, 4  ;;  %v570_v8 = vrot.slane %v568_v36, 5  ;;  %v852_v31 = vshrl.u32 %v4574_v53, 16  ;;  %537 = vst [vmem:[#allocation2 + $0x6c] sm:$0xc] %v536_v3  ;;  %1309 = vmatpush1.bf16.msra.mxu0 %v3875_v23  ;;  %v3878_v9 = vld [vmem:[%s6131_s1 + $0x48] sm:$0xff]   ;;  %vm6282_vm5 = vmmov %vm6277_vm2 }
  0x6d   : > { %v993_v44 = vsel %vm6276_vm1, %v990_v61, %v992_v27  ;;  %v4622_v54 = vsel %vm6277_vm2, %v846_v33, %v850_v15  ;;  %v856_v40 = vshll.u32 %v4588_v34, 16  ;;  %538 = vst.msk [vmem:[#allocation2 + $0x70] sm:$0xf] %vm6278_vm12, %v530_v62  ;;  %v488_v7 = vld [vmem:[#allocation2 + $0x64] sm:$0x2]  ;;  %v573_v28 = vrot.slane %v571_v1, 4  ;;  %1310 = vmatprep.subr.bf16.mxu0 %v6164_v0  ;;  %1942 = vmatpush1.bf16.msra.mxu1 %v3876_v37  ;;  %vm6283_vm9 = vmmov %vm6263_vm4 }
  0x6e   : > { %v540_v14 = vsel %vm6279_vm6, %v531_v29, %v539_v17  ;;  %v577_v52 = vshll.u32 %v3590_v49, 16  ;;  %v581_v39 = vshrl.u32 %v3590_v49, 16  ;;  %932 = vrot.lane.b32.xlu1 %v4622_v54, %s4005_s25  ;;  %v489_v53 = vsel %vm6280_vm0, 0, %v488_v7  ;;  %v589_v45 = vld [vmem:[#allocation2 + $0x7c] sm:$0x8]  ;;  %1943 = vmatprep.subr.bf16.mxu1 %v6164_v0  ;;  %v3879_v49 = vld [vmem:[%s6131_s1 + $0xf0] sm:$0xff]   ;;  %vm6287_vm4 = vmmov %vm6276_vm1 }
  0x6f   : > { %541 = vst [vmem:[#allocation2 + $0x74] sm:$0x7] %v540_v14  ;;  %490 = vst [vmem:[#allocation2 + $0x64] sm:$0x2] %v489_v53  ;;  %v590_v5 = vsel %vm4304_vm14, %v570_v8, %v589_v45  ;;  %v574_v47 = vor.u32 %v573_v28, %v570_v8  ;;  %v634_v56 = vld [vmem:[#allocation2 + $0x98] sm:$0x1]  ;;  %v787_v59 = vsel %vm6281_vm3, %v782_v26, %v4271_v60 }
  0x70   : > { %1026 = vrot.lane.b32.xlu0 %v993_v44, %s4005_s25  ;;  %v579_v51 = vrot.slane %v577_v52, 5  ;;  %v583_v16 = vrot.slane %v581_v39, 4  ;;  %v854_v36 = vor.u32 %v852_v31, %v850_v15  ;;  %v858_v61 = vrot.slane %v856_v40, 1  ;;  %591 = vst [vmem:[#allocation2 + $0x7c] sm:$0x8] %v590_v5  ;;  %1311 = vmatpush1.bf16.msra.mxu0 %v3878_v9  ;;  %v4663_v30 = vld [vmem:[#allocation2 + $0x88] sm:$0xff]   ;;  %vm6289_vm13 = vmmov %vm6276_vm1 }
  0x71   : > { %v626_v33 = vrot.slane %v4438_v38, 4  ;;  %v575_v22 = vrot.slane %v574_v47, 4  ;;  %v593_v10 = vld [vmem:[#allocation2 + $0x84] sm:$0xf]  ;;  %1312 = vmatprep.subr.bf16.mxu0 %v6164_v0  ;;  %1944 = vmatpush1.bf16.msra.mxu1 %v3879_v49  ;;  %v860_v1 = vshrl.u32 %v4588_v34, 16  ;;  %v4669_v3 = vld [vmem:[#allocation2 + $0x90] sm:$0xff]   ;;  %vm6290_vm8 = vmmov %vm6277_vm2 }
  0x72   : > { %v584_v17 = vor.u32 %v583_v16, %v579_v51  ;;  %v4659_v32 = vsel %vm6282_vm5, %v854_v36, %v858_v61  ;;  %v686_v24 = vld [vmem:[#allocation2 + $0x18] sm:$0xc]  ;;  %1945 = vmatprep.subr.bf16.mxu1 %v6164_v0  ;;  %v3880_v62 = vld [vmem:[%s6131_s1 + $0x50] sm:$0xff]   ;;  %v1004_v44 = vrot.slane %v4663_v30, 1  ;;  %v904_v5 = vshll.u32 %v4663_v30, 16  ;;  %vm6293_vm12 = vmmov %vm6281_vm3  ;;  %s3944_s7 = sshll.u32 %s4006_s6, 4  ;;  %s3945_s7 = int_to_ptr.vmem [resolvable:$false] %s3944_s7 }
  0x73   : > { %v635_v20 = vsel %vm4312_vm15, %v626_v33, %v634_v56  ;;  %v4654_v60 = vld [vmem:[#allocation2 + $0x68] sm:$0xff]   ;;  %v580_v38 = vsel %vm4297_vm10, %v575_v22, %v579_v51  ;;  %v681_v26 = vld [vmem:[#allocation2 + $0x18] sm:$0xe]  ;;  %vm6284_vm10 = vnez %v6215_v2  ;;  %v3734_v7 = vcombine.low %v686_v24, %v4249_v43  ;;  %vm6285_vm15 = vmmov %vm6276_vm1  ;;  %s3946_s8 = scalar_lea.vmem %s3945_s7, 17408  ;;  %p3947_p0 = scmp.lt.s32.totalorder %s6084_s27, %s3945_s7 }
  0x74   : > { %916 = vrot.lane.b32.xlu0 %v787_v59, %s4005_s25  ;;  %v585_v63 = vrot.slane %v584_v17, 4  ;;  %636 = vst [vmem:[#allocation2 + $0x98] sm:$0x1] %v635_v20  ;;  %592 = vst.msk [vmem:[#allocation2 + $0x80] sm:$0xf] %vm6283_vm9, %v580_v38  ;;  %v872_v15 = vshll.u32 %v4654_v60, 16  ;;  %v4687_v2 = vcombine.low %v681_v26, %v4249_v43  ;;  %1313 = vmatpush1.bf16.msra.mxu0 %v3880_v62  ;;  %p3948_p1 = scmp.lt.s32.totalorder %s3946_s8, %s3940_s5 }
  0x75   : > { %v3881_v31 = vld [vmem:[%s6131_s1 + $0xf8] sm:$0xff]   ;;  %v996_v46 = vrot.slane %v4654_v60, 1  ;;  %v862_v28 = vor.u32 %v860_v1, %v858_v61  ;;  %1314 = vmatprep.subr.bf16.mxu0 %v6164_v0  ;;  %v876_v45 = vshrl.u32 %v4654_v60, 16  ;;  %v4696_v43 = vrot.slane %v4669_v3, 1  ;;  %v3884_v61 = vld [vmem:[%s6131_s1 + $0x60] sm:$0xff]   ;;  %vm6294_vm6 = vmmov %vm6276_vm1 }
  0x76   : > { %v542_v12 = vld [vmem:[#allocation2 + $0x74] sm:$0x4]  ;;  %v594_v23 = vsel %vm4329_vm11, %v585_v63, %v593_v10  ;;  %v3844_v29 = vld [vmem:[#allocation2 + $0x60] sm:$0xff]   ;;  %1946 = vmatpush1.bf16.msra.mxu1 %v3881_v31  ;;  %v3882_v37 = vld [vmem:[%s6131_s1 + $0x58] sm:$0xff]   ;;  %v874_v53 = vrot.slane %v872_v15, 1  ;;  %v2542_v59 = vrot.slane %v3734_v7, 1  ;;  %p3949_p2 = por %p3948_p1, %p3947_p0 }
  0x77   : > { %v543_v8 = vsel %vm6284_vm10, 0, %v542_v12  ;;  %595 = vst [vmem:[#allocation2 + $0x84] sm:$0xf] %v594_v23  ;;  %v4683_v40 = vld [vmem:[#allocation2 + $0x78] sm:$0xff]   ;;  %v994_v14 = vrot.slane %v3844_v29, 1  ;;  %v864_v52 = vshll.u32 %v3844_v29, 16  ;;  %2826 = vmatprep.subr.bf16.mxu1 %v6164_v0  ;;  %vm6286_vm11 = vmmov %vm6277_vm2 }
  0x78   : > { %934 = vrot.lane.b32.xlu0 %v4659_v32, %s4005_s25  ;;  %544 = vst [vmem:[#allocation2 + $0x74] sm:$0x4] %v543_v8  ;;  %v868_v39 = vshrl.u32 %v3844_v29, 16  ;;  %v888_v16 = vshll.u32 %v4683_v40, 16  ;;  %v2129_v36 = vrot.slane %v4687_v2, 1  ;;  %1315 = vmatpush1.bf16.msra.mxu0 %v3882_v37  ;;  %v878_v38 = vor.u32 %v876_v45, %v874_v53  ;;  %vm6295_vm0 = vmmov %vm6281_vm3  ;;  %p3950_p3 = pnand %p3949_p2, %p3943_p13 }
  0x79   : > { %v995_v47 = vsel %vm6285_vm15, %v992_v27, %v994_v14  ;;  %v866_v51 = vrot.slane %v864_v52, 1  ;;  %v997_v27 = vsel %vm6287_vm4, %v994_v14, %v996_v46  ;;  %1316 = vmatprep.subr.bf16.mxu0 %v6164_v0  ;;  %v4717_v22 = vld [vmem:[#allocation2 + $0x90] ss:$0 sps:$4 sm:$0x11]   ;;  %v1000_v24 = vrot.slane %v4683_v40, 1  ;;  %vm6296_vm3 = vmmov %vm6276_vm1 }
  0x7a   : > { %1028 = vrot.lane.b32.xlu1 %v995_v47, %s4005_s25  ;;  %v4725_v49 = vsel %vm6289_vm13, %v2129_v36, %v4357_v4  ;;  %v890_v21 = vrot.slane %v888_v16, 1  ;;  %v892_v12 = vshrl.u32 %v4683_v40, 16  ;;  %v908_v23 = vshrl.u32 %v4663_v30, 16  ;;  %vm6297_vm5 = vmmov %vm6295_vm0  ;;  %v3888_v30 = vld [vmem:[%s6131_s1 + $0x78] sm:$0xff]  }
  0x7b   : > { %v637_v56 = vld [vmem:[#allocation2 + $0x98] sm:$0x1]  ;;  %v4711_v34 = vsel %vm6286_vm11, %v862_v28, %v866_v51  ;;  %v870_v33 = vor.u32 %v868_v39, %v866_v51  ;;  %v912_v62 = vshll.u32 %v4717_v22, 16  ;;  %v1472_v29 = vshrl.u32 %v4717_v22, 16  ;;  %v3887_v22 = vld [vmem:[%s6131_s1 + $0x70] sm:$0xff]   ;;  %vm6298_vm9 = vmmov %vm6276_vm1 }
  0x7c   : > { %v638_v9 = vsel %vm4490_vm7, 0, %v637_v56  ;;  %936 = vrot.lane.b32.xlu0 %v4711_v34, %s4005_s25  ;;  %vm6288_vm7 = vmmov %vm6276_vm1  ;;  %1317 = vmatpush1.bf16.msra.mxu0 %v3884_v61  ;;  %v1479_v14 = vshrl.u32 %v4219_v18, 16  ;;  %v1481_v52 = vshll.u32 %v4219_v18, 16  ;;  %v894_v37 = vor.u32 %v892_v12, %v890_v21 }
  0x7d   : > { %639 = vst [vmem:[#allocation2 + $0x98] sm:$0x1] %v638_v9  ;;  %v4721_v17 = vsel %vm6288_vm7, %v2542_v59, %v4357_v4  ;;  %v4728_v10 = vsel %vm6290_vm8, %v870_v33, %v874_v53  ;;  %1318 = vmatprep.subr.bf16.mxu0 %v6164_v0  ;;  %v914_v56 = vrot.slane %v912_v62, 1  ;;  %vm6299_vm10 = vmmov %vm6295_vm0  ;;  %vm1044_vm8 = vcmask 523264  }
  0x7e   : > { %v596_v42 = vld [vmem:[#allocation2 + $0x84] sm:$0x8]  ;;  %1030 = vrot.lane.b32.xlu1 %v997_v27, %s4005_s25  ;;  %v1483_v61 = vrot.slane %v1481_v52, 1  ;;  %vm6300_vm15 = vmmov %vm6276_vm1 }
  0x7f   : > { %v3846_v20 = vld [vmem:[#allocation2 + $0x70] sm:$0xff]   ;;  %v597_v60 = vsel %vm4304_vm14, 0, %v596_v42  ;;  %vm6291_vm14 = vmmov %vm6277_vm2 }
  0x80   : > { %598 = vst [vmem:[#allocation2 + $0x84] sm:$0x8] %v597_v60  ;;  %v998_v63 = vrot.slane %v3846_v20, 1  ;;  %v880_v1 = vshll.u32 %v3846_v20, 16  ;;  %v884_v26 = vshrl.u32 %v3846_v20, 16  ;;  %938 = vrot.lane.b32.xlu0 %v4728_v10, %s4005_s25  ;;  %vm6292_vm2 = vmmov %vm6276_vm1  ;;  %v1007_v20 = vsel %vm6298_vm9, %v1004_v44, %v4696_v43 }
  0x81   : > { %vm6301_vm11 = vmmov %vm6295_vm0 }
  0x82   : > { %v999_v4 = vsel %vm6276_vm1, %v996_v46, %v998_v63  ;;  %v882_v15 = vrot.slane %v880_v1, 1  ;;  %v1001_v31 = vsel %vm6292_vm2, %v998_v63, %v1000_v24  ;;  %v906_v46 = vrot.slane %v904_v5, 1  ;;  %v3885_v5 = vld [vmem:[%s6131_s1 + $0x68] sm:$0xff]   ;;  %vm6302_vm4 = vmmov %vm6276_vm1 }
  0x83   : > { %1032 = vrot.lane.b32.xlu1 %v999_v4, %s4005_s25  ;;  %1319 = vmatpush1.bf16.msra.mxu0 %v3885_v5  ;;  %v1484_v63 = vor.u32 %v1483_v61, %v1479_v14  ;;  %vm6303_vm7 = vmmov %vm6295_vm0 }
  0x84   : > { %v4744_v8 = vsel %vm6291_vm14, %v878_v38, %v882_v15  ;;  %v886_v7 = vor.u32 %v884_v26, %v882_v15  ;;  %v4755_v47 = vld [vmem:[#allocation2 + $0x98] ss:$0 sps:$4 sm:$0x33]   ;;  %1320 = vmatprep.subr.bf16.mxu0 %v6164_v0  ;;  %v910_v33 = vor.u32 %v908_v23, %v906_v46  ;;  %vm6304_vm13 = vmmov %vm6276_vm1 }
  0x85   : > { %940 = vrot.lane.b32.xlu0 %v4744_v8, %s4005_s25  ;;  %v1491_v42 = vrot.slane %v4755_v47, 1  ;;  %v4793_v1 = vld [vmem:[#allocation2 + $0x98] ss:$0 sps:$4 sm:$0x11]   ;;  %vm6305_vm1 = vmmov %vm6295_vm0 }
  0x86   : > { %v4751_v40 = vsel %vm6293_vm12, %v886_v7, %v890_v21  ;;  %v915_v60 = vsel %vm6299_vm10, %v910_v33, %v914_v56  ;;  %v1008_v26 = vrot.slane %v4793_v1, 1  ;;  %v4806_v4 = vld [vmem:[#allocation2 + $0x98] sm:$0xff]   ;;  %vm6306_vm14 = vmmov %vm6295_vm0 }
  0x87   : > { %v3848_v28 = vld [vmem:[#allocation2 + $0x80] sm:$0xff]   ;;  %1034 = vrot.lane.b32.xlu1 %v1001_v31, %s4005_s25  ;;  %1321 = vmatpush1.bf16.msra.mxu0 %v3887_v22  ;;  %v1492_v38 = vsel %vm6300_vm15, %v4696_v43, %v1491_v42  ;;  %v2131_v12 = vrot.slane %v4806_v4, 1  ;;  %vm6307_vm2 = vmmov %vm6295_vm0 }
  0x88   : > { %v1002_v39 = vrot.slane %v3848_v28, 1  ;;  %v896_v53 = vshll.u32 %v3848_v28, 16  ;;  %v900_v45 = vshrl.u32 %v3848_v28, 16  ;;  %1322 = vmatprep.subr.bf16.mxu0 %v6164_v0  ;;  %v1009_v21 = vsel %vm6302_vm4, %v4696_v43, %v1008_v26  ;;  %vm6308_vm12 = vmmov %vm6296_vm3 }
  0x89   : > { %942 = vrot.lane.b32.xlu0 %v4751_v40, %s4005_s25  ;;  %v2132_v23 = vsel %vm6304_vm13, %v4696_v43, %v2131_v12  ;;  %vm6315_vm15 = vmmov %vm6305_vm1 }
  0x8a   : > { %v1003_v51 = vsel %vm6294_vm6, %v1000_v24, %v1002_v39  ;;  %v898_v16 = vrot.slane %v896_v53, 1  ;;  %v1005_v59 = vsel %vm6296_vm3, %v1002_v39, %v1004_v44  ;;  %v959_v44 = vshll.u32 %v4669_v3, 16  ;;  %vm6309_vm6 = vmmov %vm6296_vm3 }
  0x8b   : > { %1036 = vrot.lane.b32.xlu1 %v1003_v51, %s4005_s25  ;;  %1323 = vmatpush1.bf16.msra.mxu0 %v3888_v30  ;;  %v1485_v24 = vsel %vm6301_vm11, %v1484_v63, %v4293_v11  ;;  %vm6319_vm13 = vmmov %vm6305_vm1 }
  0x8c   : > { %v4766_v9 = vsel %vm6295_vm0, %v894_v37, %v898_v16  ;;  %v902_v36 = vor.u32 %v900_v45, %v898_v16  ;;  %2350 = vmatprep.subr.bf16.mxu0 %v6164_v0  ;;  %v4809_v15 = vrot.slane %v959_v44, 1  ;;  %v3883_v44 = vld [vmem:[%s6131_s1 + $0x180] sm:$0xff]   ;;  %vm6310_vm0 = vmmov %vm6296_vm3 }
  0x8d   : > { %944 = vrot.lane.b32.xlu0 %v4766_v9, %s4005_s25  ;;  %vm6311_vm3 = vmmov %vm6305_vm1 }
  0x8e   : > { %v4774_v27 = vsel %vm6297_vm5, %v902_v36, %v906_v46  ;;  %v4820_v11 = vsel %vm6303_vm7, %v910_v33, %v4809_v15  ;;  %vm6312_vm5 = vmmov %vm6305_vm1 }
  0x8f   : > { %1038 = vrot.lane.b32.xlu1 %v1005_v59, %s4005_s25  ;;  %vm6313_vm9 = vmmov %vm6310_vm0 }
  0x90   : > { %vm6314_vm10 = vmmov %vm6310_vm0 }
  0x91   : > { %946 = vrot.lane.b32.xlu0 %v4774_v27, %s4005_s25  ;;  %vm6316_vm11 = vmmov %vm6310_vm0 }
  0x92   : > { %vm6317_vm4 = vmmov %vm6310_vm0 }
  0x93   : > { %1040 = vrot.lane.b32.xlu1 %v1007_v20, %s4005_s25  ;;  %vm6318_vm7 = vmmov %vm6305_vm1 }
  0x95   : > { %948 = vrot.lane.b32.xlu0 %v915_v60, %s4005_s25 }
  0x97   : > { %1493 = vrot.lane.b32.xlu1 %v1492_v38, %s4005_s25 }
  0x99   : > { %1476 = vrot.lane.b32.xlu0 %v1472_v29, %s4005_s25 }
  0x9b   : > { %1495 = vrot.lane.b32.xlu1 %v1491_v42, %s4005_s25 }
  0x9d   : > { %2084 = vrot.lane.b32.xlu0 %v1485_v24, %s4005_s25 }
  0x9f   : > { %2544 = vrot.lane.b32.xlu1 %v4721_v17, %s4005_s25 }
  0xa1   : > { %2135 = vrot.lane.b32.xlu0 %v4725_v49, %s4005_s25 }
  0xa3   : > { %1042 = vrot.lane.b32.xlu1 %v1009_v21, %s4005_s25 }
  0xa5   : > { %2086 = vrot.lane.b32.xlu0 %v4820_v11, %s4005_s25 }
  0xa7   : > { %2137 = vrot.lane.b32.xlu1 %v2132_v23, %s4005_s25 }
  0xaf   : > { %v1011_v17 = vpop.permute.xlu0 %1010 }
  0xb0   : > { %v1098_v49 = vsel %vm1044_vm8, %v4384_v57, %v1011_v17  ;;  %v1502_v62 = vsel %vm1044_vm8, %v1485_v24, %v1011_v17  ;;  %v4866_v24 = vld [vmem:[#allocation2 + $0xa0] ss:$0 sps:$4 sm:$0x33]  }
  0xb1   : > { %1324 = vmatprep.mubr.bf16.mxu0 %v1098_v49  ;;  %v1553_v31 = vshll.u32 %v1502_v62, 16  ;;  %v1551_v46 = vshrl.u32 %v1502_v62, 16 }
  0xb3   : > { %v1475_v29 = vpop.permute.xlu0 %1474  ;;  %v1555_v43 = vrot.slane %v1553_v31, 1 }
  0xb4   : > { %v1498_v7 = vsel %vm1044_vm8, %v4320_v35, %v1475_v29 }
  0xb5   : > { %v1543_v52 = vshll.u32 %v1498_v7, 16  ;;  %v1556_v5 = vor.u32 %v1555_v43, %v1551_v46  ;;  %v1541_v16 = vshrl.u32 %v1498_v7, 16  ;;  %v3921_v46 = vld [vmem:[#allocation2 + $0x20] sm:$0xff]  }
  0xb7   : > { %v1545_v56 = vrot.slane %v1543_v52, 1 }
  0xb9   : > { %v1546_v38 = vor.u32 %v1545_v56, %v1541_v16 }
  0xbb   : > { %v1013_v14 = vpop.permute.xlu1 %1012 }
  0xbc   : > { %v1015_v28 = vpop.permute.xlu0 %1014  ;;  %v4837_v39 = vsel %vm1044_vm8, %v4407_v58, %v1013_v14  ;;  %v3886_v14 = vld [vmem:[%s6131_s1 + $0x188] sm:$0xff]  }
  0xbd   : > { %v4841_v57 = vsel %vm1044_vm8, %v4419_v6, %v1015_v28  ;;  %v1557_v37 = vshll.u32 %v4837_v39, 16  ;;  %v1568_v58 = vshrl.u32 %v4837_v39, 16  ;;  %v2133_v28 = vrot.slane %v4866_v24, 1 }
  0xbe   : > { %v1571_v53 = vshll.u32 %v4841_v57, 16  ;;  %v6157_v61 = vrot.slane %v4841_v57, 1  ;;  %v1582_v17 = vshrl.u32 %v4841_v57, 16 }
  0xbf   : > { %v919_v45 = vpop.permute.xlu1 %918  ;;  %v1559_v51 = vrot.slane %v1557_v37, 1 }
  0xc0   : > { %v4847_v59 = vsel %vm1044_vm8, %v4221_v19, %v919_v45  ;;  %v4853_v60 = vrot.slane %v1571_v53, 1  ;;  %v967_v45 = vshll.u32 %v4793_v1, 16 }
  0xc1   : > { %v1547_v36 = vshll.u32 %v4847_v59, 16  ;;  %v1560_v6 = vsel %vm6305_vm1, %v1556_v5, %v1559_v51  ;;  %v1570_v20 = vor.u32 %v1568_v58, %v1559_v51  ;;  %v1561_v52 = vshrl.u32 %v4847_v59, 16 }
  0xc2   : > { %1947 = vmatprep.mubr.bf16.mxu1 %v1560_v6  ;;  %v1584_v56 = vor.u32 %v1582_v17, %v4853_v60 }
  0xc3   : > { %v1549_v42 = vrot.slane %v1547_v36, 1  ;;  %v921_v22 = vpop.permute.xlu1 %920  ;;  %v3922_v36 = vld [vmem:[#allocation2 + $0x28] sm:$0xff]  }
  0xc4   : > { %v1017_v33 = vpop.permute.xlu0 %1016  ;;  %v4861_v30 = vsel %vm1044_vm8, %v4260_v48, %v921_v22  ;;  %v1574_v48 = vsel %vm6307_vm2, %v1570_v20, %v4853_v60  ;;  %vm6323_vm2 = vmmov %vm6310_vm0 }
  0xc5   : > { %v4857_v63 = vsel %vm1044_vm8, %v4486_v41, %v1017_v33  ;;  %v1564_v21 = vshll.u32 %v4861_v30, 16  ;;  %v1550_v23 = vsel %vm6306_vm14, %v1546_v38, %v1549_v42  ;;  %v6156_v7 = vrot.slane %v4861_v30, 1  ;;  %vm6322_vm14 = vmmov %vm6310_vm0 }
  0xc6   : > { %v2634_v26 = vrot.slane %v4857_v63, 1  ;;  %v1585_v41 = vshll.u32 %v4857_v63, 16  ;;  %1948 = vmatmul.mubr.bf16.vlgmr.msra.gmra.mrb[0].mxu1 %v1550_v23  ;;  %v1563_v5 = vor.u32 %v1561_v52, %v1549_v42  ;;  %v2134_v33 = vsel %vm6309_vm6, %v2131_v12, %v2133_v28  ;;  %vm6325_vm6 = vmmov %vm6305_vm1 }
  0xc7   : > { %v923_v62 = vpop.permute.xlu1 %922  ;;  %2827 = vmatpush1.bf16.msra.mxu1 %v3883_v44  ;;  %1955 = vmatprep.mubr.bf16.mxu1 %v1574_v48  ;;  %v4896_v53 = vrot.slane %v1564_v21, 1  ;;  %v2520_v42 = vshll.u32 %v4755_v47, 16  ;;  %v1575_v20 = vshrl.u32 %v4861_v30, 16  ;;  %v1596_v24 = vshrl.u32 %v4857_v63, 16 }
  0xc8   : > { %v1019_v49 = vpop.permute.xlu0 %1018  ;;  %v4878_v29 = vsel %vm6308_vm12, %v6157_v61, %v2634_v26  ;;  %v4886_v43 = vsel %vm1044_vm8, %v3921_v46, %v923_v62  ;;  %2828 = vmatprep.subr.bf16.mxu1 %v6164_v0  ;;  %v1587_v58 = vrot.slane %v1585_v41, 1  ;;  %2139 = vrot.lane.b32.xlu1 %v2134_v33, %s4005_s25  ;;  %vm6324_vm12 = vmmov %vm6310_vm0 }
  0xc9   : > { %v4882_v31 = vsel %vm1044_vm8, %v4511_v55, %v1019_v49  ;;  %v963_v55 = vshrl.u32 %v4669_v3, 16  ;;  %v2632_v37 = vrot.slane %v4886_v43, 1  ;;  %v3889_v3 = vld [vmem:[%s6131_s1 + $0x190] sm:$0xff]   ;;  %v1578_v38 = vshll.u32 %v4886_v43, 16 }
  0xca   : > { %v2638_v51 = vrot.slane %v4882_v31, 1  ;;  %v1599_v12 = vshll.u32 %v4882_v31, 16  ;;  %v1567_v23 = vsel %vm6311_vm3, %v1563_v5, %v4896_v53  ;;  %v2522_v17 = vrot.slane %v2520_v42, 1  ;;  %vm6329_vm3 = vmmov %vm6323_vm2 }
  0xcb   : > { %v925_v16 = vpop.permute.xlu1 %924  ;;  %2829 = vmatpush1.bf16.msra.mxu1 %v3886_v14  ;;  %v4914_v22 = vsel %vm6310_vm0, %v6156_v7, %v2632_v37  ;;  %v4930_v49 = vsel %vm6312_vm5, %v1584_v56, %v1587_v58  ;;  %v4939_v14 = vor.u32 %v963_v55, %v4809_v15  ;;  %v1577_v56 = vor.u32 %v1575_v20, %v4896_v53  ;;  %vm6327_vm0 = vmmov %vm6305_vm1 }
  0xcc   : > { %v4902_v6 = vsel %vm1044_vm8, %v3922_v36, %v925_v16  ;;  %2830 = vmatprep.subr.bf16.mxu1 %v6164_v0  ;;  %v4933_v62 = vsel %vm6313_vm9, %v2634_v26, %v2638_v51  ;;  %v3890_v26 = vld [vmem:[%s6131_s1 + $0x198] sm:$0xff]   ;;  %v969_v16 = vrot.slane %v967_v45, 1  ;;  %v1580_v15 = vrot.slane %v1578_v38, 1  ;;  %2141 = vrot.lane.b32.xlu1 %v2133_v28, %s4005_s25  ;;  %vm6331_vm5 = vmmov %vm6327_vm0 }
  0xcd   : > { %v2636_v44 = vrot.slane %v4902_v6, 1  ;;  %v1598_v36 = vor.u32 %v1596_v24, %v1587_v58  ;;  %v1601_v33 = vrot.slane %v1599_v12, 1  ;;  %v2524_v20 = vshrl.u32 %v4755_v47, 16  ;;  %v3924_v38 = vld [vmem:[#allocation2 + $0x38] sm:$0xff]   ;;  %vm6333_vm9 = vmmov %vm6327_vm0 }
  0xce   : > { %1956 = vmatmul.mubr.bf16.gmra.mrb[4].mxu1 %v1567_v23  ;;  %v1610_v47 = vshrl.u32 %v4882_v31, 16  ;;  %v1589_v12 = vshrl.u32 %v4886_v43, 16  ;;  %v1592_v23 = vshll.u32 %v4902_v6, 16 }
  0xcf   : > { %v927_v48 = vpop.permute.xlu1 %926  ;;  %v4936_v46 = vsel %vm6314_vm10, %v2632_v37, %v2636_v44  ;;  %1963 = vmatprep.mubr.bf16.mxu1 %v4930_v49  ;;  %2831 = vmatpush1.bf16.msra.mxu1 %v3889_v3  ;;  %v2523_v3 = vsel %vm6315_vm15, %v4939_v14, %v2522_v17  ;;  %vm6335_vm10 = vmmov %vm6323_vm2 }
  0xd0   : > { %2832 = vmatprep.subr.bf16.mxu1 %v6164_v0  ;;  %2527 = vrot.lane.b32.xlu0 %v2523_v3, %s4005_s25  ;;  %vm6337_vm15 = vmmov %vm6327_vm0 }
  0xd1   : > { %v1021_v21 = vpop.permute.xlu0 %1020 }
  0xd2   : > { %v4927_v41 = vsel %vm1044_vm8, %v4547_v50, %v1021_v21  ;;  %v3923_v50 = vld [vmem:[#allocation2 + $0x30] sm:$0xff]  }
  0xd3   : > { %v2642_v52 = vrot.slane %v4927_v41, 1  ;;  %v4944_v5 = vsel %vm1044_vm8, %v3923_v50, %v927_v48  ;;  %v929_v21 = vpop.permute.xlu1 %928  ;;  %2833 = vmatpush1.bf16.msra.mxu1 %v3890_v26  ;;  %v4986_v48 = vsel %vm6319_vm13, %v1577_v56, %v1580_v15  ;;  %v4989_v50 = vsel %vm6305_vm1, %v1598_v36, %v1601_v33  ;;  %v3892_v56 = vld [vmem:[%s6131_s1 + $0x1a8] sm:$0xff]   ;;  %vm6347_vm13 = vmmov %vm6327_vm0 }
  0xd4   : > { %v2640_v37 = vrot.slane %v4944_v5, 1  ;;  %v4969_v24 = vsel %vm1044_vm8, %v3924_v38, %v929_v21  ;;  %2834 = vmatprep.subr.bf16.mxu1 %v6164_v0  ;;  %6320 = vst [vmem:[#allocation6_spill] sm:$0xff] %v4986_v48  ;;  %6321 = vst [vmem:[#allocation7_spill] sm:$0xff] %v4989_v50  ;;  %v1613_v26 = vshll.u32 %v4927_v41, 16 }
  0xd5   : > { %v1023_v55 = vpop.permute.xlu0 %1022  ;;  %v4956_v42 = vsel %vm6316_vm11, %v2638_v51, %v2642_v52  ;;  %v4976_v51 = vsel %vm6318_vm7, %v4939_v14, %v969_v16  ;;  %v2526_v16 = vor.u32 %v2524_v20, %v2522_v17  ;;  %v1612_v20 = vor.u32 %v1610_v47, %v1601_v33  ;;  %vm6339_vm11 = vmmov %vm6327_vm0 }
  0xd6   : > { %v4960_v45 = vsel %vm1044_vm8, %v4580_v13, %v1023_v55  ;;  %v4965_v28 = vsel %vm6317_vm4, %v2636_v44, %v2640_v37  ;;  %v3891_v13 = vld [vmem:[%s6131_s1 + $0x1a0] sm:$0xff]   ;;  %v6155_v44 = vrot.slane %v4969_v24, 1  ;;  %2088 = vrot.lane.b32.xlu1 %v4976_v51, %s4005_s25  ;;  %1964 = vmatmul.mubr.bf16.gmra.mrb[8].mxu1 %v4986_v48  ;;  %v1615_v38 = vrot.slane %v1613_v26, 1  ;;  %vm6342_vm4 = vmmov %vm6323_vm2 }
  0xd7   : > { %v2646_v58 = vrot.slane %v4960_v45, 1  ;;  %1971 = vmatprep.mubr.bf16.mxu1 %v4989_v50  ;;  %2835 = vmatpush1.bf16.msra.mxu1 %v3891_v13  ;;  %v6158_v13 = vshrl.u32 %v4793_v1, 16  ;;  %v1606_v33 = vshll.u32 %v4944_v5, 16  ;;  %vm6345_vm7 = vmmov %vm6327_vm0 }
  0xd8   : > { %v4999_v3 = vsel %vm6323_vm2, %v2640_v37, %v6155_v44  ;;  %2836 = vmatprep.subr.bf16.mxu1 %v6164_v0  ;;  %2529 = vrot.lane.b32.xlu0 %v2526_v16, %s4005_s25  ;;  %v1594_v37 = vrot.slane %v1592_v23, 1  ;;  %v931_v7 = vpop.permute.xlu1 %930  ;;  %v3898_v23 = vld [vmem:[%s6131_s1 + $0x100] sm:$0xff]   ;;  %vm6349_vm1 = vmmov %vm6327_vm0 }
  0xd9   : > { %v4994_v55 = vsel %vm6322_vm14, %v2642_v52, %v2646_v58  ;;  %v1591_v52 = vor.u32 %v1589_v12, %v1580_v15  ;;  %v1603_v15 = vshrl.u32 %v4902_v6, 16  ;;  %vm6351_vm14 = vmmov %vm6327_vm0 }
  0xda   : > { %vm6353_vm2 = vmmov %vm6327_vm0 }
  0xdb   : > { %2837 = vmatpush1.bf16.msra.mxu1 %v3892_v56  ;;  %v5031_v12 = vsel %vm6325_vm6, %v1591_v52, %v1594_v37  ;;  %v3894_v56 = vld [vmem:[%s6131_s1 + $0x1b8] sm:$0xff]   ;;  %vm6358_vm6 = vmmov %vm6327_vm0 }
  0xdc   : > { %2838 = vmatprep.subr.bf16.mxu1 %v6164_v0  ;;  %2090 = vrot.lane.b32.xlu0 %v6158_v13, %s4005_s25  ;;  %6326 = vst [vmem:[#allocation8_spill] sm:$0xff] %v5031_v12  ;;  %v1605_v13 = vor.u32 %v1603_v15, %v1594_v37 }
  0xde   : > { %v1025_v21 = vpop.permute.xlu0 %1024  ;;  %1972 = vmatmul.mubr.bf16.gmra.mrb[12].mxu1 %v5031_v12  ;;  %v1608_v12 = vrot.slane %v1606_v33, 1 }
  0xdf   : > { %v5007_v36 = vsel %vm1044_vm8, %v4622_v54, %v1025_v21  ;;  %v3893_v54 = vld [vmem:[%s6131_s1 + $0x1b0] sm:$0xff]  }
  0xe0   : > { %v2650_v17 = vrot.slane %v5007_v36, 1  ;;  %2839 = vmatpush1.bf16.msra.mxu1 %v3893_v54  ;;  %v5066_v37 = vsel %vm6331_vm5, %v1605_v13, %v1608_v12  ;;  %v1641_v15 = vshll.u32 %v5007_v36, 16  ;;  %v3896_v13 = vld [vmem:[%s6131_s1 + $0x1c8] sm:$0xff]   ;;  %vm6360_vm5 = vmmov %vm6327_vm0 }
  0xe1   : > { %2840 = vmatprep.subr.bf16.mxu1 %v6164_v0  ;;  %6332 = vst [vmem:[#allocation11_spill] sm:$0xff] %v5066_v37 }
  0xe2   : > { %v1027_v44 = vpop.permute.xlu0 %1026  ;;  %v5017_v21 = vsel %vm6324_vm12, %v2646_v58, %v2650_v17  ;;  %v1624_v58 = vshrl.u32 %v4927_v41, 16  ;;  %vm6355_vm12 = vmmov %vm6327_vm0 }
  0xe3   : > { %v5021_v16 = vsel %vm1044_vm8, %v4659_v32, %v1027_v44  ;;  %v1627_v32 = vshll.u32 %v4960_v45, 16  ;;  %v5037_v44 = vsel %vm6327_vm0, %v1612_v20, %v1615_v38  ;;  %v5052_v20 = vpop.permute.xlu1 %932 }
  0xe4   : > { %v2654_v47 = vrot.slane %v5021_v16, 1  ;;  %6328 = vst [vmem:[#allocation9_spill] sm:$0xff] %v5037_v44  ;;  %1979 = vmatprep.mubr.bf16.mxu1 %v5037_v44  ;;  %v1626_v54 = vor.u32 %v1624_v58, %v1615_v38  ;;  %2841 = vmatpush1.bf16.msra.mxu1 %v3894_v56  ;;  %v1638_v38 = vshrl.u32 %v4960_v45, 16  ;;  %v3901_v58 = vld [vmem:[%s6131_s1 + $0x110] sm:$0xff]  }
  0xe5   : > { %v1629_v44 = vrot.slane %v1627_v32, 1  ;;  %2842 = vmatprep.subr.bf16.mxu1 %v6164_v0 }
  0xe6   : > { %v917_v26 = vpop.permute.xlu0 %916  ;;  %v5047_v52 = vsel %vm6329_vm3, %v2650_v17, %v2654_v47  ;;  %v3900_v17 = vld [vmem:[%s6131_s1 + $0x108] sm:$0xff]   ;;  %1980 = vmatmul.mubr.bf16.gmra.mrb[16].mxu1 %v5066_v37  ;;  %v1643_v37 = vrot.slane %v1641_v15, 1  ;;  %v1655_v15 = vshll.u32 %v5021_v16, 16  ;;  %vm6359_vm3 = vmmov %vm6327_vm0 }
  0xe7   : > { %6330 = vst [vmem:[#allocation10_spill] sm:$0xff] %v5047_v52  ;;  %v1046_v61 = vsel %vm1044_vm8, %v4320_v35, %v917_v26  ;;  %v3895_v35 = vld [vmem:[%s6131_s1 + $0x1c0] sm:$0xff]   ;;  %v5072_v33 = vsel %vm6333_vm9, %v1626_v54, %v1629_v44  ;;  %v3928_v52 = vld [vmem:[#allocation2 + $0x58] sm:$0xff]   ;;  %vm6362_vm9 = vmmov %vm6342_vm4 }
  0xe8   : > { %1325 = vmatmul.mubr.bf16.vlgmr.msra.gmra.mrb[0].mxu0 %v1046_v61  ;;  %v1617_v61 = vshrl.u32 %v4944_v5, 16  ;;  %6334 = vst [vmem:[#allocation12_spill] sm:$0xff] %v5072_v33  ;;  %1987 = vmatprep.mubr.bf16.mxu1 %v5072_v33  ;;  %v1640_v33 = vor.u32 %v1638_v38, %v1629_v44  ;;  %v1631_v44 = vshrl.u32 %v4969_v24, 16  ;;  %v1652_v38 = vshrl.u32 %v5007_v36, 16 }
  0xe9   : > { %1332 = vmatprep.mubr.bf16.mxu0 %v4837_v39  ;;  %2351 = vmatpush1.bf16.msra.mxu0 %v3898_v23  ;;  %v1620_v39 = vshll.u32 %v4969_v24, 16 }
  0xea   : > { %2352 = vmatprep.subr.bf16.mxu0 %v6164_v0  ;;  %2843 = vmatpush1.bf16.msra.mxu1 %v3895_v35  ;;  %v1619_v56 = vor.u32 %v1617_v61, %v1608_v12 }
  0xeb   : > { %2844 = vmatprep.subr.bf16.mxu1 %v6164_v0  ;;  %v1622_v54 = vrot.slane %v1620_v39, 1 }
  0xec   : > { %v1029_v32 = vpop.permute.xlu1 %1028 }
  0xed   : > { %2353 = vmatpush1.bf16.msra.mxu0 %v3900_v17  ;;  %v5083_v23 = vsel %vm1044_vm8, %v4711_v34, %v1029_v32  ;;  %v3925_v17 = vld [vmem:[#allocation2 + $0x40] sm:$0xff]   ;;  %v3903_v34 = vld [vmem:[%s6131_s1 + $0x118] sm:$0xff]   ;;  %v5111_v39 = vsel %vm6337_vm15, %v1619_v56, %v1622_v54  ;;  %vm6364_vm15 = vmmov %vm6327_vm0 }
  0xee   : > { %2354 = vmatprep.subr.bf16.mxu0 %v6164_v0  ;;  %v2658_v26 = vrot.slane %v5083_v23, 1  ;;  %v5090_v35 = vsel %vm1044_vm8, %v3925_v17, %v931_v7  ;;  %2845 = vmatpush1.bf16.msra.mxu1 %v3896_v13  ;;  %6338 = vst [vmem:[#allocation14_spill] sm:$0xff] %v5111_v39  ;;  %v3899_v56 = vld [vmem:[%s6131_s1 + $0x1d8] sm:$0xff]  }
  0xef   : > { %2846 = vmatprep.subr.bf16.mxu1 %v6164_v0  ;;  %v1634_v61 = vshll.u32 %v5090_v35, 16  ;;  %1988 = vmatmul.mubr.bf16.gmra.mrb[20].mxu1 %v5111_v39 }
  0xf0   : > { %1333 = vmatmul.mubr.bf16.gmra.mrb[4].mxu0 %v4847_v59  ;;  %v1031_v32 = vpop.permute.xlu1 %1030  ;;  %v3897_v59 = vld [vmem:[%s6131_s1 + $0x1d0] sm:$0xff]   ;;  %v5106_v12 = vsel %vm6335_vm10, %v2654_v47, %v2658_v26  ;;  %v3904_v47 = vld [vmem:[%s6131_s1 + $0x120] sm:$0xff]   ;;  %vm6363_vm10 = vmmov %vm6327_vm0 }
  0xf1   : > { %1340 = vmatprep.mubr.bf16.mxu0 %v4841_v57  ;;  %2355 = vmatpush1.bf16.msra.mxu0 %v3901_v58  ;;  %v5102_v7 = vsel %vm1044_vm8, %v4728_v10, %v1031_v32  ;;  %6336 = vst [vmem:[#allocation13_spill] sm:$0xff] %v5106_v12  ;;  %v5118_v10 = vsel %vm6339_vm11, %v1640_v33, %v1643_v37  ;;  %v1636_v17 = vrot.slane %v1634_v61, 1  ;;  %v1657_v58 = vrot.slane %v1655_v15, 1  ;;  %v3907_v15 = vld [vmem:[%s6131_s1 + $0x130] sm:$0xff]   ;;  %vm6365_vm11 = vmmov %vm6327_vm0 }
  0xf2   : > { %2356 = vmatprep.subr.bf16.mxu0 %v6164_v0  ;;  %6340 = vst [vmem:[#allocation15_spill] sm:$0xff] %v5118_v10  ;;  %1995 = vmatprep.mubr.bf16.mxu1 %v5118_v10  ;;  %v1633_v33 = vor.u32 %v1631_v44, %v1622_v54  ;;  %v3906_v10 = vld [vmem:[%s6131_s1 + $0x128] sm:$0xff]  }
  0xf3   : > { %2847 = vmatpush1.bf16.msra.mxu1 %v3897_v59  ;;  %v1654_v59 = vor.u32 %v1652_v38, %v1643_v37  ;;  %v1645_v37 = vshrl.u32 %v5090_v35, 16 }
  0xf4   : > { %2848 = vmatprep.subr.bf16.mxu1 %v6164_v0  ;;  %v5155_v61 = vsel %vm6345_vm7, %v1633_v33, %v1636_v17  ;;  %v935_v33 = vpop.permute.xlu0 %934  ;;  %vm6369_vm7 = vmmov %vm6327_vm0 }
  0xf5   : > { %2357 = vmatpush1.bf16.msra.mxu0 %v3903_v34  ;;  %v5123_v13 = vpop.permute.xlu1 %1032  ;;  %v3926_v34 = vld [vmem:[#allocation2 + $0x48] sm:$0xff]   ;;  %6346 = vst [vmem:[#allocation17_spill] sm:$0xff] %v5155_v61  ;;  %v5161_v38 = vsel %vm6347_vm13, %v1654_v59, %v1657_v58  ;;  %v3927_v59 = vld [vmem:[#allocation2 + $0x50] sm:$0xff]   ;;  %vm6370_vm13 = vmmov %vm6327_vm0 }
  0xf6   : > { %2358 = vmatprep.subr.bf16.mxu0 %v6164_v0  ;;  %v5134_v32 = vsel %vm1044_vm8, %v3926_v34, %v5052_v20  ;;  %v6341_v0 = vrot.slane %v5102_v7, 1  ;;  %v3902_v20 = vld [vmem:[%s6131_s1 + $0x1e0] sm:$0xff]   ;;  %6348 = vst [vmem:[#allocation18_spill] sm:$0xff] %v5161_v38 }
  0xf7   : > { %2849 = vmatpush1.bf16.msra.mxu1 %v3899_v56  ;;  %v1648_v44 = vshll.u32 %v5134_v32, 16  ;;  %v3905_v56 = vld [vmem:[%s6131_s1 + $0x1e8] sm:$0xff]  }
  0xf8   : > { %1341 = vmatmul.mubr.bf16.gmra.mrb[8].mxu0 %v4861_v30  ;;  %v5143_v39 = vsel %vm6342_vm4, %v2658_v26, %v6341_v0  ;;  %v1666_v0 = vshrl.u32 %v5021_v16, 16  ;;  %v1669_v26 = vshll.u32 %v5083_v23, 16  ;;  %1996 = vmatmul.mubr.bf16.gmra.mrb[24].mxu1 %v5155_v61  ;;  %v5176_v61 = vsel %vm1044_vm8, %v3927_v59, %v935_v33  ;;  %v3913_v33 = vld [vmem:[%s6131_s1 + $0x1f8] sm:$0xff]   ;;  %vm6367_vm4 = vmmov %vm6327_vm0 }
  0xf9   : > { %1348 = vmatprep.mubr.bf16.mxu0 %v4857_v63  ;;  %2359 = vmatpush1.bf16.msra.mxu0 %v3904_v47  ;;  %6343 = vst [vmem:[#allocation16_spill] sm:$0xff] %v5143_v39  ;;  %v5145_v54 = vpop.permute.xlu1 %1034  ;;  %v6344_v63 = vmov 0   ;;  %v1650_v34 = vrot.slane %v1648_v44, 1  ;;  %v3909_v39 = vld [vmem:[%s6131_s1 + $0x138] sm:$0xff]   ;;  %v1680_v44 = vshrl.u32 %v5083_v23, 16 }
  0xfa   : > { %2360 = vmatprep.subr.bf16.mxu0 %v6344_v63  ;;  %2850 = vmatprep.subr.bf16.mxu1 %v6344_v63 }
  0xfb   : > { %2003 = vmatprep.mubr.bf16.mxu1 %v5161_v38  ;;  %2851 = vmatpush1.bf16.msra.mxu1 %v3902_v20  ;;  %v1668_v20 = vor.u32 %v1666_v0, %v1657_v58  ;;  %v1671_v38 = vrot.slane %v1669_v26, 1  ;;  %v1662_v58 = vshll.u32 %v5176_v61, 16  ;;  %v1683_v0 = vshll.u32 %v5102_v7, 16 }
  0xfc   : > { %2852 = vmatprep.subr.bf16.mxu1 %v6344_v63 }
  0xfd   : > { %2361 = vmatpush1.bf16.msra.mxu0 %v3906_v10  ;;  %v5166_v47 = vpop.permute.xlu1 %1036  ;;  %v1647_v10 = vor.u32 %v1645_v37, %v1636_v17  ;;  %v2106_v17 = vshll.u32 %v4687_v2, 16  ;;  %v5199_v26 = vsel %vm6351_vm14, %v1668_v20, %v1671_v38  ;;  %v1685_v50 = vrot.slane %v1683_v0, 1  ;;  %vm6372_vm14 = vmmov %vm6327_vm0 }
  0xfe   : > { %2362 = vmatprep.subr.bf16.mxu0 %v6344_v63  ;;  %6352 = vst [vmem:[#allocation20_spill] sm:$0xff] %v5199_v26 }
  0xff   : > { %2853 = vmatpush1.bf16.msra.mxu1 %v3905_v56  ;;  %v5193_v37 = vsel %vm6349_vm1, %v1647_v10, %v1650_v34  ;;  %v2104_v10 = vshrl.u32 %v4687_v2, 16  ;;  %v2108_v59 = vrot.slane %v2106_v17, 1  ;;  %v3912_v2 = vld [vmem:[%s6131_s1 + $0x148] sm:$0xff]   ;;  %v5222_v17 = vsel %vm1044_vm8, %v4744_v8, %v5123_v13  ;;  %vm6371_vm1 = vmmov %vm6327_vm0 }
 0x100   : > { %1349 = vmatmul.mubr.bf16.gmra.mrb[12].mxu0 %v4886_v43  ;;  %v3908_v43 = vld [vmem:[%s6131_s1 + $0x1f0] sm:$0xff]   ;;  %2854 = vmatprep.subr.bf16.mxu1 %v6344_v63  ;;  %6350 = vst [vmem:[#allocation19_spill] sm:$0xff] %v5193_v37  ;;  %v1694_v8 = vshrl.u32 %v5102_v7, 16  ;;  %v1697_v13 = vshll.u32 %v5222_v17, 16 }
 0x101   : > { %1356 = vmatprep.mubr.bf16.mxu0 %v4882_v31  ;;  %2363 = vmatpush1.bf16.msra.mxu0 %v3907_v15  ;;  %v5182_v12 = vpop.permute.xlu1 %1038  ;;  %v1659_v31 = vshrl.u32 %v5134_v32, 16  ;;  %v3911_v15 = vld [vmem:[%s6131_s1 + $0x140] sm:$0xff]  }
 0x102   : > { %2364 = vmatprep.subr.bf16.mxu0 %v6344_v63  ;;  %2004 = vmatmul.mubr.bf16.gmra.mrb[28].mxu1 %v5193_v37  ;;  %v1664_v37 = vrot.slane %v1662_v58, 1 }
 0x103   : > { %2011 = vmatprep.mubr.bf16.mxu1 %v5199_v26  ;;  %2855 = vmatpush1.bf16.msra.mxu1 %v3908_v43  ;;  %v1661_v20 = vor.u32 %v1659_v31, %v1650_v34  ;;  %v1682_v43 = vor.u32 %v1680_v44, %v1671_v38  ;;  %v2109_v38 = vor.u32 %v2108_v59, %v2104_v10  ;;  %v6357_v59 = vshrl.u32 %v4793_v1, 16 }
 0x104   : > { %2856 = vmatprep.subr.bf16.mxu1 %v6344_v63  ;;  %v1696_v1 = vor.u32 %v1694_v8, %v1685_v50 }
 0x105   : > { %2365 = vmatpush1.bf16.msra.mxu0 %v3909_v39  ;;  %v1041_v56 = vpop.permute.xlu1 %1040  ;;  %v937_v39 = vpop.permute.xlu0 %936  ;;  %v5230_v44 = vsel %vm6353_vm2, %v1661_v20, %v1664_v37  ;;  %v5236_v0 = vsel %vm6355_vm12, %v1682_v43, %v1685_v50  ;;  %v5250_v20 = vsel %vm6358_vm6, %v2109_v38, %v4375_v25  ;;  %v2112_v43 = vshll.u32 %v4806_v4, 16  ;;  %v3915_v25 = vld [vmem:[%s6131_s1 + $0x158] sm:$0xff]   ;;  %vm6373_vm2 = vmmov %vm6327_vm0 }
 0x106   : > { %2366 = vmatprep.subr.bf16.mxu0 %v6344_v63  ;;  %v5213_v26 = vsel %vm1044_vm8, %v3928_v52, %v937_v39  ;;  %v1673_v52 = vshrl.u32 %v5176_v61, 16  ;;  %6354 = vst [vmem:[#allocation21_spill] sm:$0xff] %v5230_v44  ;;  %6356 = vst [vmem:[#allocation22_spill] sm:$0xff] %v5236_v0  ;;  %v5265_v4 = vsel %vm1044_vm8, %v4751_v40, %v5145_v54 }
 0x107   : > { %2857 = vmatpush1.bf16.msra.mxu1 %v3913_v33  ;;  %v1676_v34 = vshll.u32 %v5213_v26, 16  ;;  %v5275_v38 = vrot.slane %v2112_v43, 1  ;;  %v1711_v8 = vshll.u32 %v5265_v4, 16  ;;  %vm6374_vm12 = vmmov %vm6327_vm0 }
 0x108   : > { %1357 = vmatmul.mubr.bf16.gmra.mrb[16].mxu0 %v4902_v6  ;;  %vm6375_vm6 = vmmov %vm6327_vm0 }
 0x109   : > { %1364 = vmatprep.mubr.bf16.mxu0 %v4927_v41  ;;  %2367 = vmatpush1.bf16.msra.mxu0 %v3911_v15  ;;  %v1494_v6 = vpop.permute.xlu1 %1493  ;;  %v3914_v15 = vld [vmem:[%s6131_s1 + $0x150] sm:$0xff]  }
 0x10a   : > { %2368 = vmatprep.subr.bf16.mxu0 %v6344_v63  ;;  %v1504_v41 = vsel %vm1044_vm8, %v4976_v51, %v1494_v6  ;;  %2012 = vmatmul.mubr.bf16.gmra.mrb[32].mxu1 %v5230_v44  ;;  %v3929_v44 = vld [vmem:[#allocation2 + $0x60] sm:$0xff]  }
 0x10b   : > { %v1767_v31 = vshll.u32 %v1504_v41, 16  ;;  %v1778_v58 = vshrl.u32 %v1504_v41, 16  ;;  %2019 = vmatprep.mubr.bf16.mxu1 %v5236_v0  ;;  %v1678_v0 = vrot.slane %v1676_v34, 1 }
 0x10d   : > { %2369 = vmatpush1.bf16.msra.mxu0 %v3912_v2  ;;  %v5241_v33 = vrot.slane %v1767_v31, 1  ;;  %v1496_v10 = vpop.permute.xlu1 %1495  ;;  %v939_v2 = vpop.permute.xlu0 %938  ;;  %v1675_v31 = vor.u32 %v1673_v52, %v1664_v37  ;;  %v1687_v52 = vshrl.u32 %v5213_v26, 16 }
 0x10e   : > { %2370 = vmatprep.subr.bf16.mxu0 %v6344_v63  ;;  %v1507_v39 = vsel %vm1044_vm8, %v6357_v59, %v1496_v10  ;;  %v5256_v48 = vsel %vm1044_vm8, %v3929_v44, %v939_v2  ;;  %v1699_v10 = vrot.slane %v1697_v13, 1  ;;  %v1708_v44 = vshrl.u32 %v5222_v17, 16 }
 0x10f   : > { %v1780_v6 = vor.u32 %v1778_v58, %v5241_v33  ;;  %v1781_v41 = vshll.u32 %v1507_v39, 16  ;;  %v1690_v34 = vshll.u32 %v5256_v48, 16  ;;  %v5279_v40 = vsel %vm6327_vm0, %v1675_v31, %v1678_v0 }
 0x110   : > { %1365 = vmatmul.mubr.bf16.gmra.mrb[20].mxu0 %v4944_v5  ;;  %v6361_v59 = vrot.slane %v4841_v57, 1  ;;  %v2115_v31 = vsel %vm6363_vm10, %v4939_v14, %v5275_v38  ;;  %v1710_v57 = vor.u32 %v1708_v44, %v1699_v10  ;;  %vm6380_vm10 = vmmov %vm6327_vm0 }
 0x111   : > { %1372 = vmatprep.mubr.bf16.mxu0 %v4960_v45  ;;  %2371 = vmatpush1.bf16.msra.mxu0 %v3914_v15  ;;  %v1783_v5 = vrot.slane %v1781_v41, 1  ;;  %v2545_v37 = vpop.permute.xlu1 %2544  ;;  %v5271_v45 = vsel %vm1044_vm8, %v4820_v11, %v1041_v56  ;;  %v5288_v11 = vsel %vm6360_vm5, %v1696_v1, %v1699_v10  ;;  %v3916_v56 = vld [vmem:[%s6131_s1 + $0x160] sm:$0xff]   ;;  %v941_v43 = vpop.permute.xlu0 %940  ;;  %v1692_v41 = vrot.slane %v1690_v34, 1  ;;  %v3930_v1 = vld [vmem:[#allocation2 + $0x68] sm:$0xff]   ;;  %vm6378_vm5 = vmmov %vm6327_vm0 }
 0x112   : > { %2372 = vmatprep.subr.bf16.mxu0 %v6344_v63  ;;  %v2552_v50 = vsel %vm1044_vm8, %v5250_v20, %v2545_v37  ;;  %2020 = vmatmul.mubr.bf16.gmra.mrb[36].mxu1 %v5279_v40  ;;  %v1753_v13 = vshll.u32 %v5271_v45, 16  ;;  %v1764_v2 = vshrl.u32 %v5271_v45, 16  ;;  %v3917_v37 = vld [vmem:[%s6131_s1 + $0x168] sm:$0xff]  }
 0x113   : > { %v2629_v58 = vrot.slane %v2552_v50, 1  ;;  %v5282_v54 = vsel %vm6359_vm3, %v1780_v6, %v1783_v5  ;;  %2027 = vmatprep.mubr.bf16.mxu1 %v5288_v11  ;;  %v1689_v6 = vor.u32 %v1687_v52, %v1678_v0  ;;  %v1713_v5 = vrot.slane %v1711_v8, 1  ;;  %vm6377_vm3 = vmmov %vm6327_vm0 }
 0x114   : > { %v5318_v0 = vsel %vm1044_vm8, %v4766_v9, %v5166_v47  ;;  %v5320_v14 = vrot.slane %v1753_v13, 1  ;;  %v1701_v50 = vshrl.u32 %v5256_v48, 16  ;;  %v1722_v47 = vshrl.u32 %v5265_v4, 16 }
 0x115   : > { %2373 = vmatpush1.bf16.msra.mxu0 %v3915_v25  ;;  %v5295_v15 = vpop.permute.xlu1 %1042  ;;  %v5300_v39 = vsel %vm6362_vm9, %v2629_v58, %v6361_v59  ;;  %v5309_v25 = vsel %vm1044_vm8, %v3930_v1, %v941_v43  ;;  %v5329_v34 = vsel %vm6364_vm15, %v1689_v6, %v1692_v41  ;;  %v1725_v44 = vshll.u32 %v5318_v0, 16  ;;  %v943_v59 = vpop.permute.xlu0 %942  ;;  %vm6381_vm15 = vmmov %vm6327_vm0 }
 0x116   : > { %2374 = vmatprep.subr.bf16.mxu0 %v6344_v63  ;;  %v1704_v10 = vshll.u32 %v5309_v25, 16  ;;  %v5333_v9 = vor.u32 %v1764_v2, %v5320_v14  ;;  %v5339_v8 = vsel %vm6365_vm11, %v1710_v57, %v1713_v5  ;;  %v1703_v43 = vor.u32 %v1701_v50, %v1692_v41  ;;  %vm6385_vm11 = vmmov %vm6362_vm9 }
 0x117   : > { %v1724_v57 = vor.u32 %v1722_v47, %v1713_v5  ;;  %v5364_v41 = vsel %vm1044_vm8, %v4774_v27, %v5182_v12  ;;  %v1715_v50 = vshrl.u32 %v5309_v25, 16  ;;  %v1736_v5 = vshrl.u32 %v5318_v0, 16 }
 0x118   : > { %1373 = vmatmul.mubr.bf16.gmra.mrb[24].mxu0 %v4969_v24  ;;  %v1706_v2 = vrot.slane %v1704_v10, 1 }
 0x119   : > { %1380 = vmatprep.mubr.bf16.mxu0 %v5007_v36  ;;  %2375 = vmatpush1.bf16.msra.mxu0 %v3916_v56  ;;  %v2138_v52 = vpop.permute.xlu1 %2137  ;;  %v3918_v56 = vld [vmem:[%s6131_s1 + $0x170] sm:$0xff]   ;;  %v945_v27 = vpop.permute.xlu0 %944 }
 0x11a   : > { %2376 = vmatprep.subr.bf16.mxu0 %v6344_v63  ;;  %v5325_v36 = vsel %vm1044_vm8, %v2115_v31, %v2138_v52  ;;  %2028 = vmatmul.mubr.bf16.gmra.mrb[40].mxu1 %v5329_v34  ;;  %v3931_v31 = vld [vmem:[#allocation2 + $0x70] sm:$0xff]   ;;  %v3919_v52 = vld [vmem:[%s6131_s1 + $0x178] sm:$0xff]   ;;  %v1717_v12 = vor.u32 %v1715_v50, %v1706_v2 }
 0x11b   : > { %v2214_v58 = vshll.u32 %v5325_v36, 16  ;;  %2035 = vmatprep.mubr.bf16.mxu1 %v5339_v8  ;;  %v5355_v1 = vsel %vm1044_vm8, %v3931_v31, %v943_v59 }
 0x11c   : > { %v1718_v10 = vshll.u32 %v5355_v1, 16  ;;  %v1729_v31 = vshrl.u32 %v5355_v1, 16 }
 0x11d   : > { %2377 = vmatpush1.bf16.msra.mxu0 %v3917_v37  ;;  %v5345_v13 = vrot.slane %v2214_v58, 1  ;;  %v1727_v37 = vrot.slane %v1725_v44, 1  ;;  %v1739_v58 = vshll.u32 %v5364_v41, 16  ;;  %v3932_v44 = vld [vmem:[#allocation2 + $0x78] sm:$0xff]   ;;  %v947_v50 = vpop.permute.xlu0 %946 }
 0x11e   : > { %2378 = vmatprep.subr.bf16.mxu0 %v6344_v63 }
 0x11f   : > { %6366 = vst [vmem:[#allocation23_spill] sm:$0xff] %v5345_v13  ;;  %v5352_v6 = vsel %vm6367_vm4, %v5333_v9, %v5345_v13  ;;  %v5376_v47 = vsel %vm6370_vm13, %v1724_v57, %v1727_v37  ;;  %v1738_v59 = vor.u32 %v1736_v5, %v1727_v37  ;;  %v1750_v13 = vshrl.u32 %v5364_v41, 16  ;;  %vm6389_vm4 = vmmov %vm6362_vm9 }
 0x120   : > { %1381 = vmatmul.mubr.bf16.gmra.mrb[28].mxu0 %v5090_v35  ;;  %6368 = vst [vmem:[#allocation24_spill] sm:$0xff] %v5352_v6  ;;  %vm6397_vm13 = vmmov %vm6389_vm4 }
 0x121   : > { %1388 = vmatprep.mubr.bf16.mxu0 %v5021_v16  ;;  %2379 = vmatpush1.bf16.msra.mxu0 %v3918_v56  ;;  %v5370_v16 = vsel %vm6369_vm7, %v1703_v43, %v1706_v2  ;;  %v5381_v56 = vsel %vm1044_vm8, %v3932_v44, %v945_v27  ;;  %v1741_v43 = vrot.slane %v1739_v58, 1  ;;  %vm6393_vm7 = vmmov %vm6389_vm4 }
 0x122   : > { %2380 = vmatprep.subr.bf16.mxu0 %v6344_v63  ;;  %2036 = vmatmul.mubr.bf16.gmra.mrb[44].mxu1 %v5370_v16  ;;  %v1720_v63 = vrot.slane %v1718_v10, 1  ;;  %v1732_v57 = vshll.u32 %v5381_v56, 16  ;;  %v3933_v10 = vld [vmem:[#allocation2 + $0x80] sm:$0xff]   ;;  %v1743_v27 = vshrl.u32 %v5381_v56, 16 }
 0x123   : > { %2043 = vmatprep.mubr.bf16.mxu1 %v5376_v47  ;;  %v5392_v2 = vsel %vm6372_vm14, %v1738_v59, %v1741_v43  ;;  %v5397_v5 = vsel %vm1044_vm8, %v3933_v10, %v947_v50  ;;  %v1752_v58 = vor.u32 %v1750_v13, %v1741_v43  ;;  %v949_v59 = vpop.permute.xlu0 %948  ;;  %v5412_v43 = vld [vmem:[#allocation2 + $0x88] sm:$0xff]  }
 0x124   : > { %v1734_v37 = vrot.slane %v1732_v57, 1  ;;  %v1094_v57 = vsel %vm1044_vm8, %v5412_v43, %v949_v59  ;;  %v1757_v50 = vshrl.u32 %v5397_v5, 16 }
 0x125   : > { %2381 = vmatpush1.bf16.msra.mxu0 %v3919_v52  ;;  %v5387_v52 = vsel %vm6371_vm1, %v1717_v12, %v1720_v63  ;;  %v1746_v12 = vshll.u32 %v5397_v5, 16  ;;  %vm6399_vm1 = vmmov %vm6389_vm4 }
 0x126   : > { %vm6402_vm14 = vmmov %vm6399_vm1 }
 0x127   : > { %v1748_v13 = vrot.slane %v1746_v12, 1  ;;  %v3935_v12 = vld [vmem:[#allocation2 + $0x90] ss:$0 sps:$4 sm:$0x11]  }
 0x128   : > { %1389 = vmatmul.mubr.bf16.gmra.mrb[32].mxu0 %v5134_v32 }
 0x129   : > { %1396 = vmatprep.mubr.bf16.mxu0 %v5083_v23  ;;  %v1731_v23 = vor.u32 %v1729_v31, %v1720_v63  ;;  %v5408_v63 = vsel %vm6374_vm12, %v1752_v58, %v5320_v14  ;;  %v1745_v31 = vor.u32 %v1743_v27, %v1734_v37  ;;  %v1477_v58 = vpop.permute.xlu0 %1476  ;;  %v5426_v27 = vor.u32 %v1757_v50, %v1748_v13  ;;  %vm6406_vm12 = vmmov %vm6399_vm1 }
 0x12a   : > { %2044 = vmatmul.mubr.bf16.gmra.mrb[48].mxu1 %v5387_v52  ;;  %v1500_v59 = vsel %vm1044_vm8, %v3935_v12, %v1477_v58 }
 0x12b   : > { %2051 = vmatprep.mubr.bf16.mxu1 %v5392_v2  ;;  %v5403_v44 = vsel %vm6373_vm2, %v1731_v23, %v1734_v37  ;;  %v1760_v23 = vshll.u32 %v1094_v57, 16  ;;  %v5419_v14 = vsel %vm6375_vm6, %v1745_v31, %v1748_v13  ;;  %v1770_v37 = vsel %vm6327_vm0, %v5333_v9, %v5241_v33  ;;  %vm6403_vm2 = vmmov %vm6399_vm1 }
 0x12c   : > { %6376 = vst [vmem:[#allocation25_spill] sm:$0xff] %v5419_v14  ;;  %v1771_v31 = vshrl.u32 %v1094_v57, 16  ;;  %v1774_v6 = vshll.u32 %v1500_v59, 16  ;;  %v2656_v59 = vrot.slane %v5176_v61, 1  ;;  %vm6407_vm6 = vmmov %vm6399_vm1 }
 0x12d   : > { %v1762_v10 = vrot.slane %v1760_v23, 1  ;;  %v2085_v13 = vpop.permute.xlu0 %2084  ;;  %vm6410_vm0 = vmmov %vm6399_vm1 }
 0x12e   : > { %v1776_v9 = vrot.slane %v1774_v6, 1  ;;  %v2546_v23 = vsel %vm1044_vm8, %v4219_v18, %v2085_v13 }
 0x12f   : > { %v1773_v33 = vor.u32 %v1771_v31, %v1762_v10  ;;  %v6391_v31 = vld [vmem:[#allocation11_spill] sm:$0xff] }
 0x130   : > { %1397 = vmatmul.mubr.bf16.gmra.mrb[36].mxu0 %v5176_v61  ;;  %v6398_v61 = vrot.slane %v5102_v7, 1 }
 0x131   : > { %1404 = vmatprep.mubr.bf16.mxu0 %v5102_v7  ;;  %v1777_v50 = vsel %vm6378_vm5, %v1773_v33, %v1776_v9  ;;  %v6394_v9 = vld [vmem:[#allocation16_spill] sm:$0xff]  ;;  %v6404_v7 = vld [vmem:[#allocation19_spill] sm:$0xff]  ;;  %vm6412_vm5 = vmmov %vm6410_vm0 }
 0x132   : > { %2052 = vmatmul.mubr.bf16.gmra.mrb[52].mxu1 %v5403_v44 }
 0x133   : > { %2059 = vmatprep.mubr.bf16.mxu1 %v5408_v63 }
 0x138   : > { %1405 = vmatmul.mubr.bf16.gmra.mrb[40].mxu0 %v5213_v26 }
 0x139   : > { %1412 = vmatprep.mubr.bf16.mxu0 %v5222_v17 }
 0x13a   : > { %2060 = vmatmul.mubr.bf16.gmra.mrb[56].mxu1 %v5419_v14  ;;  %v1763_v14 = vsel %vm6377_vm3, %v5426_v27, %v1762_v10  ;;  %v2144_v10 = vsel %vm1044_vm8, %v4221_v19, %v2085_v13  ;;  %v6395_v13 = vld [vmem:[#allocation14_spill] sm:$0xff]  ;;  %vm6411_vm3 = vmmov %vm6410_vm0 }
 0x13b   : > { %2067 = vmatprep.mubr.bf16.mxu1 %v1770_v37  ;;  %v2626_v37 = vrot.slane %v2546_v23, 1  ;;  %v6396_v23 = vld [vmem:[#allocation15_spill] sm:$0xff] }
 0x140   : > { %1413 = vmatmul.mubr.bf16.gmra.mrb[44].mxu0 %v5256_v48 }
 0x141   : > { %1420 = vmatprep.mubr.bf16.mxu0 %v5265_v4 }
 0x142   : > { %2068 = vmatmul.mubr.bf16.gmra.mrb[60].mxu1 %v1763_v14  ;;  %v2136_v14 = vpop.permute.xlu0 %2135 }
 0x143   : > { %2075 = vmatprep.mubr.bf16.mxu1 %v5282_v54  ;;  %v6379_v54 = vrot.slane %v4861_v30, 1  ;;  %v2153_v18 = vsel %vm1044_vm8, %v5250_v20, %v2136_v14  ;;  %v1162_v30 = vsel %vm1044_vm8, %v4976_v51, %v5295_v15  ;;  %v2198_v20 = vshll.u32 %v2144_v10, 16  ;;  %v6400_v14 = vld [vmem:[#allocation17_spill] sm:$0xff] }
 0x145   : > { %v2628_v6 = vsel %vm6362_vm9, %v2626_v37, %v6379_v54  ;;  %vm6413_vm9 = vmmov %vm6410_vm0 }
 0x148   : > { %1421 = vmatmul.mubr.bf16.gmra.mrb[48].mxu0 %v5309_v25 }
 0x149   : > { %1428 = vmatprep.mubr.bf16.mxu0 %v5318_v0 }
 0x14a   : > { %2076 = vmatmul.mubr.bf16.gmra.mrb[64].mxu1 %v1777_v50  ;;  %v2666_v50 = vrot.slane %v5222_v17, 1 }
 0x14b   : > { %2858 = vmatprep.mubr.bf16.mxu1 %v5300_v39  ;;  %v2205_v39 = vshll.u32 %v2153_v18, 16 }
 0x14c   : > { %v2667_v54 = vsel %vm6399_vm1, %v6398_v61, %v2666_v50  ;;  %vm6419_vm1 = vmmov %vm6410_vm0 }
 0x14d   : > { %v2207_v58 = vrot.slane %v2205_v39, 1 }
 0x150   : > { %1429 = vmatmul.mubr.bf16.gmra.mrb[52].mxu0 %v5355_v1 }
 0x151   : > { %1436 = vmatprep.mubr.bf16.mxu0 %v5364_v41 }
 0x152   : > { %2859 = vmatmul.mubr.bf16.vlgmr.msra.gmra.mrb[68].mxu1 %v2628_v6  ;;  %v2664_v6 = vrot.slane %v5256_v48, 1  ;;  %v6405_v48 = vld [vmem:[#allocation20_spill] sm:$0xff] }
 0x153   : > { %2866 = vmatprep.mubr.bf16.mxu1 %v4878_v29  ;;  %v2203_v29 = vshrl.u32 %v2153_v18, 16  ;;  %v6401_v18 = vld [vmem:[#allocation18_spill] sm:$0xff] }
 0x155   : > { %v2208_v12 = vor.u32 %v2207_v58, %v2203_v29  ;;  %v2674_v29 = vrot.slane %v5318_v0, 1 }
 0x157   : > { %v2209_v51 = vsel %vm6380_vm10, %v2208_v12, %v4853_v60  ;;  %v6383_v60 = vld [vmem:[#allocation7_spill] sm:$0xff] }
 0x158   : > { %1437 = vmatmul.mubr.bf16.gmra.mrb[56].mxu0 %v5381_v56 }
 0x159   : > { %1444 = vmatprep.mubr.bf16.mxu0 %v5271_v45 }
 0x15a   : > { %2867 = vmatmul.mubr.bf16.gmra.mrb[72].mxu1 %v4914_v22  ;;  %v2196_v22 = vshrl.u32 %v2144_v10, 16 }
 0x15b   : > { %2874 = vmatprep.mubr.bf16.mxu1 %v4933_v62  ;;  %v2200_v62 = vrot.slane %v2198_v20, 1 }
 0x15d   : > { %v2201_v15 = vor.u32 %v2200_v62, %v2196_v22  ;;  %v6408_v62 = vld [vmem:[#allocation21_spill] sm:$0xff] }
 0x15f   : > { %v2202_v19 = vsel %vm6381_vm15, %v2201_v15, %v4896_v53  ;;  %v2652_v53 = vrot.slane %v5134_v32, 1  ;;  %v2660_v32 = vrot.slane %v5213_v26, 1  ;;  %v2670_v26 = vrot.slane %v5265_v4, 1  ;;  %v6409_v15 = vld [vmem:[#allocation22_spill] sm:$0xff]  ;;  %vm6414_vm15 = vmmov %vm6410_vm0 }
 0x160   : > { %1445 = vmatmul.mubr.bf16.gmra.mrb[60].mxu0 %v5397_v5 }
 0x161   : > { %1452 = vmatprep.mubr.bf16.mxu0 %v1162_v30  ;;  %v2657_v33 = vsel %vm6393_vm7, %v2652_v53, %v2656_v59  ;;  %v2661_v37 = vsel %vm6397_vm13, %v2656_v59, %v2660_v32  ;;  %v2665_v17 = vsel %vm6402_vm14, %v2660_v32, %v2664_v6  ;;  %v2671_v39 = vsel %vm6403_vm2, %v2666_v50, %v2670_v26  ;;  %v2087_v32 = vpop.permute.xlu0 %2086  ;;  %vm6417_vm7 = vmmov %vm6410_vm0 }
 0x162   : > { %2875 = vmatmul.mubr.bf16.gmra.mrb[76].mxu1 %v4936_v46  ;;  %v2648_v46 = vrot.slane %v5090_v35, 1  ;;  %v6390_v35 = vld [vmem:[#allocation13_spill] sm:$0xff]  ;;  %v2668_v30 = vrot.slane %v5309_v25, 1  ;;  %v2675_v22 = vsel %vm6407_vm6, %v2670_v26, %v2674_v29  ;;  %v2672_v25 = vrot.slane %v5355_v1, 1  ;;  %vm6418_vm13 = vmmov %vm6410_vm0 }
 0x163   : > { %2882 = vmatprep.mubr.bf16.mxu1 %v4956_v42  ;;  %v6382_v42 = vld [vmem:[#allocation6_spill] sm:$0xff]  ;;  %v2676_v1 = vrot.slane %v5381_v56, 1  ;;  %vm6420_vm14 = vmmov %vm6380_vm10 }
 0x164   : > { %v2669_v12 = vsel %vm6406_vm12, %v2664_v6, %v2668_v30  ;;  %vm6421_vm2 = vmmov %vm6410_vm0 }
 0x165   : > { %v2677_v56 = vsel %vm6412_vm5, %v2672_v25, %v2676_v1  ;;  %vm6425_vm12 = vmmov %vm6380_vm10 }
 0x166   : > { %vm6426_vm6 = vmmov %vm6380_vm10 }
 0x168   : > { %1453 = vmatmul.mubr.bf16.gmra.mrb[64].mxu0 %v1094_v57  ;;  %v6386_v57 = vld [vmem:[#allocation10_spill] sm:$0xff] }
 0x169   : > { %2382 = vmatprep.mubr.bf16.mxu0 %v2209_v51  ;;  %v2678_v51 = vrot.slane %v5364_v41, 1 }
 0x16a   : > { %2883 = vmatmul.mubr.bf16.gmra.mrb[80].mxu1 %v4965_v28  ;;  %v6384_v28 = vrot.slane %v4969_v24, 1  ;;  %v6392_v24 = vld [vmem:[#allocation12_spill] sm:$0xff] }
 0x16b   : > { %2890 = vmatprep.mubr.bf16.mxu1 %v4994_v55 }
 0x16c   : > { %v2649_v55 = vsel %vm6385_vm11, %v6384_v28, %v2648_v46  ;;  %v2679_v28 = vsel %vm6411_vm3, %v2674_v29, %v2678_v51  ;;  %vm6415_vm11 = vmmov %vm6410_vm0 }
 0x170   : > { %2383 = vmatmul.mubr.bf16.vlgmr.msra.gmra.mrb[68].mxu0 %v2202_v19 }
 0x171   : > { %2390 = vmatprep.mubr.bf16.mxu0 %v4930_v49  ;;  %v6387_v49 = vld [vmem:[#allocation8_spill] sm:$0xff] }
 0x172   : > { %2891 = vmatmul.mubr.bf16.gmra.mrb[84].mxu1 %v4999_v3  ;;  %v6388_v3 = vld [vmem:[#allocation9_spill] sm:$0xff] }
 0x173   : > { %2898 = vmatprep.mubr.bf16.mxu1 %v5017_v21  ;;  %v2653_v21 = vsel %vm6389_vm4, %v2648_v46, %v2652_v53  ;;  %vm6416_vm4 = vmmov %vm6410_vm0 }
 0x178   : > { %2391 = vmatmul.mubr.bf16.gmra.mrb[72].mxu0 %v6382_v42 }
 0x179   : > { %2398 = vmatprep.mubr.bf16.mxu0 %v6383_v60  ;;  %v2673_v60 = vsel %vm6410_vm0, %v2668_v30, %v2672_v25  ;;  %v5565_v25 = vld [vmem:[#allocation2 + $0xa0] ss:$0 sps:$4 sm:$0x11]   ;;  %vm6427_vm0 = vmmov %vm6426_vm6 }
 0x17a   : > { %2899 = vmatmul.mubr.bf16.gmra.mrb[88].mxu1 %v2649_v55  ;;  %v2682_v55 = vrot.slane %v5271_v45, 1  ;;  %vm6428_vm3 = vmmov %vm6427_vm0 }
 0x17b   : > { %2906 = vmatprep.mubr.bf16.mxu1 %v6386_v57  ;;  %vm6429_vm5 = vmmov %vm6427_vm0 }
 0x180   : > { %2399 = vmatmul.mubr.bf16.gmra.mrb[76].mxu0 %v6387_v49 }
 0x181   : > { %2406 = vmatprep.mubr.bf16.mxu0 %v6388_v3  ;;  %v3936_v3 = vld [vmem:[#allocation2 + $0x98] sm:$0xff]  }
 0x182   : > { %2907 = vmatmul.mubr.bf16.gmra.mrb[92].mxu1 %v2653_v21  ;;  %v2116_v21 = vshrl.u32 %v3936_v3, 16 }
 0x183   : > { %2914 = vmatprep.mubr.bf16.mxu1 %v6390_v35  ;;  %v3937_v35 = vld [vmem:[#allocation2 + $0xa0] ss:$0 sps:$4 sm:$0x33]  }
 0x184   : > { %v2532_v59 = vshll.u32 %v3937_v35, 16  ;;  %v5524_v45 = vor.u32 %v2116_v21, %v5275_v38  ;;  %v2536_v26 = vshrl.u32 %v3937_v35, 16 }
 0x188   : > { %2407 = vmatmul.mubr.bf16.gmra.mrb[80].mxu0 %v6391_v31  ;;  %v2680_v31 = vrot.slane %v5397_v5, 1 }
 0x189   : > { %2414 = vmatprep.mubr.bf16.mxu0 %v6392_v24 }
 0x18a   : > { %2915 = vmatmul.mubr.bf16.gmra.mrb[96].mxu1 %v2657_v33  ;;  %v2686_v33 = vrot.slane %v5325_v36, 1 }
 0x18b   : > { %2922 = vmatprep.mubr.bf16.mxu1 %v6394_v9 }
 0x190   : > { %2415 = vmatmul.mubr.bf16.gmra.mrb[84].mxu0 %v6395_v13 }
 0x191   : > { %2422 = vmatprep.mubr.bf16.mxu0 %v6396_v23 }
 0x192   : > { %2923 = vmatmul.mubr.bf16.gmra.mrb[100].mxu1 %v2661_v37  ;;  %v5539_v37 = vsel %vm1044_vm8, %v5412_v43, %v2087_v32 }
 0x193   : > { %2930 = vmatprep.mubr.bf16.mxu1 %v2667_v54  ;;  %v2687_v54 = vsel %vm6415_vm11, %v2682_v55, %v2686_v33 }
 0x198   : > { %2423 = vmatmul.mubr.bf16.gmra.mrb[88].mxu0 %v6400_v14 }
 0x199   : > { %2430 = vmatprep.mubr.bf16.mxu0 %v6401_v18  ;;  %v1949_v10 = vpop.f32.mrb[0].mxu1  ;;  %v2684_v18 = vrot.slane %v5539_v37, 1 }
 0x19a   : > { %2931 = vmatmul.mubr.bf16.gmra.mrb[104].mxu1 %v2665_v17  ;;  %3029 = vrot.lane.b32.xlu1 %v1949_v10, %s4005_s25  ;;  %v1951_v4 = vpop.f32.mrb[1].mxu1 }
 0x19b   : > { %2938 = vmatprep.mubr.bf16.mxu1 %v2671_v39  ;;  %v1952_v58 = vpop.f32.mrb[2].mxu1 }
 0x19c   : > { %v1954_v20 = vpop.f32.mrb[3].mxu1  ;;  %3031 = vrot.lane.b32.xlu0 %v1952_v58, %s4005_s25  ;;  %v2685_v58 = vsel %vm6416_vm4, %v2680_v31, %v2684_v18 }
 0x1a0   : > { %2431 = vmatmul.mubr.bf16.gmra.mrb[92].mxu0 %v6404_v7  ;;  %v2528_v7 = vpop.permute.xlu0 %2527 }
 0x1a1   : > { %2438 = vmatprep.mubr.bf16.mxu0 %v6405_v48  ;;  %v1957_v0 = vpop.f32.mrb[4].mxu1 }
 0x1a2   : > { %2939 = vmatmul.mubr.bf16.gmra.mrb[108].mxu1 %v2669_v12  ;;  %3033 = vrot.lane.b32.xlu1 %v1957_v0, %s4005_s25  ;;  %v1959_v19 = vpop.f32.mrb[5].mxu1  ;;  %v5560_v12 = vld [vmem:[#allocation2 + $0x90] sm:$0xff]  }
 0x1a3   : > { %2946 = vmatprep.mubr.bf16.mxu1 %v2675_v22  ;;  %v1960_v46 = vpop.f32.mrb[6].mxu1 }
 0x1a4   : > { %v1962_v42 = vpop.f32.mrb[7].mxu1  ;;  %3035 = vrot.lane.b32.xlu0 %v1960_v46, %s4005_s25 }
 0x1a5   : > { %v2120_v42 = vshll.u32 %v5565_v25, 16 }
 0x1a7   : > { %v2122_v3 = vrot.slane %v2120_v42, 1 }
 0x1a8   : > { %2439 = vmatmul.mubr.bf16.gmra.mrb[96].mxu0 %v6408_v62 }
 0x1a9   : > { %2446 = vmatprep.mubr.bf16.mxu0 %v6409_v15  ;;  %v1965_v41 = vpop.f32.mrb[8].mxu1 }
 0x1aa   : > { %2947 = vmatmul.mubr.bf16.gmra.mrb[112].mxu1 %v2673_v60  ;;  %3037 = vrot.lane.b32.xlu1 %v1965_v41, %s4005_s25  ;;  %v1967_v57 = vpop.f32.mrb[9].mxu1  ;;  %v2530_v60 = vpop.permute.xlu0 %2529 }
 0x1ab   : > { %2954 = vmatprep.mubr.bf16.mxu1 %v2679_v28  ;;  %v1968_v53 = vpop.f32.mrb[10].mxu1 }
 0x1ac   : > { %v1970_v49 = vpop.f32.mrb[11].mxu1  ;;  %3039 = vrot.lane.b32.xlu0 %v1968_v53, %s4005_s25  ;;  %v3939_v53 = vld [vmem:[#allocation2 + $0x98] ss:$0 sps:$4 sm:$0x11]  }
 0x1b0   : > { %2447 = vmatmul.mubr.bf16.gmra.mrb[100].mxu0 %v5279_v40  ;;  %v2683_v40 = vsel %vm6413_vm9, %v2678_v51, %v2682_v55 }
 0x1b1   : > { %2454 = vmatprep.mubr.bf16.mxu0 %v5288_v11  ;;  %v2534_v11 = vrot.slane %v2532_v59, 1  ;;  %v1973_v24 = vpop.f32.mrb[12].mxu1 }
 0x1b2   : > { %2955 = vmatmul.mubr.bf16.gmra.mrb[116].mxu1 %v2677_v56  ;;  %3041 = vrot.lane.b32.xlu1 %v1973_v24, %s4005_s25  ;;  %v1975_v9 = vpop.f32.mrb[13].mxu1 }
 0x1b3   : > { %2962 = vmatprep.mubr.bf16.mxu1 %v2683_v40  ;;  %v1976_v13 = vpop.f32.mrb[14].mxu1  ;;  %v2535_v38 = vsel %vm6380_vm10, %v5524_v45, %v2534_v11  ;;  %v2538_v30 = vor.u32 %v2536_v26, %v2534_v11  ;;  %v2123_v40 = vsel %vm6420_vm14, %v5524_v45, %v2122_v3  ;;  %v2225_v45 = vshrl.u32 %v5325_v36, 16  ;;  %v6424_v36 = vld [vmem:[#allocation23_spill] sm:$0xff] }
 0x1b4   : > { %v1978_v23 = vpop.f32.mrb[15].mxu1  ;;  %3043 = vrot.lane.b32.xlu0 %v1976_v13, %s4005_s25  ;;  %v2210_v13 = vshll.u32 %v5539_v37, 16 }
 0x1b5   : > { %v6422_v23 = vld [vmem:[#allocation25_spill] sm:$0xff] }
 0x1b6   : > { %v2212_v26 = vrot.slane %v2210_v13, 1 }
 0x1b8   : > { %2455 = vmatmul.mubr.bf16.gmra.mrb[104].mxu0 %v5329_v34  ;;  %v2681_v34 = vsel %vm6414_vm15, %v2676_v1, %v2680_v31 }
 0x1b9   : > { %2462 = vmatprep.mubr.bf16.mxu0 %v5339_v8  ;;  %v5541_v8 = vpop.permute.xlu1 %2139  ;;  %v1981_v17 = vpop.f32.mrb[16].mxu1 }
 0x1ba   : > { %2963 = vmatmul.mubr.bf16.gmra.mrb[120].mxu1 %v2681_v34  ;;  %v2554_v6 = vsel %vm1044_vm8, %v2535_v38, %v5541_v8  ;;  %3045 = vrot.lane.b32.xlu1 %v1981_v17, %s4005_s25  ;;  %v1983_v39 = vpop.f32.mrb[17].mxu1  ;;  %v2124_v34 = vshrl.u32 %v5565_v25, 16 }
 0x1bb   : > { %v5531_v50 = vpop.f32.mrb[0].mxu0  ;;  %2970 = vmatprep.mubr.bf16.mxu1 %v2687_v54  ;;  %v2690_v43 = vrot.slane %v2554_v6, 1  ;;  %v1984_v10 = vpop.f32.mrb[18].mxu1  ;;  %v6423_v6 = vld [vmem:[#allocation24_spill] sm:$0xff] }
 0x1bc   : > { %v1328_v5 = vpop.f32.mrb[1].mxu0  ;;  %v1986_v48 = vpop.f32.mrb[19].mxu1  ;;  %3047 = vrot.lane.b32.xlu0 %v1984_v10, %s4005_s25 }
 0x1bd   : > { %v5543_v61 = vpop.f32.mrb[2].mxu0  ;;  %v5556_v20 = vpop.permute.xlu1 %2141  ;;  %v2691_v22 = vsel %vm6417_vm7, %v2686_v33, %v2690_v43 }
 0x1be   : > { %v1331_v14 = vpop.f32.mrb[3].mxu0  ;;  %v2556_v62 = vsel %vm1044_vm8, %v2538_v30, %v5556_v20  ;;  %v2162_v10 = vsel %vm1044_vm8, %v2124_v34, %v5556_v20  ;;  %v2091_v20 = vpop.permute.xlu0 %2090 }
 0x1bf   : > { %v2694_v19 = vrot.slane %v2556_v62, 1  ;;  %v2242_v62 = vshll.u32 %v2162_v10, 16 }
 0x1c0   : > { %2463 = vmatmul.mubr.bf16.gmra.mrb[108].mxu0 %v5370_v16 }
 0x1c1   : > { %2470 = vmatprep.mubr.bf16.mxu0 %v5376_v47  ;;  %v2548_v47 = vsel %vm1044_vm8, %v5560_v12, %v2528_v7  ;;  %v2695_v49 = vsel %vm6419_vm1, %v2690_v43, %v2694_v19  ;;  %v2089_v54 = vpop.permute.xlu1 %2088  ;;  %v2227_v43 = vor.u32 %v2225_v45, %v6424_v36  ;;  %v2150_v19 = vsel %vm1044_vm8, %v3939_v53, %v2091_v20 }
 0x1c2   : > { %2971 = vmatmul.mubr.bf16.gmra.mrb[124].mxu1 %v2685_v58  ;;  %v2688_v51 = vrot.slane %v2548_v47, 1  ;;  %v1989_v15 = vpop.f32.mrb[20].mxu1  ;;  %v2148_v30 = vsel %vm1044_vm8, %v5560_v12, %v2089_v54  ;;  %v2218_v58 = vshrl.u32 %v5539_v37, 16 }
 0x1c3   : > { %v5552_v29 = vpop.f32.mrb[4].mxu0  ;;  %2978 = vmatprep.mubr.bf16.mxu1 %v2691_v22  ;;  %3049 = vrot.lane.b32.xlu1 %v1989_v15, %s4005_s25  ;;  %v1991_v46 = vpop.f32.mrb[21].mxu1  ;;  %v2221_v47 = vshll.u32 %v2148_v30, 16  ;;  %v2213_v22 = vsel %vm6425_vm12, %v5426_v27, %v2212_v26 }
 0x1c4   : > { %v1336_v4 = vpop.f32.mrb[5].mxu0  ;;  %v1992_v28 = vpop.f32.mrb[22].mxu1  ;;  %v2220_v46 = vor.u32 %v2218_v58, %v2212_v26 }
 0x1c5   : > { %v5558_v16 = vpop.f32.mrb[6].mxu0  ;;  %v1994_v41 = vpop.f32.mrb[23].mxu1  ;;  %3051 = vrot.lane.b32.xlu0 %v1992_v28, %s4005_s25  ;;  %v2223_v37 = vrot.slane %v2221_v47, 1  ;;  %v2244_v28 = vrot.slane %v2242_v62, 1  ;;  %v3337_v62 = vlaneseq }
 0x1c6   : > { %v1339_v0 = vpop.f32.mrb[7].mxu0 }
 0x1c7   : > { %v2224_v3 = vsel %vm6427_vm0, %v2220_v46, %v2223_v37  ;;  %v5649_v20 = vshrl.u32 %v3337_v62, 7 }
 0x1c8   : > { %2471 = vmatmul.mubr.bf16.gmra.mrb[112].mxu0 %v5387_v52  ;;  %v2689_v52 = vsel %vm6418_vm13, %v2684_v18, %v2688_v51 }
 0x1c9   : > { %2478 = vmatprep.mubr.bf16.mxu0 %v5392_v2  ;;  %v2550_v2 = vsel %vm1044_vm8, %v3939_v53, %v2530_v60 }
 0x1ca   : > { %2979 = vmatmul.mubr.bf16.gmra.mrb[128].mxu1 %v2689_v52  ;;  %v2692_v35 = vrot.slane %v2550_v2, 1  ;;  %v2235_v2 = vshll.u32 %v2150_v19, 16 }
 0x1cb   : > { %v5573_v1 = vpop.f32.mrb[8].mxu0  ;;  %2986 = vmatprep.mubr.bf16.mxu1 %v2695_v49  ;;  %v1997_v59 = vpop.f32.mrb[24].mxu1 }
 0x1cc   : > { %v1344_v55 = vpop.f32.mrb[9].mxu0  ;;  %3053 = vrot.lane.b32.xlu1 %v1997_v59, %s4005_s25  ;;  %v1999_v56 = vpop.f32.mrb[25].mxu1  ;;  %v2693_v9 = vsel %vm6421_vm2, %v2688_v51, %v2692_v35 }
 0x1cd   : > { %v5577_v57 = vpop.f32.mrb[10].mxu0  ;;  %v2000_v11 = vpop.f32.mrb[26].mxu1  ;;  %v2232_v55 = vshrl.u32 %v2148_v30, 16  ;;  %v2237_v56 = vrot.slane %v2235_v2, 1 }
 0x1ce   : > { %v1347_v21 = vpop.f32.mrb[11].mxu0  ;;  %v2002_v24 = vpop.f32.mrb[27].mxu1  ;;  %3055 = vrot.lane.b32.xlu0 %v2000_v11, %s4005_s25 }
 0x1cf   : > { %v2234_v35 = vor.u32 %v2232_v55, %v2223_v37 }
 0x1d0   : > { %2479 = vmatmul.mubr.bf16.gmra.mrb[116].mxu0 %v5403_v44  ;;  %v2159_v44 = vsel %vm1044_vm8, %v2123_v40, %v5541_v8 }
 0x1d1   : > { %2486 = vmatprep.mubr.bf16.mxu0 %v5408_v63  ;;  %v2228_v38 = vshll.u32 %v2159_v44, 16  ;;  %v2239_v25 = vshrl.u32 %v2159_v44, 16  ;;  %v2238_v44 = vsel %vm6429_vm5, %v2234_v35, %v2237_v56 }
 0x1d2   : > { %2987 = vmatmul.mubr.bf16.gmra.mrb[132].mxu1 %v2693_v9 }
 0x1d3   : > { %v5586_v31 = vpop.f32.mrb[12].mxu0  ;;  %v2230_v39 = vrot.slane %v2228_v38, 1 }
 0x1d4   : > { %v1352_v33 = vpop.f32.mrb[13].mxu0 }
 0x1d5   : > { %v5592_v32 = vpop.f32.mrb[14].mxu0  ;;  %v2005_v5 = vpop.f32.mrb[28].mxu1  ;;  %v2231_v0 = vsel %vm6426_vm6, %v2227_v43, %v2230_v39  ;;  %v2241_v60 = vor.u32 %v2239_v25, %v2230_v39 }
 0x1d6   : > { %v1355_v63 = vpop.f32.mrb[15].mxu0  ;;  %3057 = vrot.lane.b32.xlu1 %v2005_v5, %s4005_s25  ;;  %v2007_v8 = vpop.f32.mrb[29].mxu1 }
 0x1d7   : > { %v2008_v14 = vpop.f32.mrb[30].mxu1  ;;  %v2245_v53 = vsel %vm6428_vm3, %v2241_v60, %v2244_v28  ;;  %v3339_v60 = vsub.s32 0, %v5649_v20 }
 0x1d8   : > { %2487 = vmatmul.mubr.bf16.gmra.mrb[120].mxu0 %v6422_v23  ;;  %v2010_v17 = vpop.f32.mrb[31].mxu1  ;;  %3059 = vrot.lane.b32.xlu0 %v2008_v14, %s4005_s25 }
 0x1d9   : > { %2494 = vmatprep.mubr.bf16.mxu0 %v6423_v6 }
 0x1db   : > { %v5600_v18 = vpop.f32.mrb[16].mxu0 }
 0x1dc   : > { %v1360_v7 = vpop.f32.mrb[17].mxu0 }
 0x1dd   : > { %v5608_v48 = vpop.f32.mrb[18].mxu0  ;;  %v2013_v51 = vpop.f32.mrb[32].mxu1 }
 0x1de   : > { %v1363_v4 = vpop.f32.mrb[19].mxu0  ;;  %3061 = vrot.lane.b32.xlu1 %v2013_v51, %s4005_s25  ;;  %v2015_v12 = vpop.f32.mrb[33].mxu1 }
 0x1df   : > { %v2016_v15 = vpop.f32.mrb[34].mxu1 }
 0x1e0   : > { %2495 = vmatmul.mubr.bf16.gmra.mrb[124].mxu0 %v2213_v22  ;;  %3063 = vrot.lane.b32.xlu0 %v2016_v15, %s4005_s25  ;;  %v2018_v27 = vpop.f32.mrb[35].mxu1 }
 0x1e1   : > { %2502 = vmatprep.mubr.bf16.mxu0 %v2231_v0 }
 0x1e3   : > { %v5616_v42 = vpop.f32.mrb[20].mxu0 }
 0x1e4   : > { %v1368_v41 = vpop.f32.mrb[21].mxu0 }
 0x1e5   : > { %v5619_v52 = vpop.f32.mrb[22].mxu0  ;;  %v2021_v21 = vpop.f32.mrb[36].mxu1  ;;  %v5661_v41 = vld [vmem:[%s6132_s2] sm:$0x3] }
 0x1e6   : > { %v1371_v49 = vpop.f32.mrb[23].mxu0  ;;  %3065 = vrot.lane.b32.xlu1 %v2021_v21, %s4005_s25  ;;  %v2023_v59 = vpop.f32.mrb[37].mxu1 }
 0x1e7   : > { %v2024_v40 = vpop.f32.mrb[38].mxu1  ;;  %v5667_v49 = vrot.slane %v5661_v41, %v3339_v60 }
 0x1e8   : > { %2503 = vmatmul.mubr.bf16.gmra.mrb[128].mxu0 %v2224_v3  ;;  %3067 = vrot.lane.b32.xlu0 %v2024_v40, %s4005_s25  ;;  %v2026_v24 = vpop.f32.mrb[39].mxu1 }
 0x1e9   : > { %2510 = vmatprep.mubr.bf16.mxu0 %v2245_v53 }
 0x1eb   : > { %v5624_v11 = vpop.f32.mrb[24].mxu0 }
 0x1ec   : > { %v1376_v33 = vpop.f32.mrb[25].mxu0 }
 0x1ed   : > { %v5627_v9 = vpop.f32.mrb[26].mxu0  ;;  %v2029_v13 = vpop.f32.mrb[40].mxu1 }
 0x1ee   : > { %v1379_v63 = vpop.f32.mrb[27].mxu0  ;;  %3069 = vrot.lane.b32.xlu1 %v2029_v13, %s4005_s25  ;;  %v2031_v45 = vpop.f32.mrb[41].mxu1 }
 0x1ef   : > { %v2032_v38 = vpop.f32.mrb[42].mxu1 }
 0x1f0   : > { %2511 = vmatmul.mubr.bf16.gmra.mrb[132].mxu0 %v2238_v44  ;;  %3071 = vrot.lane.b32.xlu0 %v2032_v38, %s4005_s25  ;;  %v2034_v5 = vpop.f32.mrb[43].mxu1 }
 0x1f3   : > { %v5631_v23 = vpop.f32.mrb[28].mxu0 }
 0x1f4   : > { %v1384_v34 = vpop.f32.mrb[29].mxu0 }
 0x1f5   : > { %v5634_v54 = vpop.f32.mrb[30].mxu0  ;;  %v2037_v8 = vpop.f32.mrb[44].mxu1 }
 0x1f6   : > { %v1387_v6 = vpop.f32.mrb[31].mxu0  ;;  %3073 = vrot.lane.b32.xlu1 %v2037_v8, %s4005_s25  ;;  %v2039_v14 = vpop.f32.mrb[45].mxu1 }
 0x1f7   : > { %v2040_v26 = vpop.f32.mrb[46].mxu1 }
 0x1f8   : > { %3075 = vrot.lane.b32.xlu0 %v2040_v26, %s4005_s25  ;;  %v2042_v36 = vpop.f32.mrb[47].mxu1 }
 0x1fb   : > { %v5637_v17 = vpop.f32.mrb[32].mxu0 }
 0x1fc   : > { %v1392_v43 = vpop.f32.mrb[33].mxu0 }
 0x1fd   : > { %v5640_v39 = vpop.f32.mrb[34].mxu0  ;;  %v2045_v7 = vpop.f32.mrb[48].mxu1 }
 0x1fe   : > { %v1395_v30 = vpop.f32.mrb[35].mxu0  ;;  %3077 = vrot.lane.b32.xlu1 %v2045_v7, %s4005_s25  ;;  %v2047_v10 = vpop.f32.mrb[49].mxu1 }
 0x1ff   : > { %v2048_v4 = vpop.f32.mrb[50].mxu1 }
 0x200   : > { %3079 = vrot.lane.b32.xlu0 %v2048_v4, %s4005_s25  ;;  %v2050_v47 = vpop.f32.mrb[51].mxu1 }
 0x203   : > { %v5643_v58 = vpop.f32.mrb[36].mxu0 }
 0x204   : > { %v1400_v22 = vpop.f32.mrb[37].mxu0 }
 0x205   : > { %v5646_v25 = vpop.f32.mrb[38].mxu0  ;;  %v2053_v51 = vpop.f32.mrb[52].mxu1 }
 0x206   : > { %v1403_v0 = vpop.f32.mrb[39].mxu0  ;;  %3081 = vrot.lane.b32.xlu1 %v2053_v51, %s4005_s25  ;;  %v2055_v12 = vpop.f32.mrb[53].mxu1 }
 0x207   : > { %v2056_v15 = vpop.f32.mrb[54].mxu1 }
 0x208   : > { %3083 = vrot.lane.b32.xlu0 %v2056_v15, %s4005_s25  ;;  %v2058_v46 = vpop.f32.mrb[55].mxu1 }
 0x20b   : > { %v5651_v19 = vpop.f32.mrb[40].mxu0 }
 0x20c   : > { %v1408_v37 = vpop.f32.mrb[41].mxu0  ;;  %v3030_v21 = vpop.permute.xlu1 %3029 }
 0x20d   : > { %v5654_v27 = vpop.f32.mrb[42].mxu0  ;;  %v2061_v55 = vpop.f32.mrb[56].mxu1  ;;  %v3267_v59 = vsel %vm1044_vm8, %v5531_v50, %v3030_v21 }
 0x20e   : > { %v1411_v28 = vpop.f32.mrb[43].mxu0  ;;  %3085 = vrot.lane.b32.xlu1 %v2061_v55, %s4005_s25  ;;  %v2063_v2 = vpop.f32.mrb[57].mxu1  ;;  %v3347_v24 = vadd.f32 %v5667_v49, %v3267_v59 }
 0x20f   : > { %v2064_v3 = vpop.f32.mrb[58].mxu1  ;;  %v3032_v33 = vpop.permute.xlu0 %3031 }
 0x210   : > { %3087 = vrot.lane.b32.xlu0 %v2064_v3, %s4005_s25  ;;  %v2066_v56 = vpop.f32.mrb[59].mxu1  ;;  %v3268_v63 = vsel %vm1044_vm8, %v5543_v61, %v3032_v33  ;;  %3415 = vst [vmem:[%s5679_s26] sm:$0xff] %v3347_v24 }
 0x211   : > { %v3349_v13 = vadd.f32 %v5667_v49, %v3268_v63 }
 0x213   : > { %v5669_v53 = vpop.f32.mrb[44].mxu0  ;;  %3417 = vst [vmem:[%s5679_s26 + $0x10] sm:$0xff] %v3349_v13 }
 0x214   : > { %v1416_v35 = vpop.f32.mrb[45].mxu0  ;;  %v3034_v34 = vpop.permute.xlu1 %3033 }
 0x215   : > { %v5674_v40 = vpop.f32.mrb[46].mxu0  ;;  %v2069_v45 = vpop.f32.mrb[60].mxu1  ;;  %v3269_v6 = vsel %vm1044_vm8, %v5552_v29, %v3034_v34 }
 0x216   : > { %v1419_v44 = vpop.f32.mrb[47].mxu0  ;;  %3089 = vrot.lane.b32.xlu1 %v2069_v45, %s4005_s25  ;;  %v2071_v50 = vpop.f32.mrb[61].mxu1  ;;  %v3351_v26 = vadd.f32 %v5667_v49, %v3269_v6 }
 0x217   : > { %v2072_v38 = vpop.f32.mrb[62].mxu1  ;;  %v3036_v36 = vpop.permute.xlu0 %3035 }
 0x218   : > { %3091 = vrot.lane.b32.xlu0 %v2072_v38, %s4005_s25  ;;  %v2074_v8 = vpop.f32.mrb[63].mxu1  ;;  %v3270_v30 = vsel %vm1044_vm8, %v5558_v16, %v3036_v36  ;;  %3419 = vst [vmem:[%s5679_s26 + $0x20] sm:$0xff] %v3351_v26 }
 0x219   : > { %v3353_v7 = vadd.f32 %v5667_v49, %v3270_v30 }
 0x21b   : > { %v5685_v5 = vpop.f32.mrb[48].mxu0  ;;  %3421 = vst [vmem:[%s5679_s26 + $0x30] sm:$0xff] %v3353_v7 }
 0x21c   : > { %v1424_v61 = vpop.f32.mrb[49].mxu0  ;;  %v3038_v22 = vpop.permute.xlu1 %3037 }
 0x21d   : > { %v5690_v14 = vpop.f32.mrb[50].mxu0  ;;  %v2077_v10 = vpop.f32.mrb[64].mxu1  ;;  %v3271_v16 = vsel %vm1044_vm8, %v5573_v1, %v3038_v22 }
 0x21e   : > { %v1427_v43 = vpop.f32.mrb[51].mxu0  ;;  %3093 = vrot.lane.b32.xlu1 %v2077_v10, %s4005_s25  ;;  %v2079_v4 = vpop.f32.mrb[65].mxu1  ;;  %v3355_v12 = vadd.f32 %v5667_v49, %v3271_v16 }
 0x21f   : > { %v2080_v29 = vpop.f32.mrb[66].mxu1  ;;  %v3040_v15 = vpop.permute.xlu0 %3039 }
 0x220   : > { %3095 = vrot.lane.b32.xlu0 %v2080_v29, %s4005_s25  ;;  %v2082_v0 = vpop.f32.mrb[67].mxu1  ;;  %v3272_v37 = vsel %vm1044_vm8, %v5577_v57, %v3040_v15  ;;  %3423 = vst [vmem:[%s5679_s26 + $0x40] sm:$0xff] %v3355_v12 }
 0x221   : > { %v3357_v60 = vadd.f32 %v5667_v49, %v3272_v37 }
 0x223   : > { %v5699_v47 = vpop.f32.mrb[52].mxu0  ;;  %3425 = vst [vmem:[%s5679_s26 + $0x50] sm:$0xff] %v3357_v60 }
 0x224   : > { %v1432_v62 = vpop.f32.mrb[53].mxu0  ;;  %v3042_v3 = vpop.permute.xlu1 %3041 }
 0x225   : > { %v5704_v51 = vpop.f32.mrb[54].mxu0  ;;  %v2860_v28 = vpop.f32.mrb[68].mxu1  ;;  %v3273_v57 = vsel %vm1044_vm8, %v5586_v31, %v3042_v3 }
 0x226   : > { %v1435_v46 = vpop.f32.mrb[55].mxu0  ;;  %3165 = vrot.lane.b32.xlu1 %v2860_v28, %s4005_s25  ;;  %v2862_v55 = vpop.f32.mrb[69].mxu1  ;;  %v3359_v56 = vadd.f32 %v5667_v49, %v3273_v57 }
 0x227   : > { %v2863_v1 = vpop.f32.mrb[70].mxu1  ;;  %v3044_v24 = vpop.permute.xlu0 %3043 }
 0x228   : > { %3167 = vrot.lane.b32.xlu0 %v2863_v1, %s4005_s25  ;;  %v2865_v35 = vpop.f32.mrb[71].mxu1  ;;  %v3274_v44 = vsel %vm1044_vm8, %v5592_v32, %v3044_v24  ;;  %3427 = vst [vmem:[%s5679_s26 + $0x60] sm:$0xff] %v3359_v56 }
 0x229   : > { %v3361_v63 = vadd.f32 %v5667_v49, %v3274_v44 }
 0x22b   : > { %v5713_v2 = vpop.f32.mrb[56].mxu0  ;;  %3429 = vst [vmem:[%s5679_s26 + $0x70] sm:$0xff] %v3361_v63 }
 0x22c   : > { %v1440_v21 = vpop.f32.mrb[57].mxu0  ;;  %v3046_v38 = vpop.permute.xlu1 %3045 }
 0x22d   : > { %v5718_v59 = vpop.f32.mrb[58].mxu0  ;;  %v2868_v13 = vpop.f32.mrb[72].mxu1  ;;  %v3275_v32 = vsel %vm1044_vm8, %v5600_v18, %v3046_v38 }
 0x22e   : > { %v1443_v33 = vpop.f32.mrb[59].mxu0  ;;  %3169 = vrot.lane.b32.xlu1 %v2868_v13, %s4005_s25  ;;  %v2870_v45 = vpop.f32.mrb[73].mxu1  ;;  %v3363_v8 = vadd.f32 %v5667_v49, %v3275_v32 }
 0x22f   : > { %v2871_v31 = vpop.f32.mrb[74].mxu1  ;;  %v3048_v26 = vpop.permute.xlu0 %3047 }
 0x230   : > { %3171 = vrot.lane.b32.xlu0 %v2871_v31, %s4005_s25  ;;  %v2873_v61 = vpop.f32.mrb[75].mxu1  ;;  %v3276_v43 = vsel %vm1044_vm8, %v5608_v48, %v3048_v26  ;;  %3431 = vst [vmem:[%s5679_s26 + $0x80] sm:$0xff] %v3363_v8 }
 0x231   : > { %v3365_v30 = vadd.f32 %v5667_v49, %v3276_v43 }
 0x233   : > { %v5727_v50 = vpop.f32.mrb[60].mxu0  ;;  %3433 = vst [vmem:[%s5679_s26 + $0x90] sm:$0xff] %v3365_v30 }
 0x234   : > { %v1448_v34 = vpop.f32.mrb[61].mxu0 }
 0x235   : > { %v5732_v6 = vpop.f32.mrb[62].mxu0  ;;  %v2876_v7 = vpop.f32.mrb[76].mxu1 }
 0x236   : > { %v1451_v36 = vpop.f32.mrb[63].mxu0  ;;  %3173 = vrot.lane.b32.xlu1 %v2876_v7, %s4005_s25  ;;  %v2878_v10 = vpop.f32.mrb[77].mxu1 }
 0x237   : > { %v2879_v18 = vpop.f32.mrb[78].mxu1  ;;  %v3050_v29 = vpop.permute.xlu1 %3049 }
 0x238   : > { %3175 = vrot.lane.b32.xlu0 %v2879_v18, %s4005_s25  ;;  %v3277_v48 = vsel %vm1044_vm8, %v5616_v42, %v3050_v29  ;;  %v2881_v62 = vpop.f32.mrb[79].mxu1  ;;  %v3052_v12 = vpop.permute.xlu0 %3051 }
 0x239   : > { %v3367_v0 = vadd.f32 %v5667_v49, %v3277_v48  ;;  %v3278_v46 = vsel %vm1044_vm8, %v5619_v52, %v3052_v12 }
 0x23a   : > { %v3369_v37 = vadd.f32 %v5667_v49, %v3278_v46 }
 0x23b   : > { %v5741_v4 = vpop.f32.mrb[64].mxu0  ;;  %3435 = vst [vmem:[%s5679_s26 + $0xa0] sm:$0xff] %v3367_v0 }
 0x23c   : > { %v1456_v22 = vpop.f32.mrb[65].mxu0  ;;  %3437 = vst [vmem:[%s5679_s26 + $0xb0] sm:$0xff] %v3369_v37 }
 0x23d   : > { %v5746_v16 = vpop.f32.mrb[66].mxu0  ;;  %v2884_v60 = vpop.f32.mrb[80].mxu1 }
 0x23e   : > { %v1459_v15 = vpop.f32.mrb[67].mxu0  ;;  %3177 = vrot.lane.b32.xlu1 %v2884_v60, %s4005_s25  ;;  %v2886_v28 = vpop.f32.mrb[81].mxu1 }
 0x23f   : > { %v2887_v42 = vpop.f32.mrb[82].mxu1  ;;  %v3054_v1 = vpop.permute.xlu1 %3053 }
 0x240   : > { %3179 = vrot.lane.b32.xlu0 %v2887_v42, %s4005_s25  ;;  %v3279_v52 = vsel %vm1044_vm8, %v5624_v11, %v3054_v1  ;;  %v2889_v21 = vpop.f32.mrb[83].mxu1  ;;  %v3056_v56 = vpop.permute.xlu0 %3055 }
 0x241   : > { %v3371_v35 = vadd.f32 %v5667_v49, %v3279_v52  ;;  %v3280_v33 = vsel %vm1044_vm8, %v5627_v9, %v3056_v56 }
 0x242   : > { %v3373_v44 = vadd.f32 %v5667_v49, %v3280_v33 }
 0x243   : > { %v5755_v55 = vpop.f32.mrb[68].mxu0  ;;  %3439 = vst [vmem:[%s5679_s26 + $0xc0] sm:$0xff] %v3371_v35 }
 0x244   : > { %v2386_v3 = vpop.f32.mrb[69].mxu0  ;;  %3441 = vst [vmem:[%s5679_s26 + $0xd0] sm:$0xff] %v3373_v44 }
 0x245   : > { %v5760_v57 = vpop.f32.mrb[70].mxu0  ;;  %v2892_v63 = vpop.f32.mrb[84].mxu1 }
 0x246   : > { %v2389_v24 = vpop.f32.mrb[71].mxu0  ;;  %3181 = vrot.lane.b32.xlu1 %v2892_v63, %s4005_s25  ;;  %v2894_v13 = vpop.f32.mrb[85].mxu1 }
 0x247   : > { %v2895_v11 = vpop.f32.mrb[86].mxu1 }
 0x248   : > { %v3058_v31 = vpop.permute.xlu1 %3057  ;;  %3183 = vrot.lane.b32.xlu0 %v2895_v11, %s4005_s25  ;;  %v2897_v34 = vpop.f32.mrb[87].mxu1 }
 0x249   : > { %v3281_v9 = vsel %vm1044_vm8, %v5631_v23, %v3058_v31 }
 0x24a   : > { %v3375_v61 = vadd.f32 %v5667_v49, %v3281_v9  ;;  %v3060_v8 = vpop.permute.xlu0 %3059 }
 0x24b   : > { %v5769_v45 = vpop.f32.mrb[72].mxu0  ;;  %v3282_v36 = vsel %vm1044_vm8, %v5634_v54, %v3060_v8 }
 0x24c   : > { %v2394_v38 = vpop.f32.mrb[73].mxu0  ;;  %3443 = vst [vmem:[%s5679_s26 + $0xe0] sm:$0xff] %v3375_v61  ;;  %v3377_v43 = vadd.f32 %v5667_v49, %v3282_v36 }
 0x24d   : > { %v5774_v32 = vpop.f32.mrb[74].mxu0  ;;  %v2900_v30 = vpop.f32.mrb[88].mxu1 }
 0x24e   : > { %v2397_v26 = vpop.f32.mrb[75].mxu0  ;;  %3445 = vst [vmem:[%s5679_s26 + $0xf0] sm:$0xff] %v3377_v43  ;;  %3185 = vrot.lane.b32.xlu1 %v2900_v30, %s4005_s25  ;;  %v2902_v7 = vpop.f32.mrb[89].mxu1 }
 0x24f   : > { %v2903_v23 = vpop.f32.mrb[90].mxu1 }
 0x250   : > { %v3062_v18 = vpop.permute.xlu1 %3061  ;;  %3187 = vrot.lane.b32.xlu0 %v2903_v23, %s4005_s25  ;;  %v2905_v22 = vpop.f32.mrb[91].mxu1 }
 0x251   : > { %v3283_v54 = vsel %vm1044_vm8, %v5637_v17, %v3062_v18 }
 0x252   : > { %v3379_v62 = vadd.f32 %v5667_v49, %v3283_v54  ;;  %v3064_v0 = vpop.permute.xlu0 %3063 }
 0x253   : > { %v5783_v10 = vpop.f32.mrb[76].mxu0  ;;  %v3284_v15 = vsel %vm1044_vm8, %v5640_v39, %v3064_v0 }
 0x254   : > { %v2402_v29 = vpop.f32.mrb[77].mxu0  ;;  %3447 = vst [vmem:[%s5679_s26 + $0x100] sm:$0xff] %v3379_v62  ;;  %v3381_v46 = vadd.f32 %v5667_v49, %v3284_v15 }
 0x255   : > { %v5788_v48 = vpop.f32.mrb[78].mxu0  ;;  %v2908_v37 = vpop.f32.mrb[92].mxu1 }
 0x256   : > { %v2405_v12 = vpop.f32.mrb[79].mxu0  ;;  %3449 = vst [vmem:[%s5679_s26 + $0x110] sm:$0xff] %v3381_v46  ;;  %3189 = vrot.lane.b32.xlu1 %v2908_v37, %s4005_s25  ;;  %v2910_v60 = vpop.f32.mrb[93].mxu1 }
 0x257   : > { %v2911_v17 = vpop.f32.mrb[94].mxu1 }
 0x258   : > { %v3066_v42 = vpop.permute.xlu1 %3065  ;;  %3191 = vrot.lane.b32.xlu0 %v2911_v17, %s4005_s25  ;;  %v2913_v3 = vpop.f32.mrb[95].mxu1 }
 0x259   : > { %v3285_v39 = vsel %vm1044_vm8, %v5643_v58, %v3066_v42 }
 0x25a   : > { %v3383_v21 = vadd.f32 %v5667_v49, %v3285_v39  ;;  %v3068_v35 = vpop.permute.xlu0 %3067 }
 0x25b   : > { %v5797_v28 = vpop.f32.mrb[80].mxu0  ;;  %v3286_v24 = vsel %vm1044_vm8, %v5646_v25, %v3068_v35 }
 0x25c   : > { %v2410_v1 = vpop.f32.mrb[81].mxu0  ;;  %3451 = vst [vmem:[%s5679_s26 + $0x120] sm:$0xff] %v3383_v21  ;;  %v3385_v33 = vadd.f32 %v5667_v49, %v3286_v24 }
 0x25d   : > { %v5802_v52 = vpop.f32.mrb[82].mxu0  ;;  %v2916_v44 = vpop.f32.mrb[96].mxu1 }
 0x25e   : > { %v2413_v56 = vpop.f32.mrb[83].mxu0  ;;  %3453 = vst [vmem:[%s5679_s26 + $0x130] sm:$0xff] %v3385_v33  ;;  %3193 = vrot.lane.b32.xlu1 %v2916_v44, %s4005_s25  ;;  %v2918_v63 = vpop.f32.mrb[97].mxu1 }
 0x25f   : > { %v2919_v58 = vpop.f32.mrb[98].mxu1 }
 0x260   : > { %v3070_v11 = vpop.permute.xlu1 %3069  ;;  %3195 = vrot.lane.b32.xlu0 %v2919_v58, %s4005_s25  ;;  %v2921_v38 = vpop.f32.mrb[99].mxu1 }
 0x261   : > { %v3287_v25 = vsel %vm1044_vm8, %v5651_v19, %v3070_v11 }
 0x262   : > { %v3387_v34 = vadd.f32 %v5667_v49, %v3287_v25  ;;  %v3072_v61 = vpop.permute.xlu0 %3071 }
 0x263   : > { %v5811_v13 = vpop.f32.mrb[84].mxu0  ;;  %v3288_v26 = vsel %vm1044_vm8, %v5654_v27, %v3072_v61 }
 0x264   : > { %v2418_v31 = vpop.f32.mrb[85].mxu0  ;;  %3455 = vst [vmem:[%s5679_s26 + $0x140] sm:$0xff] %v3387_v34  ;;  %v3389_v36 = vadd.f32 %v5667_v49, %v3288_v26 }
 0x265   : > { %v5816_v9 = vpop.f32.mrb[86].mxu0  ;;  %v2924_v43 = vpop.f32.mrb[100].mxu1 }
 0x266   : > { %v2421_v8 = vpop.f32.mrb[87].mxu0  ;;  %3457 = vst [vmem:[%s5679_s26 + $0x150] sm:$0xff] %v3389_v36  ;;  %3197 = vrot.lane.b32.xlu1 %v2924_v43, %s4005_s25  ;;  %v2926_v30 = vpop.f32.mrb[101].mxu1 }
 0x267   : > { %v2927_v19 = vpop.f32.mrb[102].mxu1 }
 0x268   : > { %v3074_v23 = vpop.permute.xlu1 %3073  ;;  %3199 = vrot.lane.b32.xlu0 %v2927_v19, %s4005_s25  ;;  %v2929_v29 = vpop.f32.mrb[103].mxu1 }
 0x269   : > { %v3289_v27 = vsel %vm1044_vm8, %v5669_v53, %v3074_v23 }
 0x26a   : > { %v3391_v22 = vadd.f32 %v5667_v49, %v3289_v27  ;;  %v3076_v62 = vpop.permute.xlu0 %3075 }
 0x26b   : > { %v5825_v7 = vpop.f32.mrb[88].mxu0  ;;  %v3290_v12 = vsel %vm1044_vm8, %v5674_v40, %v3076_v62 }
 0x26c   : > { %v2426_v18 = vpop.f32.mrb[89].mxu0  ;;  %3459 = vst [vmem:[%s5679_s26 + $0x160] sm:$0xff] %v3391_v22  ;;  %v3393_v15 = vadd.f32 %v5667_v49, %v3290_v12 }
 0x26d   : > { %v5830_v54 = vpop.f32.mrb[90].mxu0  ;;  %v2932_v46 = vpop.f32.mrb[104].mxu1 }
 0x26e   : > { %v2429_v0 = vpop.f32.mrb[91].mxu0  ;;  %3461 = vst [vmem:[%s5679_s26 + $0x170] sm:$0xff] %v3393_v15  ;;  %3201 = vrot.lane.b32.xlu1 %v2932_v46, %s4005_s25  ;;  %v2934_v37 = vpop.f32.mrb[105].mxu1 }
 0x26f   : > { %v2935_v53 = vpop.f32.mrb[106].mxu1 }
 0x270   : > { %v3078_v17 = vpop.permute.xlu1 %3077  ;;  %3203 = vrot.lane.b32.xlu0 %v2935_v53, %s4005_s25  ;;  %v2937_v1 = vpop.f32.mrb[107].mxu1 }
 0x271   : > { %v3291_v40 = vsel %vm1044_vm8, %v5685_v5, %v3078_v17 }
 0x272   : > { %v3395_v3 = vadd.f32 %v5667_v49, %v3291_v40  ;;  %v3080_v21 = vpop.permute.xlu0 %3079 }
 0x273   : > { %v5839_v60 = vpop.f32.mrb[92].mxu0  ;;  %v3292_v56 = vsel %vm1044_vm8, %v5690_v14, %v3080_v21 }
 0x274   : > { %v2434_v42 = vpop.f32.mrb[93].mxu0  ;;  %3463 = vst [vmem:[%s5679_s26 + $0x180] sm:$0xff] %v3395_v3  ;;  %v3397_v24 = vadd.f32 %v5667_v49, %v3292_v56 }
 0x275   : > { %v5844_v39 = vpop.f32.mrb[94].mxu0  ;;  %v2940_v33 = vpop.f32.mrb[108].mxu1 }
 0x276   : > { %v2437_v35 = vpop.f32.mrb[95].mxu0  ;;  %3465 = vst [vmem:[%s5679_s26 + $0x190] sm:$0xff] %v3397_v24  ;;  %3205 = vrot.lane.b32.xlu1 %v2940_v33, %s4005_s25  ;;  %v2942_v44 = vpop.f32.mrb[109].mxu1 }
 0x277   : > { %v2943_v5 = vpop.f32.mrb[110].mxu1 }
 0x278   : > { %v3082_v58 = vpop.permute.xlu1 %3081  ;;  %3207 = vrot.lane.b32.xlu0 %v2943_v5, %s4005_s25  ;;  %v2945_v31 = vpop.f32.mrb[111].mxu1 }
 0x279   : > { %v3293_v14 = vsel %vm1044_vm8, %v5699_v47, %v3082_v58 }
 0x27a   : > { %v3399_v38 = vadd.f32 %v5667_v49, %v3293_v14  ;;  %v3084_v34 = vpop.permute.xlu0 %3083 }
 0x27b   : > { %v5853_v63 = vpop.f32.mrb[96].mxu0  ;;  %v3294_v8 = vsel %vm1044_vm8, %v5704_v51, %v3084_v34  ;;  %v3343_v34 = vsub.s32 1, %v5649_v20 }
 0x27c   : > { %v2442_v11 = vpop.f32.mrb[97].mxu0  ;;  %3467 = vst [vmem:[%s5679_s26 + $0x1a0] sm:$0xff] %v3399_v38  ;;  %v3401_v26 = vadd.f32 %v5667_v49, %v3294_v8 }
 0x27d   : > { %v5858_v25 = vpop.f32.mrb[98].mxu0  ;;  %v2948_v36 = vpop.f32.mrb[112].mxu1 }
 0x27e   : > { %v2445_v61 = vpop.f32.mrb[99].mxu0  ;;  %3469 = vst [vmem:[%s5679_s26 + $0x1b0] sm:$0xff] %v3401_v26  ;;  %3209 = vrot.lane.b32.xlu1 %v2948_v36, %s4005_s25  ;;  %v2950_v43 = vpop.f32.mrb[113].mxu1 }
 0x27f   : > { %v2951_v47 = vpop.f32.mrb[114].mxu1  ;;  %v5911_v43 = vrot.slane %v5661_v41, %v3343_v34 }
 0x280   : > { %v3086_v19 = vpop.permute.xlu1 %3085  ;;  %3211 = vrot.lane.b32.xlu0 %v2951_v47, %s4005_s25  ;;  %v2953_v18 = vpop.f32.mrb[115].mxu1 }
 0x281   : > { %v3295_v51 = vsel %vm1044_vm8, %v5713_v2, %v3086_v19 }
 0x282   : > { %v3403_v29 = vadd.f32 %v5667_v49, %v3295_v51  ;;  %v3088_v22 = vpop.permute.xlu0 %3087 }
 0x283   : > { %v5867_v30 = vpop.f32.mrb[100].mxu0  ;;  %v3296_v0 = vsel %vm1044_vm8, %v5718_v59, %v3088_v22 }
 0x284   : > { %v2450_v23 = vpop.f32.mrb[101].mxu0  ;;  %3471 = vst [vmem:[%s5679_s26 + $0x1c0] sm:$0xff] %v3403_v29  ;;  %v3405_v12 = vadd.f32 %v5667_v49, %v3296_v0 }
 0x285   : > { %v5872_v27 = vpop.f32.mrb[102].mxu0  ;;  %v2956_v15 = vpop.f32.mrb[116].mxu1 }
 0x286   : > { %v2453_v62 = vpop.f32.mrb[103].mxu0  ;;  %3473 = vst [vmem:[%s5679_s26 + $0x1d0] sm:$0xff] %v3405_v12  ;;  %3213 = vrot.lane.b32.xlu1 %v2956_v15, %s4005_s25  ;;  %v2958_v46 = vpop.f32.mrb[117].mxu1 }
 0x287   : > { %v2959_v2 = vpop.f32.mrb[118].mxu1 }
 0x288   : > { %v3090_v53 = vpop.permute.xlu1 %3089  ;;  %3215 = vrot.lane.b32.xlu0 %v2959_v2, %s4005_s25  ;;  %v2961_v42 = vpop.f32.mrb[119].mxu1 }
 0x289   : > { %v3297_v59 = vsel %vm1044_vm8, %v5727_v50, %v3090_v53 }
 0x28a   : > { %v3407_v1 = vadd.f32 %v5667_v49, %v3297_v59  ;;  %v3092_v3 = vpop.permute.xlu0 %3091 }
 0x28b   : > { %v5881_v37 = vpop.f32.mrb[104].mxu0  ;;  %v3298_v35 = vsel %vm1044_vm8, %v5732_v6, %v3092_v3 }
 0x28c   : > { %v2458_v17 = vpop.f32.mrb[105].mxu0  ;;  %3475 = vst [vmem:[%s5679_s26 + $0x1e0] sm:$0xff] %v3407_v1  ;;  %v3409_v56 = vadd.f32 %v5667_v49, %v3298_v35 }
 0x28d   : > { %v5886_v40 = vpop.f32.mrb[106].mxu0  ;;  %v2964_v24 = vpop.f32.mrb[120].mxu1 }
 0x28e   : > { %v2461_v21 = vpop.f32.mrb[107].mxu0  ;;  %3477 = vst [vmem:[%s5679_s26 + $0x1f0] sm:$0xff] %v3409_v56  ;;  %3217 = vrot.lane.b32.xlu1 %v2964_v24, %s4005_s25  ;;  %v2966_v33 = vpop.f32.mrb[121].mxu1 }
 0x28f   : > { %v2967_v50 = vpop.f32.mrb[122].mxu1 }
 0x290   : > { %v3094_v5 = vpop.permute.xlu1 %3093  ;;  %3219 = vrot.lane.b32.xlu0 %v2967_v50, %s4005_s25  ;;  %v2969_v11 = vpop.f32.mrb[123].mxu1 }
 0x291   : > { %v3299_v6 = vsel %vm1044_vm8, %v5741_v4, %v3094_v5 }
 0x292   : > { %v3411_v31 = vadd.f32 %v5667_v49, %v3299_v6  ;;  %v3096_v38 = vpop.permute.xlu0 %3095 }
 0x293   : > { %v5895_v44 = vpop.f32.mrb[108].mxu0  ;;  %v3300_v8 = vsel %vm1044_vm8, %v5746_v16, %v3096_v38 }
 0x294   : > { %v2466_v58 = vpop.f32.mrb[109].mxu0  ;;  %3479 = vst [vmem:[%s5679_s26 + $0x200] sm:$0xff] %v3411_v31  ;;  %v3413_v26 = vadd.f32 %v5667_v49, %v3300_v8 }
 0x295   : > { %v5900_v14 = vpop.f32.mrb[110].mxu0  ;;  %v2972_v36 = vpop.f32.mrb[124].mxu1 }
 0x296   : > { %v2469_v61 = vpop.f32.mrb[111].mxu0  ;;  %3481 = vst [vmem:[%s5679_s26 + $0x210] sm:$0xff] %v3413_v26  ;;  %3221 = vrot.lane.b32.xlu1 %v2972_v36, %s4005_s25  ;;  %v2974_v4 = vpop.f32.mrb[125].mxu1 }
 0x297   : > { %v2975_v47 = vpop.f32.mrb[126].mxu1 }
 0x298   : > { %v3166_v20 = vpop.permute.xlu1 %3165  ;;  %3223 = vrot.lane.b32.xlu0 %v2975_v47, %s4005_s25  ;;  %v2977_v23 = vpop.f32.mrb[127].mxu1 }
 0x299   : > { %v3301_v49 = vsel %vm1044_vm8, %v5755_v55, %v3166_v20 }
 0x29a   : > { %v3348_v18 = vadd.f32 %v5911_v43, %v3301_v49  ;;  %v3168_v29 = vpop.permute.xlu0 %3167 }
 0x29b   : > { %v5913_v19 = vpop.f32.mrb[112].mxu0  ;;  %v3302_v41 = vsel %vm1044_vm8, %v5760_v57, %v3168_v29 }
 0x29c   : > { %v2474_v16 = vpop.f32.mrb[113].mxu0  ;;  %3416 = vst [vmem:[%s5679_s26 + $0x8] sm:$0xff] %v3348_v18  ;;  %v3350_v62 = vadd.f32 %v5911_v43, %v3302_v41 }
 0x29d   : > { %v5918_v51 = vpop.f32.mrb[114].mxu0  ;;  %v2980_v0 = vpop.f32.mrb[128].mxu1 }
 0x29e   : > { %v2477_v22 = vpop.f32.mrb[115].mxu0  ;;  %3418 = vst [vmem:[%s5679_s26 + $0x18] sm:$0xff] %v3350_v62  ;;  %3225 = vrot.lane.b32.xlu1 %v2980_v0, %s4005_s25  ;;  %v2982_v12 = vpop.f32.mrb[129].mxu1 }
 0x29f   : > { %v2983_v55 = vpop.f32.mrb[130].mxu1 }
 0x2a0   : > { %v3170_v46 = vpop.permute.xlu1 %3169  ;;  %3227 = vrot.lane.b32.xlu0 %v2983_v55, %s4005_s25  ;;  %v2985_v53 = vpop.f32.mrb[131].mxu1 }
 0x2a1   : > { %v3303_v57 = vsel %vm1044_vm8, %v5769_v45, %v3170_v46 }
 0x2a2   : > { %v3352_v59 = vadd.f32 %v5911_v43, %v3303_v57  ;;  %v3172_v42 = vpop.permute.xlu0 %3171 }
 0x2a3   : > { %v5927_v15 = vpop.f32.mrb[116].mxu0  ;;  %v3304_v3 = vsel %vm1044_vm8, %v5774_v32, %v3172_v42 }
 0x2a4   : > { %v2482_v2 = vpop.f32.mrb[117].mxu0  ;;  %3420 = vst [vmem:[%s5679_s26 + $0x28] sm:$0xff] %v3352_v59  ;;  %v3354_v21 = vadd.f32 %v5911_v43, %v3304_v3 }
 0x2a5   : > { %v5932_v17 = vpop.f32.mrb[118].mxu0  ;;  %v2988_v35 = vpop.f32.mrb[132].mxu1 }
 0x2a6   : > { %v2485_v1 = vpop.f32.mrb[119].mxu0  ;;  %3422 = vst [vmem:[%s5679_s26 + $0x38] sm:$0xff] %v3354_v21  ;;  %3229 = vrot.lane.b32.xlu1 %v2988_v35, %s4005_s25  ;;  %v2990_v45 = vpop.f32.mrb[133].mxu1 }
 0x2a7   : > { %v2991_v56 = vpop.f32.mrb[134].mxu1 }
 0x2a8   : > { %v3174_v33 = vpop.permute.xlu1 %3173  ;;  %3231 = vrot.lane.b32.xlu0 %v2991_v56, %s4005_s25  ;;  %v2993_v5 = vpop.f32.mrb[135].mxu1  ;;  %s3788_s25 = smul.u32 8704, %s4050_s16  ;;  %s6089_s16 = scalar_lea.sflag [#allocation4], %s161_s17 }
 0x2a9   : > { %v3305_v32 = vsel %vm1044_vm8, %v5783_v10, %v3174_v33 }
 0x2aa   : > { %v3356_v6 = vadd.f32 %v5911_v43, %v3305_v32  ;;  %v3176_v11 = vpop.permute.xlu0 %3175  ;;  %s6080_s4 = scalar_lea.hbm %s6133_s3, %s3788_s25 }
 0x2ab   : > { %v5941_v24 = vpop.f32.mrb[120].mxu0  ;;  %v3306_v38 = vsel %vm1044_vm8, %v5788_v48, %v3176_v11 }
 0x2ac   : > { %v2490_v50 = vpop.f32.mrb[121].mxu0  ;;  %3424 = vst [vmem:[%s5679_s26 + $0x48] sm:$0xff] %v3356_v6  ;;  %v3358_v34 = vadd.f32 %v5911_v43, %v3306_v38 }
 0x2ad   : > { %v5946_v58 = vpop.f32.mrb[122].mxu0 }
 0x2ae   : > { %v2493_v31 = vpop.f32.mrb[123].mxu0  ;;  %3426 = vst [vmem:[%s5679_s26 + $0x58] sm:$0xff] %v3358_v34 }
 0x2b0   : > { %v3178_v8 = vpop.permute.xlu1 %3177 }
 0x2b1   : > { %v3307_v26 = vsel %vm1044_vm8, %v5797_v28, %v3178_v8 }
 0x2b2   : > { %v3360_v4 = vadd.f32 %v5911_v43, %v3307_v26  ;;  %v3180_v47 = vpop.permute.xlu0 %3179 }
 0x2b3   : > { %v5954_v61 = vpop.f32.mrb[124].mxu0  ;;  %v3308_v48 = vsel %vm1044_vm8, %v5802_v52, %v3180_v47 }
 0x2b4   : > { %v2498_v10 = vpop.f32.mrb[125].mxu0  ;;  %3428 = vst [vmem:[%s5679_s26 + $0x68] sm:$0xff] %v3360_v4  ;;  %v3362_v16 = vadd.f32 %v5911_v43, %v3308_v48 }
 0x2b5   : > { %v5958_v36 = vpop.f32.mrb[126].mxu0 }
 0x2b6   : > { %v2501_v20 = vpop.f32.mrb[127].mxu0  ;;  %3430 = vst [vmem:[%s5679_s26 + $0x78] sm:$0xff] %v3362_v16 }
 0x2b8   : > { %v3182_v23 = vpop.permute.xlu1 %3181 }
 0x2b9   : > { %v3309_v28 = vsel %vm1044_vm8, %v5811_v13, %v3182_v23 }
 0x2ba   : > { %v3364_v22 = vadd.f32 %v5911_v43, %v3309_v28  ;;  %v3184_v41 = vpop.permute.xlu0 %3183 }
 0x2bb   : > { %v5966_v49 = vpop.f32.mrb[128].mxu0  ;;  %v3310_v52 = vsel %vm1044_vm8, %v5816_v9, %v3184_v41 }
 0x2bc   : > { %v2506_v18 = vpop.f32.mrb[129].mxu0  ;;  %3432 = vst [vmem:[%s5679_s26 + $0x88] sm:$0xff] %v3364_v22  ;;  %v3366_v0 = vadd.f32 %v5911_v43, %v3310_v52 }
 0x2bd   : > { %v5970_v29 = vpop.f32.mrb[130].mxu0 }
 0x2be   : > { %v2509_v62 = vpop.f32.mrb[131].mxu0  ;;  %3434 = vst [vmem:[%s5679_s26 + $0x98] sm:$0xff] %v3366_v0 }
 0x2c0   : > { %v3186_v12 = vpop.permute.xlu1 %3185 }
 0x2c1   : > { %v3311_v13 = vsel %vm1044_vm8, %v5825_v7, %v3186_v12 }
 0x2c2   : > { %v3368_v2 = vadd.f32 %v5911_v43, %v3311_v13  ;;  %v3188_v57 = vpop.permute.xlu0 %3187 }
 0x2c3   : > { %v5978_v55 = vpop.f32.mrb[132].mxu0  ;;  %v3312_v9 = vsel %vm1044_vm8, %v5830_v54, %v3188_v57 }
 0x2c4   : > { %v2514_v46 = vpop.f32.mrb[133].mxu0  ;;  %3436 = vst [vmem:[%s5679_s26 + $0xa8] sm:$0xff] %v3368_v2  ;;  %v3370_v42 = vadd.f32 %v5911_v43, %v3312_v9 }
 0x2c5   : > { %v5983_v53 = vpop.f32.mrb[134].mxu0 }
 0x2c6   : > { %v2517_v59 = vpop.f32.mrb[135].mxu0  ;;  %3438 = vst [vmem:[%s5679_s26 + $0xb8] sm:$0xff] %v3370_v42 }
 0x2c8   : > { %v3190_v1 = vpop.permute.xlu1 %3189 }
 0x2c9   : > { %v3313_v7 = vsel %vm1044_vm8, %v5839_v60, %v3190_v1 }
 0x2ca   : > { %v3372_v3 = vadd.f32 %v5911_v43, %v3313_v7  ;;  %v3192_v21 = vpop.permute.xlu0 %3191 }
 0x2cb   : > { %v3314_v35 = vsel %vm1044_vm8, %v5844_v39, %v3192_v21 }
 0x2cc   : > { %3440 = vst [vmem:[%s5679_s26 + $0xc8] sm:$0xff] %v3372_v3  ;;  %v3374_v54 = vadd.f32 %v5911_v43, %v3314_v35 }
 0x2ce   : > { %3442 = vst [vmem:[%s5679_s26 + $0xd8] sm:$0xff] %v3374_v54 }
 0x2d0   : > { %v3194_v45 = vpop.permute.xlu1 %3193 }
 0x2d1   : > { %v3315_v56 = vsel %vm1044_vm8, %v5853_v63, %v3194_v45 }
 0x2d2   : > { %v3376_v33 = vadd.f32 %v5911_v43, %v3315_v56  ;;  %v3196_v50 = vpop.permute.xlu0 %3195 }
 0x2d3   : > { %v3316_v60 = vsel %vm1044_vm8, %v5858_v25, %v3196_v50 }
 0x2d4   : > { %3444 = vst [vmem:[%s5679_s26 + $0xe8] sm:$0xff] %v3376_v33  ;;  %v3378_v39 = vadd.f32 %v5911_v43, %v3316_v60 }
 0x2d6   : > { %3446 = vst [vmem:[%s5679_s26 + $0xf8] sm:$0xff] %v3378_v39 }
 0x2d8   : > { %v3198_v32 = vpop.permute.xlu1 %3197 }
 0x2d9   : > { %v3317_v5 = vsel %vm1044_vm8, %v5867_v30, %v3198_v32 }
 0x2da   : > { %v3380_v6 = vadd.f32 %v5911_v43, %v3317_v5  ;;  %v3200_v11 = vpop.permute.xlu0 %3199 }
 0x2db   : > { %v3318_v63 = vsel %vm1044_vm8, %v5872_v27, %v3200_v11 }
 0x2dc   : > { %3448 = vst [vmem:[%s5679_s26 + $0x108] sm:$0xff] %v3380_v6  ;;  %v3382_v25 = vadd.f32 %v5911_v43, %v3318_v63 }
 0x2de   : > { %3450 = vst [vmem:[%s5679_s26 + $0x118] sm:$0xff] %v3382_v25 }
 0x2e0   : > { %v3202_v31 = vpop.permute.xlu1 %3201 }
 0x2e1   : > { %v3319_v38 = vsel %vm1044_vm8, %v5881_v37, %v3202_v31 }
 0x2e2   : > { %v3384_v34 = vadd.f32 %v5911_v43, %v3319_v38  ;;  %v3204_v8 = vpop.permute.xlu0 %3203 }
 0x2e3   : > { %v3320_v30 = vsel %vm1044_vm8, %v5886_v40, %v3204_v8 }
 0x2e4   : > { %3452 = vst [vmem:[%s5679_s26 + $0x128] sm:$0xff] %v3384_v34  ;;  %v3386_v27 = vadd.f32 %v5911_v43, %v3320_v30 }
 0x2e6   : > { %3454 = vst [vmem:[%s5679_s26 + $0x138] sm:$0xff] %v3386_v27 }
 0x2e8   : > { %v3206_v10 = vpop.permute.xlu1 %3205 }
 0x2e9   : > { %v3321_v26 = vsel %vm1044_vm8, %v5895_v44, %v3206_v10 }
 0x2ea   : > { %v3388_v4 = vadd.f32 %v5911_v43, %v3321_v26  ;;  %v3208_v47 = vpop.permute.xlu0 %3207 }
 0x2eb   : > { %v3322_v37 = vsel %vm1044_vm8, %v5900_v14, %v3208_v47 }
 0x2ec   : > { %3456 = vst [vmem:[%s5679_s26 + $0x148] sm:$0xff] %v3388_v4  ;;  %v3390_v40 = vadd.f32 %v5911_v43, %v3322_v37 }
 0x2ee   : > { %3458 = vst [vmem:[%s5679_s26 + $0x158] sm:$0xff] %v3390_v40 }
 0x2f0   : > { %v3210_v20 = vpop.permute.xlu1 %3209 }
 0x2f1   : > { %v3323_v48 = vsel %vm1044_vm8, %v5913_v19, %v3210_v20 }
 0x2f2   : > { %v3392_v16 = vadd.f32 %v5911_v43, %v3323_v48  ;;  %v3212_v23 = vpop.permute.xlu0 %3211 }
 0x2f3   : > { %v3324_v44 = vsel %vm1044_vm8, %v5918_v51, %v3212_v23 }
 0x2f4   : > { %3460 = vst [vmem:[%s5679_s26 + $0x168] sm:$0xff] %v3392_v16  ;;  %v3394_v14 = vadd.f32 %v5911_v43, %v3324_v44 }
 0x2f6   : > { %3462 = vst [vmem:[%s5679_s26 + $0x178] sm:$0xff] %v3394_v14 }
 0x2f8   : > { %v3214_v18 = vpop.permute.xlu1 %3213 }
 0x2f9   : > { %v3325_v28 = vsel %vm1044_vm8, %v5927_v15, %v3214_v18 }
 0x2fa   : > { %v3396_v22 = vadd.f32 %v5911_v43, %v3325_v28  ;;  %v3216_v41 = vpop.permute.xlu0 %3215 }
 0x2fb   : > { %v3326_v19 = vsel %vm1044_vm8, %v5932_v17, %v3216_v41 }
 0x2fc   : > { %3464 = vst [vmem:[%s5679_s26 + $0x188] sm:$0xff] %v3396_v22  ;;  %v3398_v51 = vadd.f32 %v5911_v43, %v3326_v19 }
 0x2fe   : > { %3466 = vst [vmem:[%s5679_s26 + $0x198] sm:$0xff] %v3398_v51 }
 0x300   : > { %v3218_v62 = vpop.permute.xlu1 %3217 }
 0x301   : > { %v3327_v52 = vsel %vm1044_vm8, %v5941_v24, %v3218_v62 }
 0x302   : > { %v3400_v0 = vadd.f32 %v5911_v43, %v3327_v52  ;;  %v3220_v12 = vpop.permute.xlu0 %3219 }
 0x303   : > { %v3328_v15 = vsel %vm1044_vm8, %v5946_v58, %v3220_v12 }
 0x304   : > { %3468 = vst [vmem:[%s5679_s26 + $0x1a8] sm:$0xff] %v3400_v0  ;;  %v3402_v17 = vadd.f32 %v5911_v43, %v3328_v15 }
 0x306   : > { %3470 = vst [vmem:[%s5679_s26 + $0x1b8] sm:$0xff] %v3402_v17 }
 0x308   : > { %v3222_v13 = vpop.permute.xlu1 %3221 }
 0x309   : > { %v3329_v46 = vsel %vm1044_vm8, %v5954_v61, %v3222_v13 }
 0x30a   : > { %v3404_v2 = vadd.f32 %v5911_v43, %v3329_v46  ;;  %v3224_v24 = vpop.permute.xlu0 %3223 }
 0x30b   : > { %v3330_v57 = vsel %vm1044_vm8, %v5958_v36, %v3224_v24 }
 0x30c   : > { %3472 = vst [vmem:[%s5679_s26 + $0x1c8] sm:$0xff] %v3404_v2  ;;  %v3406_v58 = vadd.f32 %v5911_v43, %v3330_v57 }
 0x30e   : > { %3474 = vst [vmem:[%s5679_s26 + $0x1d8] sm:$0xff] %v3406_v58 }
 0x310   : > { %v3226_v9 = vpop.permute.xlu1 %3225 }
 0x311   : > { %v3331_v59 = vsel %vm1044_vm8, %v5966_v49, %v3226_v9 }
 0x312   : > { %v3408_v42 = vadd.f32 %v5911_v43, %v3331_v59  ;;  %v3228_v1 = vpop.permute.xlu0 %3227 }
 0x313   : > { %v3332_v61 = vsel %vm1044_vm8, %v5970_v29, %v3228_v1 }
 0x314   : > { %3476 = vst [vmem:[%s5679_s26 + $0x1e8] sm:$0xff] %v3408_v42  ;;  %v3410_v36 = vadd.f32 %v5911_v43, %v3332_v61 }
 0x316   : > { %3478 = vst [vmem:[%s5679_s26 + $0x1f8] sm:$0xff] %v3410_v36 }
 0x318   : > { %v3230_v7 = vpop.permute.xlu1 %3229 }
 0x319   : > { %v3333_v3 = vsel %vm1044_vm8, %v5978_v55, %v3230_v7 }
 0x31a   : > { %v3412_v49 = vadd.f32 %v5911_v43, %v3333_v3  ;;  %v3232_v21 = vpop.permute.xlu0 %3231 }
 0x31b   : > { %v3334_v35 = vsel %vm1044_vm8, %v5983_v53, %v3232_v21 }
 0x31c   : > { %3480 = vst [vmem:[%s5679_s26 + $0x208] sm:$0xff] %v3412_v49  ;;  %v3414_v29 = vadd.f32 %v5911_v43, %v3334_v35 }
 0x31e   : > { %3482 = vst [vmem:[%s5679_s26 + $0x218] sm:$0xff] %v3414_v29 }
 0x31f   : > { %3953 = shalt.err (!%p3950_p3)
}
 0x320   : > { %s3954_s9 = scalar_lea.hbm %s6080_s4, 8704  ;;  %s3958_s30 = scalar_lea.hbm %s6133_s3, 17408 }
 0x321   : > { %p3955_p4 = scmp.ne.s32.totalorder %s6080_s4, %s3954_s9  ;;  %p3959_p9 = scmp.lt.u32.totalorder %s6080_s4, %s6133_s3 }
 0x322   : > { %p3960_p10 = scmp.lt.u32.totalorder %s3958_s30, %s3954_s9  ;;  %p3962_p12 = scmp.lt.u32.totalorder %s3954_s9, %s6080_s4 }
 0x323   : > { %p3956_p7 = pnand %p3955_p4, %p4067_p5 }
 0x324   : > { %p3961_p11 = por %p3960_p10, %p3959_p9 }
 0x325   : > { %p3957_p8 = pneg %p3956_p7 }
 0x326   : > { %p3963_p13 = por %p3962_p12, %p3961_p11 }
 0x328   : > { %p3964_p0 = pnand %p3963_p13, %p3957_p8 }
 0x32a   : > { %3967 = shalt.err (!%p3964_p0)
}
 0x32b   : > { %s4007_s20 = smov 256   ;;  %s4008_s24 = smov 16  }
 0x32c   : > { %3789 = dma.vmem_to_hbm [thread:$0]  (%p4067_p5), %s6084_s27, 8704, %s6080_s4, %s6089_s16, %s4007_s20, %s4007_s20, %s4008_s24  }
 0x32d PF: > { %p3795_p1 = scmp.ge.s32.totalorder %s4002_s15, 2  ;;  %s3512_s26 = sand.u32 1, %s3990_s12  }
 0x32e   : > { %s3513_s25 = scalar_lea.sflag [#allocation4], %s3512_s26 }
 0x32f   : > { %p3792_p2 = pnand %p3795_p1, %p4071_p6 }
 0x331   : > { %3985 = dma.done.wait (!%p3792_p2), %s3513_s25, 8704  }
 0x332   : > { %3987 = vsyncadd (!%p3792_p2), %s3513_s25, 4294958592  ;;  %p13_p3 = scmp.ge.s32.totalorder %s4054_s18, 4   ;;  %s6430_s12 = smov %s3994_s13 }
 0x333   : > { %s6431_s13 = smov %s3998_s14  ;;  %s6432_s14 = smov %s4065_s21 }
 0x334   : > { %s6433_s15 = smov %s4054_s18  ;;  %15 = sbr.rel (!%p13_p3) target bundleno = 3 (0x3), region = 85 }
 0x33b   :  { %3518 = vsyncpa [#allocation4], 1 }
 0x33c   :  { %3520 = vsyncpa [#allocation4 + $0x1], 1 }

</bundles_post_ra>
